<compile_context>
chip_gen: v7x
topology: tpu7x:2x2x1
jax: 0.10.0
libtpu: 0.0.40
codegen_flags: <defaults>
</compile_context>

<pallas_src>
import jax
import jax.numpy as jnp
from jax import lax
from jax.experimental import pallas as pl
from jax.experimental.pallas import tpu as pltpu

LANE = 128                     # channel dims padded to a multiple of the lane width
STORE_DTYPE = jnp.bfloat16     # HBM storage dtype for activations / matmul weights
BN_EPS = 1e-3                  # batch_norm_epsilon of MBConvBlock
SC_BN_EPS = 1e-5               # torch.nn.BatchNorm2d default (shortcut branch)
MAX_TILE_ROWS = 8              # output rows per grid step (bounds VMEM; v7x-safe)


def _silu(x):
    return x * jax.nn.sigmoid(x)


def _rup(n, m=LANE):
    return ((n + m - 1) // m) * m


def _pick_tile(n, cap=MAX_TILE_ROWS):
    for t in range(min(n, cap), 0, -1):
        if n % t == 0:
            return t
    return 1


# ---------------------------------------------------------------------------
# Kernel 1: expand 1x1 (+BN0+SiLU) fused with KxK depthwise (+BN1+SiLU),
#           strided output computed directly, pooled sums emitted for SE.
# ---------------------------------------------------------------------------
def _make_expand_dw_kernel(k, stride, th, Wo, H, W, pad, n_rows, wp_pad):
    sWo = stride * Wo

    def kernel(xp_ref, we_ref, s0_ref, b0_ref, wdw_ref, s1_ref, b1_ref,
               h_ref, psum_ref, *scratch):
        mid_p = we_ref.shape[1]
        t = pl.program_id(1)
        r0 = pl.multiple_of(t * (th * stride), th * stride)

        # ---- expand 1x1 on the input rows this tile needs (MXU, bf16->f32) ----
        xin = xp_ref[0, pl.ds(r0, n_rows), :, :]               # (n_rows, wp_pad, cin_p) bf16
        e = jnp.dot(xin.reshape(n_rows * wp_pad, xin.shape[-1]), we_ref[...],
                    preferred_element_type=jnp.float32)
        e = e * s0_ref[...] + b0_ref[...]
        e = _silu(e)
        e = e.reshape(n_rows, wp_pad, mid_p)

        # zero-out spatial-padding pixels (expand of zero-pad must be 0, not silu(b0))
        rows = r0 + lax.broadcasted_iota(jnp.int32, (n_rows, wp_pad), 0)
        cols = lax.broadcasted_iota(jnp.int32, (n_rows, wp_pad), 1)
        valid = (rows >= pad) & (rows < pad + H) & (cols >= pad) & (cols < pad + W)
        e = e * valid.astype(jnp.float32)[:, :, None]

        # ---- KxK depthwise shift-and-add (strided output computed directly) ----
        wv = wdw_ref[...]                                       # (k, k, mid_p) f32
        if stride == 1:
            acc = jnp.zeros((th, Wo, mid_p), jnp.float32)
            for kh in range(k):
                rwin = e[kh:kh + th]                            # (th, wp_pad, mid_p)
                for kw in range(k):
                    acc = acc + rwin[:, kw:kw + Wo, :] * wv[kh, kw]
        else:
            # Rows are decimated with a layout-preserving leading-dim reshape;
            # columns accumulate at full resolution and a single sublane-strided
            # VMEM read picks every stride-th column.
            acc_scr = scratch[0]
            accw = jnp.zeros((th, sWo, mid_p), jnp.float32)
            for kh in range(k):
                rwin = e[kh:kh + stride * th]
                rwin = rwin.reshape(th, stride, wp_pad, mid_p)[:, 0]
                for kw in range(k):
                    accw = accw + rwin[:, kw:kw + sWo, :] * wv[kh, kw]
            acc_scr[...] = accw
            acc = acc_scr[:, pl.ds(0, Wo, stride), :]

        # ---- BN1 + SiLU; write activation tile + pooled partial sums for SE ----
        y = acc * s1_ref[...] + b1_ref[...]
        y = _silu(y)
        h_ref[...] = y[None].astype(h_ref.dtype)
        psum_ref[...] = jnp.sum(y, axis=(0, 1)).reshape(1, 1, 1, mid_p)

    return kernel


def expand_depthwise(x, bp):
    """x: (N, H, W, cin_p) bf16, lane-padded.  Returns
       h: (N, Ho, Wo, mid_p) bf16 (post expand+BN0+SiLU+depthwise+BN1+SiLU)
       pooled_sum: (N, mid_p) f32 (sum over Ho*Wo, for the SE pool)."""
    N, H, W, cin_p = x.shape
    k, stride, mid_p = bp['k'], bp['stride'], bp['mid_p']
    pad = (k - 1) // 2
    assert H % stride == 0 and W % stride == 0
    Ho, Wo = H // stride, W // stride
    # TODO(synk): generalize to Wo not a multiple of 8 (extra W padding + output mask).
    assert Wo % 8 == 0 and W % 8 == 0
    th = _pick_tile(Ho)
    n_ht = Ho // th
    n_rows = stride * th + k - 1
    Hp = H + 2 * pad
    wp_pad = _rup(W + 2 * pad, 16)          # 16: bf16 sublane-pack friendly
    xp = jnp.pad(x, ((0, 0), (pad, pad), (pad, wp_pad - W - pad), (0, 0)))

    kernel = _make_expand_dw_kernel(k, stride, th, Wo, H, W, pad, n_rows, wp_pad)
    scratch = [pltpu.VMEM((th, stride * Wo, mid_p), jnp.float32)] if stride > 1 else []
    h, psum = pl.pallas_call(
        kernel,
        out_shape=(jax.ShapeDtypeStruct((N, Ho, Wo, mid_p), STORE_DTYPE),
                   jax.ShapeDtypeStruct((N, n_ht, 1, mid_p), jnp.float32)),
        grid=(N, n_ht),
        in_specs=[
            pl.BlockSpec((1, Hp, wp_pad, cin_p), lambda n, t: (n, 0, 0, 0)),
            pl.BlockSpec((cin_p, mid_p), lambda n, t: (0, 0)),
            pl.BlockSpec((1, mid_p), lambda n, t: (0, 0)),
            pl.BlockSpec((1, mid_p), lambda n, t: (0, 0)),
            pl.BlockSpec((k, k, mid_p), lambda n, t: (0, 0, 0)),
            pl.BlockSpec((1, mid_p), lambda n, t: (0, 0)),
            pl.BlockSpec((1, mid_p), lambda n, t: (0, 0)),
        ],
        out_specs=(
            pl.BlockSpec((1, th, Wo, mid_p), lambda n, t: (n, t, 0, 0)),
            pl.BlockSpec((1, 1, 1, mid_p), lambda n, t: (n, t, 0, 0)),
        ),
        scratch_shapes=scratch,
        compiler_params=pltpu.CompilerParams(
            dimension_semantics=("parallel", "parallel")),
    )(xp, bp['w_expand'], bp['s0'], bp['b0'], bp['w_dw'], bp['s1'], bp['b1'])
    pooled_sum = jnp.sum(psum, axis=(1, 2))                     # (N, mid_p) f32
    return h, pooled_sum


# ---------------------------------------------------------------------------
# Kernel 2: SE gating + project 1x1 (+BN2) + shortcut (+ fused conv+BN) + add
# ---------------------------------------------------------------------------
def _make_project_kernel(conv_shortcut):
    if conv_shortcut:
        def kernel(h_ref, g_ref, wp_ref, s2_ref, b2_ref,
                   xs_ref, wsc_ref, ssc_ref, bsc_ref, o_ref):
            _, th, Wo, mid_p = h_ref.shape
            cout_p = wp_ref.shape[1]
            hg = h_ref[0].astype(jnp.float32) * g_ref[...]       # (th, Wo, mid_p)
            y = jnp.dot(hg.reshape(th * Wo, mid_p).astype(STORE_DTYPE), wp_ref[...],
                        preferred_element_type=jnp.float32)
            y = y * s2_ref[...] + b2_ref[...]
            xs = xs_ref[0].astype(jnp.float32)                   # (th, Wo, cin_p)
            xs = xs.reshape(th * Wo, xs.shape[-1]).astype(STORE_DTYPE)
            r = jnp.dot(xs, wsc_ref[...], preferred_element_type=jnp.float32)
            r = r * ssc_ref[...] + bsc_ref[...]
            o_ref[...] = (y + r).reshape(1, th, Wo, cout_p).astype(o_ref.dtype)
    else:
        def kernel(h_ref, g_ref, wp_ref, s2_ref, b2_ref, res_ref, o_ref):
            _, th, Wo, mid_p = h_ref.shape
            cout_p = wp_ref.shape[1]
            hg = h_ref[0].astype(jnp.float32) * g_ref[...]
            y = jnp.dot(hg.reshape(th * Wo, mid_p).astype(STORE_DTYPE), wp_ref[...],
                        preferred_element_type=jnp.float32)
            y = y * s2_ref[...] + b2_ref[...]
            r = res_ref[0].astype(jnp.float32).reshape(th * Wo, cout_p)
            o_ref[...] = (y + r).reshape(1, th, Wo, cout_p).astype(o_ref.dtype)
    return kernel


def project_shortcut(h, gate, bp, shortcut_in):
    """h: (N, Ho, Wo, mid_p) bf16; gate: (N, mid_p) f32; shortcut_in: strided
       input (conv shortcut) or identity residual, (N, Ho, Wo, c_p) bf16."""
    N, Ho, Wo, mid_p = h.shape
    cout_p = bp['cout_p']
    th = _pick_tile(Ho)
    n_ht = Ho // th
    conv_sc = 'w_sc' in bp
    g3 = gate.reshape(N, 1, mid_p).astype(jnp.float32)

    in_specs = [
        pl.BlockSpec((1, th, Wo, mid_p), lambda n, t: (n, t, 0, 0)),
        pl.BlockSpec((1, 1, mid_p), lambda n, t: (n, 0, 0)),
        pl.BlockSpec((mid_p, cout_p), lambda n, t: (0, 0)),
        pl.BlockSpec((1, cout_p), lambda n, t: (0, 0)),
        pl.BlockSpec((1, cout_p), lambda n, t: (0, 0)),
    ]
    args = [h, g3, bp['w_proj'], bp['s2'], bp['b2']]
    if conv_sc:
        cin_p = shortcut_in.shape[-1]
        in_specs += [
            pl.BlockSpec((1, th, Wo, cin_p), lambda n, t: (n, t, 0, 0)),
            pl.BlockSpec((cin_p, cout_p), lambda n, t: (0, 0)),
            pl.BlockSpec((1, cout_p), lambda n, t: (0, 0)),
            pl.BlockSpec((1, cout_p), lambda n, t: (0, 0)),
        ]
        args += [shortcut_in, bp['w_sc'], bp['ssc'], bp['bsc']]
    else:
        in_specs.append(pl.BlockSpec((1, th, Wo, cout_p), lambda n, t: (n, t, 0, 0)))
        args.append(shortcut_in)

    return pl.pallas_call(
        _make_project_kernel(conv_sc),
        out_shape=jax.ShapeDtypeStruct((N, Ho, Wo, cout_p), STORE_DTYPE),
        grid=(N, n_ht),
        in_specs=in_specs,
        out_specs=pl.BlockSpec((1, th, Wo, cout_p), lambda n, t: (n, t, 0, 0)),
        compiler_params=pltpu.CompilerParams(
            dimension_semantics=("parallel", "parallel")),
    )(*args)


# ---------------------------------------------------------------------------
# Block / layer glue
# ---------------------------------------------------------------------------
def mbconv_forward(x, bp):
    """x: (N, H, W, cin_p) bf16 lane-padded.  Returns (N, Ho, Wo, cout_p) bf16."""
    N, H, W, _ = x.shape
    stride = bp['stride']
    Ho, Wo = H // stride, W // stride
    mid, mid_p = bp['mid'], bp['mid_p']

    h, pooled_sum = expand_depthwise(x, bp)

    # Tiny SE FCs in plain JAX (keeps the MXU tile from being >95% padding).
    pooled = pooled_sum[:, :mid] / float(Ho * Wo)                # (N, mid) f32
    hid = _silu(pooled @ bp['se_w1'] + bp['se_b1'])
    gate = jax.nn.sigmoid(hid @ bp['se_w2'] + bp['se_b2'])       # (N, mid)
    gate = jnp.pad(gate, ((0, 0), (0, mid_p - mid)))

    if 'w_sc' in bp:
        shortcut_in = x[:, ::stride, ::stride, :]    # small input; cheap XLA slice
    else:
        shortcut_in = x                              # identity skip (drop_connect = id in eval)
    return project_shortcut(h, gate, bp, shortcut_in)


def mblayer_forward(x_nchw, prepared):
    """NCHW in / NCHW out (PyTorch convention); eval-mode MBLayer."""
    x = jnp.transpose(x_nchw, (0, 2, 3, 1))                      # NCHW -> NHWC
    cin, cin_p = prepared[0]['cin'], prepared[0]['cin_p']
    x = jnp.pad(x, ((0, 0), (0, 0), (0, 0), (0, cin_p - cin))).astype(STORE_DTYPE)
    for bp in prepared:
        x = mbconv_forward(x, bp)
    out = x[..., :prepared[-1]['cout']].astype(jnp.float32)
    return jnp.transpose(out, (0, 3, 1, 2))                      # NHWC -> NCHW


# ---------------------------------------------------------------------------
# Parameters (deterministic synthetic init) + kernel-side preparation
# ---------------------------------------------------------------------------
def _bn_params(key, c):
    k1, k2, k3, k4 = jax.random.split(key, 4)
    return dict(
        gamma=1.0 + 0.1 * jax.random.normal(k1, (c,), jnp.float32),
        beta=0.1 * jax.random.normal(k2, (c,), jnp.float32),
        mean=0.1 * jax.random.normal(k3, (c,), jnp.float32),
        var=0.5 + jax.random.uniform(k4, (c,), jnp.float32),
    )


def _fold_bn(bn, eps, conv_bias=None):
    s = bn['gamma'] / jnp.sqrt(bn['var'] + eps)
    b = bn['beta'] - bn['mean'] * s
    if conv_bias is not None:
        b = b + conv_bias * s
    return s, b


def init_mbconv_params(key, cin, cout, ksize, stride, expand_ratio, se_ratio):
    mid = int(cin * expand_ratio)
    csq = max(1, int(cin * se_ratio))
    keys = jax.random.split(key, 12)
    p = dict(
        stride=stride,
        w_expand=0.1 * jax.random.normal(keys[0], (cin, mid), jnp.float32),
        bn0=_bn_params(keys[1], mid),
        w_dw=0.1 * jax.random.normal(keys[2], (ksize, ksize, mid), jnp.float32),
        bn1=_bn_params(keys[3], mid),
        se_w1=0.1 * jax.random.normal(keys[4], (mid, csq), jnp.float32),
        se_b1=0.1 * jax.random.normal(keys[5], (csq,), jnp.float32),
        se_w2=0.1 * jax.random.normal(keys[6], (csq, mid), jnp.float32),
        se_b2=0.1 * jax.random.normal(keys[7], (mid,), jnp.float32),
        w_proj=0.1 * jax.random.normal(keys[8], (mid, cout), jnp.float32),
        bn2=_bn_params(keys[9], cout),
    )
    if stride != 1 or cin != cout:          # shortcut = 1x1 conv (bias) + BN
        p['w_sc'] = 0.1 * jax.random.normal(keys[10], (cin, cout), jnp.float32)
        p['b_sc'] = 0.1 * jax.random.normal(keys[11], (cout,), jnp.float32)
        p['bn_sc'] = _bn_params(jax.random.fold_in(key, 99), cout)
    return p


def init_mblayer_params(key, cin, cout, ksize, stride, expand_ratio, se_ratio, num_layers):
    strides = [stride] + [1] * (num_layers - 1)
    params = []
    for s in strides:
        key, sub = jax.random.split(key)
        params.append(init_mbconv_params(sub, cin, cout, ksize, s, expand_ratio, se_ratio))
        cin = cout
    return params


def _pad_vec(v, n):
    return jnp.pad(v.astype(jnp.float32), (0, n - v.shape[0])).reshape(1, n)


def _pad_mat(w, r, c):
    return jnp.pad(w, ((0, r - w.shape[0]), (0, c - w.shape[1])))


def prepare_mbconv(p):
    """Fold BN into affine scale/bias, zero-pad channel dims to the 128-lane
    boundary (padded lanes stay exactly 0 end-to-end since padded scale/bias
    are 0 and SiLU(0)=0), cast matmul weights to the bf16 storage dtype."""
    k = p['w_dw'].shape[0]
    cin, mid = p['w_expand'].shape
    cout = p['w_proj'].shape[1]
    cin_p, mid_p, cout_p = _rup(cin), _rup(mid), _rup(cout)
    s0, b0 = _fold_bn(p['bn0'], BN_EPS)
    s1, b1 = _fold_bn(p['bn1'], BN_EPS)
    s2, b2 = _fold_bn(p['bn2'], BN_EPS)
    bp = dict(
        stride=p['stride'], k=k, cin=cin, mid=mid, cout=cout,
        cin_p=cin_p, mid_p=mid_p, cout_p=cout_p,
        w_expand=_pad_mat(p['w_expand'], cin_p, mid_p).astype(STORE_DTYPE),
        s0=_pad_vec(s0, mid_p), b0=_pad_vec(b0, mid_p),
        w_dw=jnp.pad(p['w_dw'], ((0, 0), (0, 0), (0, mid_p - mid))).astype(jnp.float32),
        s1=_pad_vec(s1, mid_p), b1=_pad_vec(b1, mid_p),
        se_w1=p['se_w1'].astype(jnp.float32), se_b1=p['se_b1'].astype(jnp.float32),
        se_w2=p['se_w2'].astype(jnp.float32), se_b2=p['se_b2'].astype(jnp.float32),
        w_proj=_pad_mat(p['w_proj'], mid_p, cout_p).astype(STORE_DTYPE),
        s2=_pad_vec(s2, cout_p), b2=_pad_vec(b2, cout_p),
    )
    if 'w_sc' in p:
        ssc, bsc = _fold_bn(p['bn_sc'], SC_BN_EPS, conv_bias=p['b_sc'])
        bp['w_sc'] = _pad_mat(p['w_sc'], cin_p, cout_p).astype(STORE_DTYPE)
        bp['ssc'] = _pad_vec(ssc, cout_p)
        bp['bsc'] = _pad_vec(bsc, cout_p)
    return bp


# ---------------------------------------------------------------------------
# Pure-JAX reference (independent path via lax.conv) for verification
# ---------------------------------------------------------------------------
def _bn_apply(x, bn, eps):
    return (x - bn['mean']) / jnp.sqrt(bn['var'] + eps) * bn['gamma'] + bn['beta']


def _mbconv_ref(x, p):
    stride = p['stride']
    h = jnp.einsum('nhwc,cd->nhwd', x, p['w_expand'])
    h = _silu(_bn_apply(h, p['bn0'], BN_EPS))
    k = p['w_dw'].shape[0]
    pd = (k - 1) // 2
    C = h.shape[-1]
    h = lax.conv_general_dilated(
        h, p['w_dw'].reshape(k, k, 1, C), window_strides=(stride, stride),
        padding=[(pd, pd), (pd, pd)],
        dimension_numbers=('NHWC', 'HWIO', 'NHWC'), feature_group_count=C)
    h = _silu(_bn_apply(h, p['bn1'], BN_EPS))
    pooled = jnp.mean(h, axis=(1, 2))
    g = _silu(pooled @ p['se_w1'] + p['se_b1'])
    g = jax.nn.sigmoid(g @ p['se_w2'] + p['se_b2'])
    h = h * g[:, None, None, :]
    y = _bn_apply(jnp.einsum('nhwc,cd->nhwd', h, p['w_proj']), p['bn2'], BN_EPS)
    if 'w_sc' in p:
        r = lax.conv_general_dilated(
            x, p['w_sc'][None, None, :, :], window_strides=(stride, stride),
            padding='VALID', dimension_numbers=('NHWC', 'HWIO', 'NHWC'))
        r = _bn_apply(r + p['b_sc'], p['bn_sc'], SC_BN_EPS)
    else:
        r = x
    return y + r


def _mblayer_ref(x_nchw, layer_params):
    x = jnp.transpose(x_nchw, (0, 2, 3, 1))
    for p in layer_params:
        x = _mbconv_ref(x, p)
    return jnp.transpose(x, (0, 3, 1, 2))


if __name__ == "__main__":
    key = jax.random.PRNGKey(0)
    k_in, k_par = jax.random.split(key)

    # PyTorch-style NCHW input: batch=2, in_channels=4, spatial=16x16
    x = jax.random.normal(k_in, (2, 4, 16, 16), jnp.float32)

    # MBLayer(in=4, out=8, kernel=3, stride=2, expand=6, se=0.25,
    #         drop_connect=0.2, num_layers=2)  -- eval mode
    params = init_mblayer_params(k_par, cin=4, cout=8, ksize=3, stride=2,
                                 expand_ratio=6, se_ratio=0.25, num_layers=2)
    prepared = [prepare_mbconv(p) for p in params]

    fwd = jax.jit(lambda a: mblayer_forward(a, prepared))
    out = jax.block_until_ready(fwd(x))
    ref = _mblayer_ref(x, params)

    assert out.shape == (2, 8, 8, 8), out.shape
    # Tolerance covers bf16 activation storage + bf16 MXU inputs vs f32 reference.
    err = float(jnp.max(jnp.abs(out - ref)))
    assert err < 2e-2, err
    print("KERNEL_OK")
</pallas_src>

<mosaic_0001>
module attributes {stable_mosaic.version = 11 : i64} {
  func.func @kernel(%arg0: i32, %arg1: i32, %arg2: memref<1x18x32x128xbf16, #tpu.memory_space<vmem>>, %arg3: memref<128x128xbf16, #tpu.memory_space<vmem>>, %arg4: memref<1x128xf32, #tpu.memory_space<vmem>>, %arg5: memref<1x128xf32, #tpu.memory_space<vmem>>, %arg6: memref<3x3x128xf32, #tpu.memory_space<vmem>>, %arg7: memref<1x128xf32, #tpu.memory_space<vmem>>, %arg8: memref<1x128xf32, #tpu.memory_space<vmem>>, %arg9: memref<1x8x8x128xbf16, #tpu.memory_space<vmem>>, %arg10: memref<1x1x1x128xf32, #tpu.memory_space<vmem>>, %arg11: memref<8x16x128xf32, #tpu.memory_space<vmem>>) attributes {dimension_semantics = [#tpu.dimension_semantics<parallel>, #tpu.dimension_semantics<parallel>], iteration_bounds = array<i64: 2, 1>, scalar_prefetch = 0 : i64, scratch_operands = 1 : i64, tpu.core_type = #tpu.core_type<tc>, window_params = [{transform_indices = @transform_0, window_bounds = array<i64: 1, 18, 32, 128>}, {pipeline_mode = #tpu.pipeline_mode<synchronous>, transform_indices = @transform_1, window_bounds = array<i64: 128, 128>}, {pipeline_mode = #tpu.pipeline_mode<synchronous>, transform_indices = @transform_2, window_bounds = array<i64: 1, 128>}, {pipeline_mode = #tpu.pipeline_mode<synchronous>, transform_indices = @transform_3, window_bounds = array<i64: 1, 128>}, {pipeline_mode = #tpu.pipeline_mode<synchronous>, transform_indices = @transform_4, window_bounds = array<i64: 3, 3, 128>}, {pipeline_mode = #tpu.pipeline_mode<synchronous>, transform_indices = @transform_5, window_bounds = array<i64: 1, 128>}, {pipeline_mode = #tpu.pipeline_mode<synchronous>, transform_indices = @transform_6, window_bounds = array<i64: 1, 128>}, {transform_indices = @transform_7, window_bounds = array<i64: 1, 8, 8, 128>}, {transform_indices = @transform_8, window_bounds = array<i64: 1, 1, 1, 128>}]} {
    %c16_i32 = arith.constant 16 : i32
    %0 = arith.muli %arg1, %c16_i32 : i32
    %1 = tpu.assume_multiple %0, 16 : i32
    %c0 = arith.constant 0 : index
    %2 = arith.index_cast %1 : i32 to index
    %c0_0 = arith.constant 0 : index
    %c0_1 = arith.constant 0 : index
    %3 = vector.load %arg2[%c0, %2, %c0_0, %c0_1] : memref<1x18x32x128xbf16, #tpu.memory_space<vmem>>, vector<1x18x32x128xbf16>
    %4 = vector.shape_cast %3 : vector<1x18x32x128xbf16> to vector<18x32x128xbf16>
    %5 = vector.shape_cast %4 : vector<18x32x128xbf16> to vector<576x128xbf16>
    %c0_2 = arith.constant 0 : index
    %c0_3 = arith.constant 0 : index
    %6 = vector.load %arg3[%c0_2, %c0_3] : memref<128x128xbf16, #tpu.memory_space<vmem>>, vector<128x128xbf16>
    %cst = arith.constant dense<0.000000e+00> : vector<576x128xf32>
    %7 = tpu.matmul %5, %6, %cst {dimension_numbers = #tpu.dot_dimension_numbers<[1], [0], [0], [1], [0, 0, 1, 1], [], []>} : vector<576x128xbf16>, vector<128x128xbf16>, vector<576x128xf32> -> vector<576x128xf32>
    %c0_4 = arith.constant 0 : index
    %c0_5 = arith.constant 0 : index
    %8 = vector.load %arg4[%c0_4, %c0_5] : memref<1x128xf32, #tpu.memory_space<vmem>>, vector<1x128xf32>
    %9 = vector.broadcast %8 : vector<1x128xf32> to vector<576x128xf32>
    %10 = arith.mulf %7, %9 : vector<576x128xf32>
    %c0_6 = arith.constant 0 : index
    %c0_7 = arith.constant 0 : index
    %11 = vector.load %arg5[%c0_6, %c0_7] : memref<1x128xf32, #tpu.memory_space<vmem>>, vector<1x128xf32>
    %12 = vector.broadcast %11 : vector<1x128xf32> to vector<576x128xf32>
    %13 = arith.addf %10, %12 : vector<576x128xf32>
    %14 = arith.negf %13 : vector<576x128xf32>
    %15 = math.exp %14 : vector<576x128xf32>
    %cst_8 = arith.constant 1.000000e+00 : f32
    %16 = vector.broadcast %cst_8 : f32 to vector<576x128xf32>
    %17 = arith.addf %16, %15 : vector<576x128xf32>
    %18 = arith.divf %16, %17 : vector<576x128xf32>
    %19 = arith.mulf %13, %18 : vector<576x128xf32>
    %20 = vector.shape_cast %19 : vector<576x128xf32> to vector<18x32x128xf32>
    %21 = tpu.iota {dimensions = array<i32: 0>} : vector<18x32xi32>
    %22 = vector.broadcast %1 : i32 to vector<18x32xi32>
    %23 = arith.addi %22, %21 : vector<18x32xi32>
    %24 = tpu.iota {dimensions = array<i32: 1>} : vector<18x32xi32>
    %c1_i32 = arith.constant 1 : i32
    %25 = vector.broadcast %c1_i32 : i32 to vector<18x32xi32>
    %26 = arith.cmpi sge, %23, %25 : vector<18x32xi32>
    %c17_i32 = arith.constant 17 : i32
    %27 = vector.broadcast %c17_i32 : i32 to vector<18x32xi32>
    %28 = arith.cmpi slt, %23, %27 : vector<18x32xi32>
    %29 = arith.andi %26, %28 : vector<18x32xi1>
    %c1_i32_9 = arith.constant 1 : i32
    %30 = vector.broadcast %c1_i32_9 : i32 to vector<18x32xi32>
    %31 = arith.cmpi sge, %24, %30 : vector<18x32xi32>
    %32 = arith.andi %29, %31 : vector<18x32xi1>
    %c17_i32_10 = arith.constant 17 : i32
    %33 = vector.broadcast %c17_i32_10 : i32 to vector<18x32xi32>
    %34 = arith.cmpi slt, %24, %33 : vector<18x32xi32>
    %35 = arith.andi %32, %34 : vector<18x32xi1>
    %36 = arith.extui %35 : vector<18x32xi1> to vector<18x32xi32>
    %37 = arith.sitofp %36 : vector<18x32xi32> to vector<18x32xf32>
    %38 = vector.shape_cast %37 : vector<18x32xf32> to vector<18x32x1xf32>
    %39 = vector.broadcast %38 : vector<18x32x1xf32> to vector<18x32x128xf32>
    %40 = arith.mulf %20, %39 : vector<18x32x128xf32>
    %c0_11 = arith.constant 0 : index
    %c0_12 = arith.constant 0 : index
    %c0_13 = arith.constant 0 : index
    %41 = vector.load %arg6[%c0_11, %c0_12, %c0_13] : memref<3x3x128xf32, #tpu.memory_space<vmem>>, vector<3x3x128xf32>
    %cst_14 = arith.constant 0.000000e+00 : f32
    %42 = vector.broadcast %cst_14 : f32 to vector<8x16x128xf32>
    %43 = vector.extract_strided_slice %40 {offsets = [0, 0, 0], sizes = [16, 32, 128], strides = [1, 1, 1]} : vector<18x32x128xf32> to vector<16x32x128xf32>
    %44 = vector.shape_cast %43 : vector<16x32x128xf32> to vector<8x2x32x128xf32>
    %45 = vector.extract_strided_slice %44 {offsets = [0, 0, 0, 0], sizes = [8, 1, 32, 128], strides = [1, 1, 1, 1]} : vector<8x2x32x128xf32> to vector<8x1x32x128xf32>
    %46 = vector.shape_cast %45 : vector<8x1x32x128xf32> to vector<8x32x128xf32>
    %47 = vector.extract_strided_slice %46 {offsets = [0, 0, 0], sizes = [8, 16, 128], strides = [1, 1, 1]} : vector<8x32x128xf32> to vector<8x16x128xf32>
    %48 = vector.extract_strided_slice %41 {offsets = [0, 0, 0], sizes = [1, 1, 128], strides = [1, 1, 1]} : vector<3x3x128xf32> to vector<1x1x128xf32>
    %49 = vector.shape_cast %48 : vector<1x1x128xf32> to vector<128xf32>
    %50 = vector.shape_cast %49 : vector<128xf32> to vector<1x1x128xf32>
    %51 = vector.broadcast %50 : vector<1x1x128xf32> to vector<8x16x128xf32>
    %52 = arith.mulf %47, %51 : vector<8x16x128xf32>
    %53 = arith.addf %42, %52 : vector<8x16x128xf32>
    %54 = vector.extract_strided_slice %46 {offsets = [0, 1, 0], sizes = [8, 16, 128], strides = [1, 1, 1]} : vector<8x32x128xf32> to vector<8x16x128xf32>
    %55 = vector.extract_strided_slice %41 {offsets = [0, 1, 0], sizes = [1, 1, 128], strides = [1, 1, 1]} : vector<3x3x128xf32> to vector<1x1x128xf32>
    %56 = vector.shape_cast %55 : vector<1x1x128xf32> to vector<128xf32>
    %57 = vector.shape_cast %56 : vector<128xf32> to vector<1x1x128xf32>
    %58 = vector.broadcast %57 : vector<1x1x128xf32> to vector<8x16x128xf32>
    %59 = arith.mulf %54, %58 : vector<8x16x128xf32>
    %60 = arith.addf %53, %59 : vector<8x16x128xf32>
    %61 = vector.extract_strided_slice %46 {offsets = [0, 2, 0], sizes = [8, 16, 128], strides = [1, 1, 1]} : vector<8x32x128xf32> to vector<8x16x128xf32>
    %62 = vector.extract_strided_slice %41 {offsets = [0, 2, 0], sizes = [1, 1, 128], strides = [1, 1, 1]} : vector<3x3x128xf32> to vector<1x1x128xf32>
    %63 = vector.shape_cast %62 : vector<1x1x128xf32> to vector<128xf32>
    %64 = vector.shape_cast %63 : vector<128xf32> to vector<1x1x128xf32>
    %65 = vector.broadcast %64 : vector<1x1x128xf32> to vector<8x16x128xf32>
    %66 = arith.mulf %61, %65 : vector<8x16x128xf32>
    %67 = arith.addf %60, %66 : vector<8x16x128xf32>
    %68 = vector.extract_strided_slice %40 {offsets = [1, 0, 0], sizes = [16, 32, 128], strides = [1, 1, 1]} : vector<18x32x128xf32> to vector<16x32x128xf32>
    %69 = vector.shape_cast %68 : vector<16x32x128xf32> to vector<8x2x32x128xf32>
    %70 = vector.extract_strided_slice %69 {offsets = [0, 0, 0, 0], sizes = [8, 1, 32, 128], strides = [1, 1, 1, 1]} : vector<8x2x32x128xf32> to vector<8x1x32x128xf32>
    %71 = vector.shape_cast %70 : vector<8x1x32x128xf32> to vector<8x32x128xf32>
    %72 = vector.extract_strided_slice %71 {offsets = [0, 0, 0], sizes = [8, 16, 128], strides = [1, 1, 1]} : vector<8x32x128xf32> to vector<8x16x128xf32>
    %73 = vector.extract_strided_slice %41 {offsets = [1, 0, 0], sizes = [1, 1, 128], strides = [1, 1, 1]} : vector<3x3x128xf32> to vector<1x1x128xf32>
    %74 = vector.shape_cast %73 : vector<1x1x128xf32> to vector<128xf32>
    %75 = vector.shape_cast %74 : vector<128xf32> to vector<1x1x128xf32>
    %76 = vector.broadcast %75 : vector<1x1x128xf32> to vector<8x16x128xf32>
    %77 = arith.mulf %72, %76 : vector<8x16x128xf32>
    %78 = arith.addf %67, %77 : vector<8x16x128xf32>
    %79 = vector.extract_strided_slice %71 {offsets = [0, 1, 0], sizes = [8, 16, 128], strides = [1, 1, 1]} : vector<8x32x128xf32> to vector<8x16x128xf32>
    %80 = vector.extract_strided_slice %41 {offsets = [1, 1, 0], sizes = [1, 1, 128], strides = [1, 1, 1]} : vector<3x3x128xf32> to vector<1x1x128xf32>
    %81 = vector.shape_cast %80 : vector<1x1x128xf32> to vector<128xf32>
    %82 = vector.shape_cast %81 : vector<128xf32> to vector<1x1x128xf32>
    %83 = vector.broadcast %82 : vector<1x1x128xf32> to vector<8x16x128xf32>
    %84 = arith.mulf %79, %83 : vector<8x16x128xf32>
    %85 = arith.addf %78, %84 : vector<8x16x128xf32>
    %86 = vector.extract_strided_slice %71 {offsets = [0, 2, 0], sizes = [8, 16, 128], strides = [1, 1, 1]} : vector<8x32x128xf32> to vector<8x16x128xf32>
    %87 = vector.extract_strided_slice %41 {offsets = [1, 2, 0], sizes = [1, 1, 128], strides = [1, 1, 1]} : vector<3x3x128xf32> to vector<1x1x128xf32>
    %88 = vector.shape_cast %87 : vector<1x1x128xf32> to vector<128xf32>
    %89 = vector.shape_cast %88 : vector<128xf32> to vector<1x1x128xf32>
    %90 = vector.broadcast %89 : vector<1x1x128xf32> to vector<8x16x128xf32>
    %91 = arith.mulf %86, %90 : vector<8x16x128xf32>
    %92 = arith.addf %85, %91 : vector<8x16x128xf32>
    %93 = vector.extract_strided_slice %40 {offsets = [2, 0, 0], sizes = [16, 32, 128], strides = [1, 1, 1]} : vector<18x32x128xf32> to vector<16x32x128xf32>
    %94 = vector.shape_cast %93 : vector<16x32x128xf32> to vector<8x2x32x128xf32>
    %95 = vector.extract_strided_slice %94 {offsets = [0, 0, 0, 0], sizes = [8, 1, 32, 128], strides = [1, 1, 1, 1]} : vector<8x2x32x128xf32> to vector<8x1x32x128xf32>
    %96 = vector.shape_cast %95 : vector<8x1x32x128xf32> to vector<8x32x128xf32>
    %97 = vector.extract_strided_slice %96 {offsets = [0, 0, 0], sizes = [8, 16, 128], strides = [1, 1, 1]} : vector<8x32x128xf32> to vector<8x16x128xf32>
    %98 = vector.extract_strided_slice %41 {offsets = [2, 0, 0], sizes = [1, 1, 128], strides = [1, 1, 1]} : vector<3x3x128xf32> to vector<1x1x128xf32>
    %99 = vector.shape_cast %98 : vector<1x1x128xf32> to vector<128xf32>
    %100 = vector.shape_cast %99 : vector<128xf32> to vector<1x1x128xf32>
    %101 = vector.broadcast %100 : vector<1x1x128xf32> to vector<8x16x128xf32>
    %102 = arith.mulf %97, %101 : vector<8x16x128xf32>
    %103 = arith.addf %92, %102 : vector<8x16x128xf32>
    %104 = vector.extract_strided_slice %96 {offsets = [0, 1, 0], sizes = [8, 16, 128], strides = [1, 1, 1]} : vector<8x32x128xf32> to vector<8x16x128xf32>
    %105 = vector.extract_strided_slice %41 {offsets = [2, 1, 0], sizes = [1, 1, 128], strides = [1, 1, 1]} : vector<3x3x128xf32> to vector<1x1x128xf32>
    %106 = vector.shape_cast %105 : vector<1x1x128xf32> to vector<128xf32>
    %107 = vector.shape_cast %106 : vector<128xf32> to vector<1x1x128xf32>
    %108 = vector.broadcast %107 : vector<1x1x128xf32> to vector<8x16x128xf32>
    %109 = arith.mulf %104, %108 : vector<8x16x128xf32>
    %110 = arith.addf %103, %109 : vector<8x16x128xf32>
    %111 = vector.extract_strided_slice %96 {offsets = [0, 2, 0], sizes = [8, 16, 128], strides = [1, 1, 1]} : vector<8x32x128xf32> to vector<8x16x128xf32>
    %112 = vector.extract_strided_slice %41 {offsets = [2, 2, 0], sizes = [1, 1, 128], strides = [1, 1, 1]} : vector<3x3x128xf32> to vector<1x1x128xf32>
    %113 = vector.shape_cast %112 : vector<1x1x128xf32> to vector<128xf32>
    %114 = vector.shape_cast %113 : vector<128xf32> to vector<1x1x128xf32>
    %115 = vector.broadcast %114 : vector<1x1x128xf32> to vector<8x16x128xf32>
    %116 = arith.mulf %111, %115 : vector<8x16x128xf32>
    %117 = arith.addf %110, %116 : vector<8x16x128xf32>
    %c0_15 = arith.constant 0 : index
    %c0_16 = arith.constant 0 : index
    %c0_17 = arith.constant 0 : index
    %118 = vector.load %arg11[%c0_15, %c0_16, %c0_17] : memref<8x16x128xf32, #tpu.memory_space<vmem>>, vector<8x16x128xf32>
    tpu.vector_store %arg11[%c0_15, %c0_16, %c0_17], %117 {strides = array<i32>} : memref<8x16x128xf32, #tpu.memory_space<vmem>>, vector<8x16x128xf32>,
    %c0_18 = arith.constant 0 : index
    %c0_19 = arith.constant 0 : index
    %c0_20 = arith.constant 0 : index
    %119 = tpu.strided_load %arg11[%c0_18, %c0_19, %c0_20] {strides = array<i32: 1, 2, 1>} : memref<8x16x128xf32, #tpu.memory_space<vmem>>, vector<8x8x128xf32>
    %c0_21 = arith.constant 0 : index
    %c0_22 = arith.constant 0 : index
    %120 = vector.load %arg7[%c0_21, %c0_22] : memref<1x128xf32, #tpu.memory_space<vmem>>, vector<1x128xf32>
    %121 = vector.shape_cast %120 : vector<1x128xf32> to vector<1x1x128xf32>
    %122 = vector.broadcast %121 : vector<1x1x128xf32> to vector<8x8x128xf32>
    %123 = arith.mulf %119, %122 : vector<8x8x128xf32>
    %c0_23 = arith.constant 0 : index
    %c0_24 = arith.constant 0 : index
    %124 = vector.load %arg8[%c0_23, %c0_24] : memref<1x128xf32, #tpu.memory_space<vmem>>, vector<1x128xf32>
    %125 = vector.shape_cast %124 : vector<1x128xf32> to vector<1x1x128xf32>
    %126 = vector.broadcast %125 : vector<1x1x128xf32> to vector<8x8x128xf32>
    %127 = arith.addf %123, %126 : vector<8x8x128xf32>
    %128 = arith.negf %127 : vector<8x8x128xf32>
    %129 = math.exp %128 : vector<8x8x128xf32>
    %cst_25 = arith.constant 1.000000e+00 : f32
    %130 = vector.broadcast %cst_25 : f32 to vector<8x8x128xf32>
    %131 = arith.addf %130, %129 : vector<8x8x128xf32>
    %132 = arith.divf %130, %131 : vector<8x8x128xf32>
    %133 = arith.mulf %127, %132 : vector<8x8x128xf32>
    %134 = vector.shape_cast %133 : vector<8x8x128xf32> to vector<1x8x8x128xf32>
    %135 = arith.truncf %134 : vector<1x8x8x128xf32> to vector<1x8x8x128xbf16>
    %c0_26 = arith.constant 0 : index
    %c0_27 = arith.constant 0 : index
    %c0_28 = arith.constant 0 : index
    %c0_29 = arith.constant 0 : index
    %136 = vector.load %arg9[%c0_26, %c0_27, %c0_28, %c0_29] : memref<1x8x8x128xbf16, #tpu.memory_space<vmem>>, vector<1x8x8x128xbf16>
    tpu.vector_store %arg9[%c0_26, %c0_27, %c0_28, %c0_29], %135 {strides = array<i32>} : memref<1x8x8x128xbf16, #tpu.memory_space<vmem>>, vector<1x8x8x128xbf16>,
    %cst_30 = arith.constant dense<0.000000e+00> : vector<128xf32>
    %137 = vector.multi_reduction <add>, %133, %cst_30 [0, 1] : vector<8x8x128xf32> to vector<128xf32>
    %138 = vector.shape_cast %137 : vector<128xf32> to vector<1x1x1x128xf32>
    %c0_31 = arith.constant 0 : index
    %c0_32 = arith.constant 0 : index
    %c0_33 = arith.constant 0 : index
    %c0_34 = arith.constant 0 : index
    %139 = vector.load %arg10[%c0_31, %c0_32, %c0_33, %c0_34] : memref<1x1x1x128xf32, #tpu.memory_space<vmem>>, vector<1x1x1x128xf32>
    tpu.vector_store %arg10[%c0_31, %c0_32, %c0_33, %c0_34], %138 {strides = array<i32>} : memref<1x1x1x128xf32, #tpu.memory_space<vmem>>, vector<1x1x1x128xf32>,
    return
  }
  func.func @transform_0(%arg0: i32, %arg1: i32) -> (i32, i32, i32, i32) {
    %c0_i32 = arith.constant 0 : i32
    %c0_i32_0 = arith.constant 0 : i32
    %c0_i32_1 = arith.constant 0 : i32
    %c0_i32_2 = arith.constant 0 : i32
    return %arg0, %c0_i32, %c0_i32_0, %c0_i32_1 : i32, i32, i32, i32
  }
  func.func @transform_1(%arg0: i32, %arg1: i32) -> (i32, i32) {
    %c0_i32 = arith.constant 0 : i32
    %c0_i32_0 = arith.constant 0 : i32
    %c0_i32_1 = arith.constant 0 : i32
    return %c0_i32, %c0_i32_0 : i32, i32
  }
  func.func @transform_2(%arg0: i32, %arg1: i32) -> (i32, i32) {
    %c0_i32 = arith.constant 0 : i32
    %c0_i32_0 = arith.constant 0 : i32
    %c0_i32_1 = arith.constant 0 : i32
    return %c0_i32, %c0_i32_0 : i32, i32
  }
  func.func @transform_3(%arg0: i32, %arg1: i32) -> (i32, i32) {
    %c0_i32 = arith.constant 0 : i32
    %c0_i32_0 = arith.constant 0 : i32
    %c0_i32_1 = arith.constant 0 : i32
    return %c0_i32, %c0_i32_0 : i32, i32
  }
  func.func @transform_4(%arg0: i32, %arg1: i32) -> (i32, i32, i32) {
    %c0_i32 = arith.constant 0 : i32
    %c0_i32_0 = arith.constant 0 : i32
    %c0_i32_1 = arith.constant 0 : i32
    %c0_i32_2 = arith.constant 0 : i32
    return %c0_i32, %c0_i32_0, %c0_i32_1 : i32, i32, i32
  }
  func.func @transform_5(%arg0: i32, %arg1: i32) -> (i32, i32) {
    %c0_i32 = arith.constant 0 : i32
    %c0_i32_0 = arith.constant 0 : i32
    %c0_i32_1 = arith.constant 0 : i32
    return %c0_i32, %c0_i32_0 : i32, i32
  }
  func.func @transform_6(%arg0: i32, %arg1: i32) -> (i32, i32) {
    %c0_i32 = arith.constant 0 : i32
    %c0_i32_0 = arith.constant 0 : i32
    %c0_i32_1 = arith.constant 0 : i32
    return %c0_i32, %c0_i32_0 : i32, i32
  }
  func.func @transform_7(%arg0: i32, %arg1: i32) -> (i32, i32, i32, i32) {
    %c0_i32 = arith.constant 0 : i32
    %c0_i32_0 = arith.constant 0 : i32
    %c0_i32_1 = arith.constant 0 : i32
    return %arg0, %arg1, %c0_i32, %c0_i32_0 : i32, i32, i32, i32
  }
  func.func @transform_8(%arg0: i32, %arg1: i32) -> (i32, i32, i32, i32) {
    %c0_i32 = arith.constant 0 : i32
    %c0_i32_0 = arith.constant 0 : i32
    %c0_i32_1 = arith.constant 0 : i32
    return %arg0, %arg1, %c0_i32, %c0_i32_0 : i32, i32, i32, i32
  }
}

module attributes {stable_mosaic.version = 11 : i64} {
  func.func @kernel(%arg0: i32, %arg1: i32, %arg2: memref<1x8x8x128xbf16, #tpu.memory_space<vmem>>, %arg3: memref<1x1x128xf32, #tpu.memory_space<vmem>>, %arg4: memref<128x128xbf16, #tpu.memory_space<vmem>>, %arg5: memref<1x128xf32, #tpu.memory_space<vmem>>, %arg6: memref<1x128xf32, #tpu.memory_space<vmem>>, %arg7: memref<1x8x8x128xbf16, #tpu.memory_space<vmem>>, %arg8: memref<128x128xbf16, #tpu.memory_space<vmem>>, %arg9: memref<1x128xf32, #tpu.memory_space<vmem>>, %arg10: memref<1x128xf32, #tpu.memory_space<vmem>>, %arg11: memref<1x8x8x128xbf16, #tpu.memory_space<vmem>>) attributes {dimension_semantics = [#tpu.dimension_semantics<parallel>, #tpu.dimension_semantics<parallel>], iteration_bounds = array<i64: 2, 1>, scalar_prefetch = 0 : i64, scratch_operands = 0 : i64, tpu.core_type = #tpu.core_type<tc>, window_params = [{transform_indices = @transform_0, window_bounds = array<i64: 1, 8, 8, 128>}, {transform_indices = @transform_1, window_bounds = array<i64: 1, 1, 128>}, {pipeline_mode = #tpu.pipeline_mode<synchronous>, transform_indices = @transform_2, window_bounds = array<i64: 128, 128>}, {pipeline_mode = #tpu.pipeline_mode<synchronous>, transform_indices = @transform_3, window_bounds = array<i64: 1, 128>}, {pipeline_mode = #tpu.pipeline_mode<synchronous>, transform_indices = @transform_4, window_bounds = array<i64: 1, 128>}, {transform_indices = @transform_5, window_bounds = array<i64: 1, 8, 8, 128>}, {pipeline_mode = #tpu.pipeline_mode<synchronous>, transform_indices = @transform_6, window_bounds = array<i64: 128, 128>}, {pipeline_mode = #tpu.pipeline_mode<synchronous>, transform_indices = @transform_7, window_bounds = array<i64: 1, 128>}, {pipeline_mode = #tpu.pipeline_mode<synchronous>, transform_indices = @transform_8, window_bounds = array<i64: 1, 128>}, {transform_indices = @transform_9, window_bounds = array<i64: 1, 8, 8, 128>}]} {
    %c0 = arith.constant 0 : index
    %c0_0 = arith.constant 0 : index
    %c0_1 = arith.constant 0 : index
    %c0_2 = arith.constant 0 : index
    %0 = vector.load %arg2[%c0, %c0_0, %c0_1, %c0_2] : memref<1x8x8x128xbf16, #tpu.memory_space<vmem>>, vector<1x8x8x128xbf16>
    %1 = vector.shape_cast %0 : vector<1x8x8x128xbf16> to vector<8x8x128xbf16>
    %2 = arith.extf %1 : vector<8x8x128xbf16> to vector<8x8x128xf32>
    %c0_3 = arith.constant 0 : index
    %c0_4 = arith.constant 0 : index
    %c0_5 = arith.constant 0 : index
    %3 = vector.load %arg3[%c0_3, %c0_4, %c0_5] : memref<1x1x128xf32, #tpu.memory_space<vmem>>, vector<1x1x128xf32>
    %4 = vector.broadcast %3 : vector<1x1x128xf32> to vector<8x8x128xf32>
    %5 = arith.mulf %2, %4 : vector<8x8x128xf32>
    %6 = vector.shape_cast %5 : vector<8x8x128xf32> to vector<64x128xf32>
    %7 = arith.truncf %6 : vector<64x128xf32> to vector<64x128xbf16>
    %c0_6 = arith.constant 0 : index
    %c0_7 = arith.constant 0 : index
    %8 = vector.load %arg4[%c0_6, %c0_7] : memref<128x128xbf16, #tpu.memory_space<vmem>>, vector<128x128xbf16>
    %cst = arith.constant dense<0.000000e+00> : vector<64x128xf32>
    %9 = tpu.matmul %7, %8, %cst {dimension_numbers = #tpu.dot_dimension_numbers<[1], [0], [0], [1], [0, 0, 1, 1], [], []>} : vector<64x128xbf16>, vector<128x128xbf16>, vector<64x128xf32> -> vector<64x128xf32>
    %c0_8 = arith.constant 0 : index
    %c0_9 = arith.constant 0 : index
    %10 = vector.load %arg5[%c0_8, %c0_9] : memref<1x128xf32, #tpu.memory_space<vmem>>, vector<1x128xf32>
    %11 = vector.broadcast %10 : vector<1x128xf32> to vector<64x128xf32>
    %12 = arith.mulf %9, %11 : vector<64x128xf32>
    %c0_10 = arith.constant 0 : index
    %c0_11 = arith.constant 0 : index
    %13 = vector.load %arg6[%c0_10, %c0_11] : memref<1x128xf32, #tpu.memory_space<vmem>>, vector<1x128xf32>
    %14 = vector.broadcast %13 : vector<1x128xf32> to vector<64x128xf32>
    %15 = arith.addf %12, %14 : vector<64x128xf32>
    %c0_12 = arith.constant 0 : index
    %c0_13 = arith.constant 0 : index
    %c0_14 = arith.constant 0 : index
    %c0_15 = arith.constant 0 : index
    %16 = vector.load %arg7[%c0_12, %c0_13, %c0_14, %c0_15] : memref<1x8x8x128xbf16, #tpu.memory_space<vmem>>, vector<1x8x8x128xbf16>
    %17 = vector.shape_cast %16 : vector<1x8x8x128xbf16> to vector<8x8x128xbf16>
    %18 = arith.extf %17 : vector<8x8x128xbf16> to vector<8x8x128xf32>
    %19 = vector.shape_cast %18 : vector<8x8x128xf32> to vector<64x128xf32>
    %20 = arith.truncf %19 : vector<64x128xf32> to vector<64x128xbf16>
    %c0_16 = arith.constant 0 : index
    %c0_17 = arith.constant 0 : index
    %21 = vector.load %arg8[%c0_16, %c0_17] : memref<128x128xbf16, #tpu.memory_space<vmem>>, vector<128x128xbf16>
    %cst_18 = arith.constant dense<0.000000e+00> : vector<64x128xf32>
    %22 = tpu.matmul %20, %21, %cst_18 {dimension_numbers = #tpu.dot_dimension_numbers<[1], [0], [0], [1], [0, 0, 1, 1], [], []>} : vector<64x128xbf16>, vector<128x128xbf16>, vector<64x128xf32> -> vector<64x128xf32>
    %c0_19 = arith.constant 0 : index
    %c0_20 = arith.constant 0 : index
    %23 = vector.load %arg9[%c0_19, %c0_20] : memref<1x128xf32, #tpu.memory_space<vmem>>, vector<1x128xf32>
    %24 = vector.broadcast %23 : vector<1x128xf32> to vector<64x128xf32>
    %25 = arith.mulf %22, %24 : vector<64x128xf32>
    %c0_21 = arith.constant 0 : index
    %c0_22 = arith.constant 0 : index
    %26 = vector.load %arg10[%c0_21, %c0_22] : memref<1x128xf32, #tpu.memory_space<vmem>>, vector<1x128xf32>
    %27 = vector.broadcast %26 : vector<1x128xf32> to vector<64x128xf32>
    %28 = arith.addf %25, %27 : vector<64x128xf32>
    %29 = arith.addf %15, %28 : vector<64x128xf32>
    %30 = vector.shape_cast %29 : vector<64x128xf32> to vector<1x8x8x128xf32>
    %31 = arith.truncf %30 : vector<1x8x8x128xf32> to vector<1x8x8x128xbf16>
    %c0_23 = arith.constant 0 : index
    %c0_24 = arith.constant 0 : index
    %c0_25 = arith.constant 0 : index
    %c0_26 = arith.constant 0 : index
    %32 = vector.load %arg11[%c0_23, %c0_24, %c0_25, %c0_26] : memref<1x8x8x128xbf16, #tpu.memory_space<vmem>>, vector<1x8x8x128xbf16>
    tpu.vector_store %arg11[%c0_23, %c0_24, %c0_25, %c0_26], %31 {strides = array<i32>} : memref<1x8x8x128xbf16, #tpu.memory_space<vmem>>, vector<1x8x8x128xbf16>,
    return
  }
  func.func @transform_0(%arg0: i32, %arg1: i32) -> (i32, i32, i32, i32) {
    %c0_i32 = arith.constant 0 : i32
    %c0_i32_0 = arith.constant 0 : i32
    %c0_i32_1 = arith.constant 0 : i32
    return %arg0, %arg1, %c0_i32, %c0_i32_0 : i32, i32, i32, i32
  }
  func.func @transform_1(%arg0: i32, %arg1: i32) -> (i32, i32, i32) {
    %c0_i32 = arith.constant 0 : i32
    %c0_i32_0 = arith.constant 0 : i32
    %c0_i32_1 = arith.constant 0 : i32
    return %arg0, %c0_i32, %c0_i32_0 : i32, i32, i32
  }
  func.func @transform_2(%arg0: i32, %arg1: i32) -> (i32, i32) {
    %c0_i32 = arith.constant 0 : i32
    %c0_i32_0 = arith.constant 0 : i32
    %c0_i32_1 = arith.constant 0 : i32
    return %c0_i32, %c0_i32_0 : i32, i32
  }
  func.func @transform_3(%arg0: i32, %arg1: i32) -> (i32, i32) {
    %c0_i32 = arith.constant 0 : i32
    %c0_i32_0 = arith.constant 0 : i32
    %c0_i32_1 = arith.constant 0 : i32
    return %c0_i32, %c0_i32_0 : i32, i32
  }
  func.func @transform_4(%arg0: i32, %arg1: i32) -> (i32, i32) {
    %c0_i32 = arith.constant 0 : i32
    %c0_i32_0 = arith.constant 0 : i32
    %c0_i32_1 = arith.constant 0 : i32
    return %c0_i32, %c0_i32_0 : i32, i32
  }
  func.func @transform_5(%arg0: i32, %arg1: i32) -> (i32, i32, i32, i32) {
    %c0_i32 = arith.constant 0 : i32
    %c0_i32_0 = arith.constant 0 : i32
    %c0_i32_1 = arith.constant 0 : i32
    return %arg0, %arg1, %c0_i32, %c0_i32_0 : i32, i32, i32, i32
  }
  func.func @transform_6(%arg0: i32, %arg1: i32) -> (i32, i32) {
    %c0_i32 = arith.constant 0 : i32
    %c0_i32_0 = arith.constant 0 : i32
    %c0_i32_1 = arith.constant 0 : i32
    return %c0_i32, %c0_i32_0 : i32, i32
  }
  func.func @transform_7(%arg0: i32, %arg1: i32) -> (i32, i32) {
    %c0_i32 = arith.constant 0 : i32
    %c0_i32_0 = arith.constant 0 : i32
    %c0_i32_1 = arith.constant 0 : i32
    return %c0_i32, %c0_i32_0 : i32, i32
  }
  func.func @transform_8(%arg0: i32, %arg1: i32) -> (i32, i32) {
    %c0_i32 = arith.constant 0 : i32
    %c0_i32_0 = arith.constant 0 : i32
    %c0_i32_1 = arith.constant 0 : i32
    return %c0_i32, %c0_i32_0 : i32, i32
  }
  func.func @transform_9(%arg0: i32, %arg1: i32) -> (i32, i32, i32, i32) {
    %c0_i32 = arith.constant 0 : i32
    %c0_i32_0 = arith.constant 0 : i32
    %c0_i32_1 = arith.constant 0 : i32
    return %arg0, %arg1, %c0_i32, %c0_i32_0 : i32, i32, i32, i32
  }
}

module attributes {stable_mosaic.version = 11 : i64} {
  func.func @kernel(%arg0: i32, %arg1: i32, %arg2: memref<1x10x16x128xbf16, #tpu.memory_space<vmem>>, %arg3: memref<128x128xbf16, #tpu.memory_space<vmem>>, %arg4: memref<1x128xf32, #tpu.memory_space<vmem>>, %arg5: memref<1x128xf32, #tpu.memory_space<vmem>>, %arg6: memref<3x3x128xf32, #tpu.memory_space<vmem>>, %arg7: memref<1x128xf32, #tpu.memory_space<vmem>>, %arg8: memref<1x128xf32, #tpu.memory_space<vmem>>, %arg9: memref<1x8x8x128xbf16, #tpu.memory_space<vmem>>, %arg10: memref<1x1x1x128xf32, #tpu.memory_space<vmem>>) attributes {dimension_semantics = [#tpu.dimension_semantics<parallel>, #tpu.dimension_semantics<parallel>], iteration_bounds = array<i64: 2, 1>, scalar_prefetch = 0 : i64, scratch_operands = 0 : i64, tpu.core_type = #tpu.core_type<tc>, window_params = [{transform_indices = @transform_0, window_bounds = array<i64: 1, 10, 16, 128>}, {pipeline_mode = #tpu.pipeline_mode<synchronous>, transform_indices = @transform_1, window_bounds = array<i64: 128, 128>}, {pipeline_mode = #tpu.pipeline_mode<synchronous>, transform_indices = @transform_2, window_bounds = array<i64: 1, 128>}, {pipeline_mode = #tpu.pipeline_mode<synchronous>, transform_indices = @transform_3, window_bounds = array<i64: 1, 128>}, {pipeline_mode = #tpu.pipeline_mode<synchronous>, transform_indices = @transform_4, window_bounds = array<i64: 3, 3, 128>}, {pipeline_mode = #tpu.pipeline_mode<synchronous>, transform_indices = @transform_5, window_bounds = array<i64: 1, 128>}, {pipeline_mode = #tpu.pipeline_mode<synchronous>, transform_indices = @transform_6, window_bounds = array<i64: 1, 128>}, {transform_indices = @transform_7, window_bounds = array<i64: 1, 8, 8, 128>}, {transform_indices = @transform_8, window_bounds = array<i64: 1, 1, 1, 128>}]} {
    %c8_i32 = arith.constant 8 : i32
    %0 = arith.muli %arg1, %c8_i32 : i32
    %1 = tpu.assume_multiple %0, 8 : i32
    %c0 = arith.constant 0 : index
    %2 = arith.index_cast %1 : i32 to index
    %c0_0 = arith.constant 0 : index
    %c0_1 = arith.constant 0 : index
    %3 = vector.load %arg2[%c0, %2, %c0_0, %c0_1] : memref<1x10x16x128xbf16, #tpu.memory_space<vmem>>, vector<1x10x16x128xbf16>
    %4 = vector.shape_cast %3 : vector<1x10x16x128xbf16> to vector<10x16x128xbf16>
    %5 = vector.shape_cast %4 : vector<10x16x128xbf16> to vector<160x128xbf16>
    %c0_2 = arith.constant 0 : index
    %c0_3 = arith.constant 0 : index
    %6 = vector.load %arg3[%c0_2, %c0_3] : memref<128x128xbf16, #tpu.memory_space<vmem>>, vector<128x128xbf16>
    %cst = arith.constant dense<0.000000e+00> : vector<160x128xf32>
    %7 = tpu.matmul %5, %6, %cst {dimension_numbers = #tpu.dot_dimension_numbers<[1], [0], [0], [1], [0, 0, 1, 1], [], []>} : vector<160x128xbf16>, vector<128x128xbf16>, vector<160x128xf32> -> vector<160x128xf32>
    %c0_4 = arith.constant 0 : index
    %c0_5 = arith.constant 0 : index
    %8 = vector.load %arg4[%c0_4, %c0_5] : memref<1x128xf32, #tpu.memory_space<vmem>>, vector<1x128xf32>
    %9 = vector.broadcast %8 : vector<1x128xf32> to vector<160x128xf32>
    %10 = arith.mulf %7, %9 : vector<160x128xf32>
    %c0_6 = arith.constant 0 : index
    %c0_7 = arith.constant 0 : index
    %11 = vector.load %arg5[%c0_6, %c0_7] : memref<1x128xf32, #tpu.memory_space<vmem>>, vector<1x128xf32>
    %12 = vector.broadcast %11 : vector<1x128xf32> to vector<160x128xf32>
    %13 = arith.addf %10, %12 : vector<160x128xf32>
    %14 = arith.negf %13 : vector<160x128xf32>
    %15 = math.exp %14 : vector<160x128xf32>
    %cst_8 = arith.constant 1.000000e+00 : f32
    %16 = vector.broadcast %cst_8 : f32 to vector<160x128xf32>
    %17 = arith.addf %16, %15 : vector<160x128xf32>
    %18 = arith.divf %16, %17 : vector<160x128xf32>
    %19 = arith.mulf %13, %18 : vector<160x128xf32>
    %20 = vector.shape_cast %19 : vector<160x128xf32> to vector<10x16x128xf32>
    %21 = tpu.iota {dimensions = array<i32: 0>} : vector<10x16xi32>
    %22 = vector.broadcast %1 : i32 to vector<10x16xi32>
    %23 = arith.addi %22, %21 : vector<10x16xi32>
    %24 = tpu.iota {dimensions = array<i32: 1>} : vector<10x16xi32>
    %c1_i32 = arith.constant 1 : i32
    %25 = vector.broadcast %c1_i32 : i32 to vector<10x16xi32>
    %26 = arith.cmpi sge, %23, %25 : vector<10x16xi32>
    %c9_i32 = arith.constant 9 : i32
    %27 = vector.broadcast %c9_i32 : i32 to vector<10x16xi32>
    %28 = arith.cmpi slt, %23, %27 : vector<10x16xi32>
    %29 = arith.andi %26, %28 : vector<10x16xi1>
    %c1_i32_9 = arith.constant 1 : i32
    %30 = vector.broadcast %c1_i32_9 : i32 to vector<10x16xi32>
    %31 = arith.cmpi sge, %24, %30 : vector<10x16xi32>
    %32 = arith.andi %29, %31 : vector<10x16xi1>
    %c9_i32_10 = arith.constant 9 : i32
    %33 = vector.broadcast %c9_i32_10 : i32 to vector<10x16xi32>
    %34 = arith.cmpi slt, %24, %33 : vector<10x16xi32>
    %35 = arith.andi %32, %34 : vector<10x16xi1>
    %36 = arith.extui %35 : vector<10x16xi1> to vector<10x16xi32>
    %37 = arith.sitofp %36 : vector<10x16xi32> to vector<10x16xf32>
    %38 = vector.shape_cast %37 : vector<10x16xf32> to vector<10x16x1xf32>
    %39 = vector.broadcast %38 : vector<10x16x1xf32> to vector<10x16x128xf32>
    %40 = arith.mulf %20, %39 : vector<10x16x128xf32>
    %c0_11 = arith.constant 0 : index
    %c0_12 = arith.constant 0 : index
    %c0_13 = arith.constant 0 : index
    %41 = vector.load %arg6[%c0_11, %c0_12, %c0_13] : memref<3x3x128xf32, #tpu.memory_space<vmem>>, vector<3x3x128xf32>
    %cst_14 = arith.constant 0.000000e+00 : f32
    %42 = vector.broadcast %cst_14 : f32 to vector<8x8x128xf32>
    %43 = vector.extract_strided_slice %40 {offsets = [0, 0, 0], sizes = [8, 16, 128], strides = [1, 1, 1]} : vector<10x16x128xf32> to vector<8x16x128xf32>
    %44 = vector.extract_strided_slice %43 {offsets = [0, 0, 0], sizes = [8, 8, 128], strides = [1, 1, 1]} : vector<8x16x128xf32> to vector<8x8x128xf32>
    %45 = vector.extract_strided_slice %41 {offsets = [0, 0, 0], sizes = [1, 1, 128], strides = [1, 1, 1]} : vector<3x3x128xf32> to vector<1x1x128xf32>
    %46 = vector.shape_cast %45 : vector<1x1x128xf32> to vector<128xf32>
    %47 = vector.shape_cast %46 : vector<128xf32> to vector<1x1x128xf32>
    %48 = vector.broadcast %47 : vector<1x1x128xf32> to vector<8x8x128xf32>
    %49 = arith.mulf %44, %48 : vector<8x8x128xf32>
    %50 = arith.addf %42, %49 : vector<8x8x128xf32>
    %51 = vector.extract_strided_slice %43 {offsets = [0, 1, 0], sizes = [8, 8, 128], strides = [1, 1, 1]} : vector<8x16x128xf32> to vector<8x8x128xf32>
    %52 = vector.extract_strided_slice %41 {offsets = [0, 1, 0], sizes = [1, 1, 128], strides = [1, 1, 1]} : vector<3x3x128xf32> to vector<1x1x128xf32>
    %53 = vector.shape_cast %52 : vector<1x1x128xf32> to vector<128xf32>
    %54 = vector.shape_cast %53 : vector<128xf32> to vector<1x1x128xf32>
    %55 = vector.broadcast %54 : vector<1x1x128xf32> to vector<8x8x128xf32>
    %56 = arith.mulf %51, %55 : vector<8x8x128xf32>
    %57 = arith.addf %50, %56 : vector<8x8x128xf32>
    %58 = vector.extract_strided_slice %43 {offsets = [0, 2, 0], sizes = [8, 8, 128], strides = [1, 1, 1]} : vector<8x16x128xf32> to vector<8x8x128xf32>
    %59 = vector.extract_strided_slice %41 {offsets = [0, 2, 0], sizes = [1, 1, 128], strides = [1, 1, 1]} : vector<3x3x128xf32> to vector<1x1x128xf32>
    %60 = vector.shape_cast %59 : vector<1x1x128xf32> to vector<128xf32>
    %61 = vector.shape_cast %60 : vector<128xf32> to vector<1x1x128xf32>
    %62 = vector.broadcast %61 : vector<1x1x128xf32> to vector<8x8x128xf32>
    %63 = arith.mulf %58, %62 : vector<8x8x128xf32>
    %64 = arith.addf %57, %63 : vector<8x8x128xf32>
    %65 = vector.extract_strided_slice %40 {offsets = [1, 0, 0], sizes = [8, 16, 128], strides = [1, 1, 1]} : vector<10x16x128xf32> to vector<8x16x128xf32>
    %66 = vector.extract_strided_slice %65 {offsets = [0, 0, 0], sizes = [8, 8, 128], strides = [1, 1, 1]} : vector<8x16x128xf32> to vector<8x8x128xf32>
    %67 = vector.extract_strided_slice %41 {offsets = [1, 0, 0], sizes = [1, 1, 128], strides = [1, 1, 1]} : vector<3x3x128xf32> to vector<1x1x128xf32>
    %68 = vector.shape_cast %67 : vector<1x1x128xf32> to vector<128xf32>
    %69 = vector.shape_cast %68 : vector<128xf32> to vector<1x1x128xf32>
    %70 = vector.broadcast %69 : vector<1x1x128xf32> to vector<8x8x128xf32>
    %71 = arith.mulf %66, %70 : vector<8x8x128xf32>
    %72 = arith.addf %64, %71 : vector<8x8x128xf32>
    %73 = vector.extract_strided_slice %65 {offsets = [0, 1, 0], sizes = [8, 8, 128], strides = [1, 1, 1]} : vector<8x16x128xf32> to vector<8x8x128xf32>
    %74 = vector.extract_strided_slice %41 {offsets = [1, 1, 0], sizes = [1, 1, 128], strides = [1, 1, 1]} : vector<3x3x128xf32> to vector<1x1x128xf32>
    %75 = vector.shape_cast %74 : vector<1x1x128xf32> to vector<128xf32>
    %76 = vector.shape_cast %75 : vector<128xf32> to vector<1x1x128xf32>
    %77 = vector.broadcast %76 : vector<1x1x128xf32> to vector<8x8x128xf32>
    %78 = arith.mulf %73, %77 : vector<8x8x128xf32>
    %79 = arith.addf %72, %78 : vector<8x8x128xf32>
    %80 = vector.extract_strided_slice %65 {offsets = [0, 2, 0], sizes = [8, 8, 128], strides = [1, 1, 1]} : vector<8x16x128xf32> to vector<8x8x128xf32>
    %81 = vector.extract_strided_slice %41 {offsets = [1, 2, 0], sizes = [1, 1, 128], strides = [1, 1, 1]} : vector<3x3x128xf32> to vector<1x1x128xf32>
    %82 = vector.shape_cast %81 : vector<1x1x128xf32> to vector<128xf32>
    %83 = vector.shape_cast %82 : vector<128xf32> to vector<1x1x128xf32>
    %84 = vector.broadcast %83 : vector<1x1x128xf32> to vector<8x8x128xf32>
    %85 = arith.mulf %80, %84 : vector<8x8x128xf32>
    %86 = arith.addf %79, %85 : vector<8x8x128xf32>
    %87 = vector.extract_strided_slice %40 {offsets = [2, 0, 0], sizes = [8, 16, 128], strides = [1, 1, 1]} : vector<10x16x128xf32> to vector<8x16x128xf32>
    %88 = vector.extract_strided_slice %87 {offsets = [0, 0, 0], sizes = [8, 8, 128], strides = [1, 1, 1]} : vector<8x16x128xf32> to vector<8x8x128xf32>
    %89 = vector.extract_strided_slice %41 {offsets = [2, 0, 0], sizes = [1, 1, 128], strides = [1, 1, 1]} : vector<3x3x128xf32> to vector<1x1x128xf32>
    %90 = vector.shape_cast %89 : vector<1x1x128xf32> to vector<128xf32>
    %91 = vector.shape_cast %90 : vector<128xf32> to vector<1x1x128xf32>
    %92 = vector.broadcast %91 : vector<1x1x128xf32> to vector<8x8x128xf32>
    %93 = arith.mulf %88, %92 : vector<8x8x128xf32>
    %94 = arith.addf %86, %93 : vector<8x8x128xf32>
    %95 = vector.extract_strided_slice %87 {offsets = [0, 1, 0], sizes = [8, 8, 128], strides = [1, 1, 1]} : vector<8x16x128xf32> to vector<8x8x128xf32>
    %96 = vector.extract_strided_slice %41 {offsets = [2, 1, 0], sizes = [1, 1, 128], strides = [1, 1, 1]} : vector<3x3x128xf32> to vector<1x1x128xf32>
    %97 = vector.shape_cast %96 : vector<1x1x128xf32> to vector<128xf32>
    %98 = vector.shape_cast %97 : vector<128xf32> to vector<1x1x128xf32>
    %99 = vector.broadcast %98 : vector<1x1x128xf32> to vector<8x8x128xf32>
    %100 = arith.mulf %95, %99 : vector<8x8x128xf32>
    %101 = arith.addf %94, %100 : vector<8x8x128xf32>
    %102 = vector.extract_strided_slice %87 {offsets = [0, 2, 0], sizes = [8, 8, 128], strides = [1, 1, 1]} : vector<8x16x128xf32> to vector<8x8x128xf32>
    %103 = vector.extract_strided_slice %41 {offsets = [2, 2, 0], sizes = [1, 1, 128], strides = [1, 1, 1]} : vector<3x3x128xf32> to vector<1x1x128xf32>
    %104 = vector.shape_cast %103 : vector<1x1x128xf32> to vector<128xf32>
    %105 = vector.shape_cast %104 : vector<128xf32> to vector<1x1x128xf32>
    %106 = vector.broadcast %105 : vector<1x1x128xf32> to vector<8x8x128xf32>
    %107 = arith.mulf %102, %106 : vector<8x8x128xf32>
    %108 = arith.addf %101, %107 : vector<8x8x128xf32>
    %c0_15 = arith.constant 0 : index
    %c0_16 = arith.constant 0 : index
    %109 = vector.load %arg7[%c0_15, %c0_16] : memref<1x128xf32, #tpu.memory_space<vmem>>, vector<1x128xf32>
    %110 = vector.shape_cast %109 : vector<1x128xf32> to vector<1x1x128xf32>
    %111 = vector.broadcast %110 : vector<1x1x128xf32> to vector<8x8x128xf32>
    %112 = arith.mulf %108, %111 : vector<8x8x128xf32>
    %c0_17 = arith.constant 0 : index
    %c0_18 = arith.constant 0 : index
    %113 = vector.load %arg8[%c0_17, %c0_18] : memref<1x128xf32, #tpu.memory_space<vmem>>, vector<1x128xf32>
    %114 = vector.shape_cast %113 : vector<1x128xf32> to vector<1x1x128xf32>
    %115 = vector.broadcast %114 : vector<1x1x128xf32> to vector<8x8x128xf32>
    %116 = arith.addf %112, %115 : vector<8x8x128xf32>
    %117 = arith.negf %116 : vector<8x8x128xf32>
    %118 = math.exp %117 : vector<8x8x128xf32>
    %cst_19 = arith.constant 1.000000e+00 : f32
    %119 = vector.broadcast %cst_19 : f32 to vector<8x8x128xf32>
    %120 = arith.addf %119, %118 : vector<8x8x128xf32>
    %121 = arith.divf %119, %120 : vector<8x8x128xf32>
    %122 = arith.mulf %116, %121 : vector<8x8x128xf32>
    %123 = vector.shape_cast %122 : vector<8x8x128xf32> to vector<1x8x8x128xf32>
    %124 = arith.truncf %123 : vector<1x8x8x128xf32> to vector<1x8x8x128xbf16>
    %c0_20 = arith.constant 0 : index
    %c0_21 = arith.constant 0 : index
    %c0_22 = arith.constant 0 : index
    %c0_23 = arith.constant 0 : index
    %125 = vector.load %arg9[%c0_20, %c0_21, %c0_22, %c0_23] : memref<1x8x8x128xbf16, #tpu.memory_space<vmem>>, vector<1x8x8x128xbf16>
    tpu.vector_store %arg9[%c0_20, %c0_21, %c0_22, %c0_23], %124 {strides = array<i32>} : memref<1x8x8x128xbf16, #tpu.memory_space<vmem>>, vector<1x8x8x128xbf16>,
    %cst_24 = arith.constant dense<0.000000e+00> : vector<128xf32>
    %126 = vector.multi_reduction <add>, %122, %cst_24 [0, 1] : vector<8x8x128xf32> to vector<128xf32>
    %127 = vector.shape_cast %126 : vector<128xf32> to vector<1x1x1x128xf32>
    %c0_25 = arith.constant 0 : index
    %c0_26 = arith.constant 0 : index
    %c0_27 = arith.constant 0 : index
    %c0_28 = arith.constant 0 : index
    %128 = vector.load %arg10[%c0_25, %c0_26, %c0_27, %c0_28] : memref<1x1x1x128xf32, #tpu.memory_space<vmem>>, vector<1x1x1x128xf32>
    tpu.vector_store %arg10[%c0_25, %c0_26, %c0_27, %c0_28], %127 {strides = array<i32>} : memref<1x1x1x128xf32, #tpu.memory_space<vmem>>, vector<1x1x1x128xf32>,
    return
  }
  func.func @transform_0(%arg0: i32, %arg1: i32) -> (i32, i32, i32, i32) {
    %c0_i32 = arith.constant 0 : i32
    %c0_i32_0 = arith.constant 0 : i32
    %c0_i32_1 = arith.constant 0 : i32
    %c0_i32_2 = arith.constant 0 : i32
    return %arg0, %c0_i32, %c0_i32_0, %c0_i32_1 : i32, i32, i32, i32
  }
  func.func @transform_1(%arg0: i32, %arg1: i32) -> (i32, i32) {
    %c0_i32 = arith.constant 0 : i32
    %c0_i32_0 = arith.constant 0 : i32
    %c0_i32_1 = arith.constant 0 : i32
    return %c0_i32, %c0_i32_0 : i32, i32
  }
  func.func @transform_2(%arg0: i32, %arg1: i32) -> (i32, i32) {
    %c0_i32 = arith.constant 0 : i32
    %c0_i32_0 = arith.constant 0 : i32
    %c0_i32_1 = arith.constant 0 : i32
    return %c0_i32, %c0_i32_0 : i32, i32
  }
  func.func @transform_3(%arg0: i32, %arg1: i32) -> (i32, i32) {
    %c0_i32 = arith.constant 0 : i32
    %c0_i32_0 = arith.constant 0 : i32
    %c0_i32_1 = arith.constant 0 : i32
    return %c0_i32, %c0_i32_0 : i32, i32
  }
  func.func @transform_4(%arg0: i32, %arg1: i32) -> (i32, i32, i32) {
    %c0_i32 = arith.constant 0 : i32
    %c0_i32_0 = arith.constant 0 : i32
    %c0_i32_1 = arith.constant 0 : i32
    %c0_i32_2 = arith.constant 0 : i32
    return %c0_i32, %c0_i32_0, %c0_i32_1 : i32, i32, i32
  }
  func.func @transform_5(%arg0: i32, %arg1: i32) -> (i32, i32) {
    %c0_i32 = arith.constant 0 : i32
    %c0_i32_0 = arith.constant 0 : i32
    %c0_i32_1 = arith.constant 0 : i32
    return %c0_i32, %c0_i32_0 : i32, i32
  }
  func.func @transform_6(%arg0: i32, %arg1: i32) -> (i32, i32) {
    %c0_i32 = arith.constant 0 : i32
    %c0_i32_0 = arith.constant 0 : i32
    %c0_i32_1 = arith.constant 0 : i32
    return %c0_i32, %c0_i32_0 : i32, i32
  }
  func.func @transform_7(%arg0: i32, %arg1: i32) -> (i32, i32, i32, i32) {
    %c0_i32 = arith.constant 0 : i32
    %c0_i32_0 = arith.constant 0 : i32
    %c0_i32_1 = arith.constant 0 : i32
    return %arg0, %arg1, %c0_i32, %c0_i32_0 : i32, i32, i32, i32
  }
  func.func @transform_8(%arg0: i32, %arg1: i32) -> (i32, i32, i32, i32) {
    %c0_i32 = arith.constant 0 : i32
    %c0_i32_0 = arith.constant 0 : i32
    %c0_i32_1 = arith.constant 0 : i32
    return %arg0, %arg1, %c0_i32, %c0_i32_0 : i32, i32, i32, i32
  }
}

module attributes {stable_mosaic.version = 11 : i64} {
  func.func @kernel(%arg0: i32, %arg1: i32, %arg2: memref<1x8x8x128xbf16, #tpu.memory_space<vmem>>, %arg3: memref<1x1x128xf32, #tpu.memory_space<vmem>>, %arg4: memref<128x128xbf16, #tpu.memory_space<vmem>>, %arg5: memref<1x128xf32, #tpu.memory_space<vmem>>, %arg6: memref<1x128xf32, #tpu.memory_space<vmem>>, %arg7: memref<1x8x8x128xbf16, #tpu.memory_space<vmem>>, %arg8: memref<1x8x8x128xbf16, #tpu.memory_space<vmem>>) attributes {dimension_semantics = [#tpu.dimension_semantics<parallel>, #tpu.dimension_semantics<parallel>], iteration_bounds = array<i64: 2, 1>, scalar_prefetch = 0 : i64, scratch_operands = 0 : i64, tpu.core_type = #tpu.core_type<tc>, window_params = [{transform_indices = @transform_0, window_bounds = array<i64: 1, 8, 8, 128>}, {transform_indices = @transform_1, window_bounds = array<i64: 1, 1, 128>}, {pipeline_mode = #tpu.pipeline_mode<synchronous>, transform_indices = @transform_2, window_bounds = array<i64: 128, 128>}, {pipeline_mode = #tpu.pipeline_mode<synchronous>, transform_indices = @transform_3, window_bounds = array<i64: 1, 128>}, {pipeline_mode = #tpu.pipeline_mode<synchronous>, transform_indices = @transform_4, window_bounds = array<i64: 1, 128>}, {transform_indices = @transform_5, window_bounds = array<i64: 1, 8, 8, 128>}, {transform_indices = @transform_6, window_bounds = array<i64: 1, 8, 8, 128>}]} {
    %c0 = arith.constant 0 : index
    %c0_0 = arith.constant 0 : index
    %c0_1 = arith.constant 0 : index
    %c0_2 = arith.constant 0 : index
    %0 = vector.load %arg2[%c0, %c0_0, %c0_1, %c0_2] : memref<1x8x8x128xbf16, #tpu.memory_space<vmem>>, vector<1x8x8x128xbf16>
    %1 = vector.shape_cast %0 : vector<1x8x8x128xbf16> to vector<8x8x128xbf16>
    %2 = arith.extf %1 : vector<8x8x128xbf16> to vector<8x8x128xf32>
    %c0_3 = arith.constant 0 : index
    %c0_4 = arith.constant 0 : index
    %c0_5 = arith.constant 0 : index
    %3 = vector.load %arg3[%c0_3, %c0_4, %c0_5] : memref<1x1x128xf32, #tpu.memory_space<vmem>>, vector<1x1x128xf32>
    %4 = vector.broadcast %3 : vector<1x1x128xf32> to vector<8x8x128xf32>
    %5 = arith.mulf %2, %4 : vector<8x8x128xf32>
    %6 = vector.shape_cast %5 : vector<8x8x128xf32> to vector<64x128xf32>
    %7 = arith.truncf %6 : vector<64x128xf32> to vector<64x128xbf16>
    %c0_6 = arith.constant 0 : index
    %c0_7 = arith.constant 0 : index
    %8 = vector.load %arg4[%c0_6, %c0_7] : memref<128x128xbf16, #tpu.memory_space<vmem>>, vector<128x128xbf16>
    %cst = arith.constant dense<0.000000e+00> : vector<64x128xf32>
    %9 = tpu.matmul %7, %8, %cst {dimension_numbers = #tpu.dot_dimension_numbers<[1], [0], [0], [1], [0, 0, 1, 1], [], []>} : vector<64x128xbf16>, vector<128x128xbf16>, vector<64x128xf32> -> vector<64x128xf32>
    %c0_8 = arith.constant 0 : index
    %c0_9 = arith.constant 0 : index
    %10 = vector.load %arg5[%c0_8, %c0_9] : memref<1x128xf32, #tpu.memory_space<vmem>>, vector<1x128xf32>
    %11 = vector.broadcast %10 : vector<1x128xf32> to vector<64x128xf32>
    %12 = arith.mulf %9, %11 : vector<64x128xf32>
    %c0_10 = arith.constant 0 : index
    %c0_11 = arith.constant 0 : index
    %13 = vector.load %arg6[%c0_10, %c0_11] : memref<1x128xf32, #tpu.memory_space<vmem>>, vector<1x128xf32>
    %14 = vector.broadcast %13 : vector<1x128xf32> to vector<64x128xf32>
    %15 = arith.addf %12, %14 : vector<64x128xf32>
    %c0_12 = arith.constant 0 : index
    %c0_13 = arith.constant 0 : index
    %c0_14 = arith.constant 0 : index
    %c0_15 = arith.constant 0 : index
    %16 = vector.load %arg7[%c0_12, %c0_13, %c0_14, %c0_15] : memref<1x8x8x128xbf16, #tpu.memory_space<vmem>>, vector<1x8x8x128xbf16>
    %17 = vector.shape_cast %16 : vector<1x8x8x128xbf16> to vector<8x8x128xbf16>
    %18 = arith.extf %17 : vector<8x8x128xbf16> to vector<8x8x128xf32>
    %19 = vector.shape_cast %18 : vector<8x8x128xf32> to vector<64x128xf32>
    %20 = arith.addf %15, %19 : vector<64x128xf32>
    %21 = vector.shape_cast %20 : vector<64x128xf32> to vector<1x8x8x128xf32>
    %22 = arith.truncf %21 : vector<1x8x8x128xf32> to vector<1x8x8x128xbf16>
    %c0_16 = arith.constant 0 : index
    %c0_17 = arith.constant 0 : index
    %c0_18 = arith.constant 0 : index
    %c0_19 = arith.constant 0 : index
    %23 = vector.load %arg8[%c0_16, %c0_17, %c0_18, %c0_19] : memref<1x8x8x128xbf16, #tpu.memory_space<vmem>>, vector<1x8x8x128xbf16>
    tpu.vector_store %arg8[%c0_16, %c0_17, %c0_18, %c0_19], %22 {strides = array<i32>} : memref<1x8x8x128xbf16, #tpu.memory_space<vmem>>, vector<1x8x8x128xbf16>,
    return
  }
  func.func @transform_0(%arg0: i32, %arg1: i32) -> (i32, i32, i32, i32) {
    %c0_i32 = arith.constant 0 : i32
    %c0_i32_0 = arith.constant 0 : i32
    %c0_i32_1 = arith.constant 0 : i32
    return %arg0, %arg1, %c0_i32, %c0_i32_0 : i32, i32, i32, i32
  }
  func.func @transform_1(%arg0: i32, %arg1: i32) -> (i32, i32, i32) {
    %c0_i32 = arith.constant 0 : i32
    %c0_i32_0 = arith.constant 0 : i32
    %c0_i32_1 = arith.constant 0 : i32
    return %arg0, %c0_i32, %c0_i32_0 : i32, i32, i32
  }
  func.func @transform_2(%arg0: i32, %arg1: i32) -> (i32, i32) {
    %c0_i32 = arith.constant 0 : i32
    %c0_i32_0 = arith.constant 0 : i32
    %c0_i32_1 = arith.constant 0 : i32
    return %c0_i32, %c0_i32_0 : i32, i32
  }
  func.func @transform_3(%arg0: i32, %arg1: i32) -> (i32, i32) {
    %c0_i32 = arith.constant 0 : i32
    %c0_i32_0 = arith.constant 0 : i32
    %c0_i32_1 = arith.constant 0 : i32
    return %c0_i32, %c0_i32_0 : i32, i32
  }
  func.func @transform_4(%arg0: i32, %arg1: i32) -> (i32, i32) {
    %c0_i32 = arith.constant 0 : i32
    %c0_i32_0 = arith.constant 0 : i32
    %c0_i32_1 = arith.constant 0 : i32
    return %c0_i32, %c0_i32_0 : i32, i32
  }
  func.func @transform_5(%arg0: i32, %arg1: i32) -> (i32, i32, i32, i32) {
    %c0_i32 = arith.constant 0 : i32
    %c0_i32_0 = arith.constant 0 : i32
    %c0_i32_1 = arith.constant 0 : i32
    return %arg0, %arg1, %c0_i32, %c0_i32_0 : i32, i32, i32, i32
  }
  func.func @transform_6(%arg0: i32, %arg1: i32) -> (i32, i32, i32, i32) {
    %c0_i32 = arith.constant 0 : i32
    %c0_i32_0 = arith.constant 0 : i32
    %c0_i32_1 = arith.constant 0 : i32
    return %arg0, %arg1, %c0_i32, %c0_i32_0 : i32, i32, i32, i32
  }
}

</mosaic_0001>

<bundles_post_ra>
// kernel: _lambda_.5
= control target key start
LH: loop header
LB: loop body
LE: loop exit
PB: predicated region body
PF: predicated region fallthrough
CT: control target
= control target key end

     0   :  { %s1207_s30 = smov 0   ;;  %s1209_s10 = smov 0   ;;  %s1329_s0 = inlined_call_operand.vmem [shape: bf16[2,8,8,128], index: 0, kind: input, shape index: {}]   ;;  %s1330_s1 = inlined_call_operand.vmem [shape: f32[2,1,128], index: 1, kind: input, shape index: {}]   ;;  %s1331_s2 = inlined_call_operand.vmem [shape: bf16[128,128], index: 2, kind: input, shape index: {}]   ;;  %s1332_s3 = inlined_call_operand.vmem [shape: f32[1,128], index: 3, kind: input, shape index: {}]   ;;  %s1333_s4 = inlined_call_operand.vmem [shape: f32[1,128], index: 4, kind: input, shape index: {}]   ;;  %s1334_s5 = inlined_call_operand.vmem [shape: bf16[2,8,8,128], index: 5, kind: input, shape index: {}]   ;;  %s1335_s6 = inlined_call_operand.vmem [shape: bf16[128,128], index: 6, kind: input, shape index: {}]   ;;  %s1336_s7 = inlined_call_operand.vmem [shape: f32[1,128], index: 7, kind: input, shape index: {}]   ;;  %s1337_s8 = inlined_call_operand.vmem [shape: f32[1,128], index: 8, kind: input, shape index: {}]   ;;  %s1338_s9 = inlined_call_operand.vmem [shape: bf16[2,8,8,128], index: 9, kind: output, shape index: {}]  }
   0x1   :  { %s1211_s11 = smov 0  }
   0x2 LB: > { %s31_s12 = sadd.s32 1, %s1151_s10  ;;  %p938_p0 = scmp.ge.s32.totalorder %s1155_s11, 1  ;;  %s1155_s11 = sphi %s1211_s11, %s19_s11   ;;  %s1151_s10 = sphi %s1209_s10, %s1340_s10   ;;  %s1147_s30 = sphi %s1207_s30, %s1339_s30  }
   0x3   : > { %p33_p1 = scmp.ge.s32.totalorder %s31_s12, 2  ;;  %p333_p2 = scmp.lt.s32.totalorder %s1155_s11, 3 }
   0x5   : > { %s1342_s12 = smov (%p33_p1, %s31_s12), 0  ;;  %p334_p3 = pnand %p938_p0, %p333_p2 }
   0x6   : > { %v1113_v0 = vld [vmem:[%s1331_s2] sm:$0xff] (!%p334_p3)   ;;  %v1115_v2 = vld [vmem:[%s1331_s2 + $0x8] sm:$0xff] (!%p334_p3)   ;;  %p390_p4 = scmp.lt.s32.totalorder (!%p334_p3), %s1147_s30, 1  ;;  %v1117_v4 = vld [vmem:[%s1331_s2 + $0x10] sm:$0xff] (!%p334_p3)  }
   0x7   : > { %337 = sbr.rel (%p334_p3) target bundleno = 272 (0x110), region = 56  ;;  %v1114_v1 = vld [vmem:[%s1335_s6] sm:$0xff] (!%p334_p3)   ;;  %1041 = vmatprep.subr.bf16.mxu0 (!%p334_p3), %v1113_v0  ;;  %v1116_v3 = vld [vmem:[%s1335_s6 + $0x8] sm:$0xff] (!%p334_p3)   ;;  %v1118_v5 = vld [vmem:[%s1335_s6 + $0x10] sm:$0xff] (!%p334_p3)  }
   0x8   : > { %1065 = vmatprep.subr.bf16.mxu1 (!%p334_p3), %v1114_v1  ;;  %1042 = vmatpush3.bf16.msra.mxu0 (!%p334_p3), %v1113_v0  ;;  %v1119_v6 = vld [vmem:[%s1331_s2 + $0x18] sm:$0xff] (!%p334_p3)   ;;  %v1121_v8 = vld [vmem:[%s1331_s2 + $0x20] sm:$0xff] (!%p334_p3)   ;;  %v1123_v10 = vld [vmem:[%s1331_s2 + $0x28] sm:$0xff] (!%p334_p3)  }
   0x9   : > { %1066 = vmatpush3.bf16.msra.mxu1 (!%p334_p3), %v1114_v1  ;;  %1043 = vmatprep.subr.bf16.mxu0 (!%p334_p3), %v1115_v2  ;;  %v1120_v7 = vld [vmem:[%s1335_s6 + $0x18] sm:$0xff] (!%p334_p3)   ;;  %v1122_v9 = vld [vmem:[%s1335_s6 + $0x20] sm:$0xff] (!%p334_p3)   ;;  %v1124_v13 = vld [vmem:[%s1335_s6 + $0x28] sm:$0xff] (!%p334_p3)  }
   0xa   : > { %1067 = vmatprep.subr.bf16.mxu1 (!%p334_p3), %v1116_v3  ;;  %v1125_v20 = vld [vmem:[%s1331_s2 + $0x30] sm:$0xff] (!%p334_p3)   ;;  %v1127_v28 = vld [vmem:[%s1331_s2 + $0x38] sm:$0xff] (!%p334_p3)   ;;  %v954_v45 = vld [vmem:[%s1332_s3] ss:$0 sm:$0xff] (!%p334_p3) }
   0xb   : > { %v1126_v22 = vld [vmem:[%s1335_s6 + $0x30] sm:$0xff] (!%p334_p3)   ;;  %v1128_v29 = vld [vmem:[%s1335_s6 + $0x38] sm:$0xff] (!%p334_p3)   ;;  %v968_v46 = vld [vmem:[%s1336_s7] ss:$0 sm:$0xff] (!%p334_p3) }
   0xc   : > { %1044 = vmatpush3.bf16.msra.mxu0 (!%p334_p3), %v1115_v2  ;;  %v955_v48 = vld [vmem:[%s1333_s4] ss:$0 sm:$0xff] (!%p334_p3) }
   0xd   : > { %1068 = vmatpush3.bf16.msra.mxu1 (!%p334_p3), %v1116_v3  ;;  %1045 = vmatprep.subr.bf16.mxu0 (!%p334_p3), %v1117_v4  ;;  %v969_v51 = vld [vmem:[%s1337_s8] ss:$0 sm:$0xff] (!%p334_p3) }
   0xe   : > { %s1344_s30 = smov (!%p390_p4, %s1147_s30), 1  ;;  %1069 = vmatprep.subr.bf16.mxu1 %v1118_v5 }
   0xf   : > { %s1249_s29 = sshll.u32 %s1344_s30, 5  ;;  %s401_s22 = scalar_lea.vmem %s1330_s1, %s1344_s30 }
  0x10   : > { %1046 = vmatpush3.bf16.msra.mxu0 %v1117_v4  ;;  %s1261_s19 = scalar_lea.vmem %s1329_s0, %s1249_s29  ;;  %s1270_s25 = scalar_lea.vmem %s1334_s5, %s1249_s29  ;;  %v945_v12 = vld [vmem:[%s401_s22] ss:$0 sm:$0xff] }
  0x11   : > { %1070 = vmatpush3.bf16.msra.mxu1 %v1118_v5  ;;  %1047 = vmatprep.subr.bf16.mxu0 %v1119_v6  ;;  %v976_v11 = vld [vmem:[%s1261_s19] sm:$0xff]   ;;  %v1011_v19 = vld [vmem:[%s1261_s19 + $0x8] sm:$0xff]   ;;  %v1012_v21 = vld [vmem:[%s1261_s19 + $0x10] sm:$0xff]   ;;  %s1314_s14 = scalar_lea.vmem %s1338_s9, %s1249_s29 }
  0x12   : > { %1071 = vmatprep.subr.bf16.mxu1 %v1120_v7  ;;  %v977_v14 = vunpack.c.l.bf16 %v976_v11  ;;  %v978_v15 = vunpack.c.h.bf16 %v976_v11  ;;  %v1129_v16 = vld [vmem:[%s1270_s25] sm:$0xff]   ;;  %v981_v24 = vunpack.c.l.bf16 %v1011_v19  ;;  %v982_v25 = vunpack.c.h.bf16 %v1011_v19  ;;  %v1013_v34 = vld [vmem:[%s1261_s19 + $0x18] sm:$0xff]   ;;  %v1130_v38 = vld [vmem:[%s1270_s25 + $0x8] sm:$0xff]  }
  0x13   : > { %1081 = vmatprep.mubr.bf16.mxu1 %v1129_v16  ;;  %v985_v26 = vunpack.c.l.bf16 %v1012_v21  ;;  %v986_v27 = vunpack.c.h.bf16 %v1012_v21  ;;  %v989_v36 = vunpack.c.l.bf16 %v1013_v34  ;;  %v990_v37 = vunpack.c.h.bf16 %v1013_v34  ;;  %v1131_v40 = vld [vmem:[%s1270_s25 + $0x10] sm:$0xff]   ;;  %v1132_v44 = vld [vmem:[%s1270_s25 + $0x18] sm:$0xff]  }
  0x14   : > { %1048 = vmatpush3.bf16.msra.mxu0 %v1119_v6  ;;  %v446_v17 = vmul.f32 %v977_v14, %v945_v12  ;;  %v447_v18 = vmul.f32 %v978_v15, %v945_v12  ;;  %v448_v30 = vmul.f32 %v981_v24, %v945_v12  ;;  %v449_v31 = vmul.f32 %v982_v25, %v945_v12 }
  0x15   : > { %1072 = vmatpush3.bf16.msra.mxu1 %v1120_v7  ;;  %1049 = vmatprep.subr.bf16.mxu0 %v1121_v8  ;;  %v450_v32 = vmul.f32 %v985_v26, %v945_v12  ;;  %v451_v33 = vmul.f32 %v986_v27, %v945_v12  ;;  %v452_v41 = vmul.f32 %v989_v36, %v945_v12 }
  0x16   : > { %1073 = vmatprep.subr.bf16.mxu1 %v1122_v9  ;;  %v454_v23 = vpack.c.bf16 %v447_v18, %v446_v17  ;;  %v455_v35 = vpack.c.bf16 %v449_v31, %v448_v30  ;;  %v453_v42 = vmul.f32 %v990_v37, %v945_v12 }
  0x17   : > { %v456_v39 = vpack.c.bf16 %v451_v33, %v450_v32 }
  0x18   : > { %1050 = vmatpush3.bf16.msra.mxu0 %v1121_v8  ;;  %1057 = vmatprep.mubr.bf16.mxu0 %v454_v23  ;;  %v457_v43 = vpack.c.bf16 %v453_v42, %v452_v41 }
  0x19   : > { %1074 = vmatpush3.bf16.msra.mxu1 %v1122_v9  ;;  %1051 = vmatprep.subr.bf16.mxu0 %v1123_v10 }
  0x1a   : > { %1075 = vmatprep.subr.bf16.mxu1 %v1124_v13 }
  0x1c   : > { %1052 = vmatpush3.bf16.msra.mxu0 %v1123_v10 }
  0x1d   : > { %1076 = vmatpush3.bf16.msra.mxu1 %v1124_v13  ;;  %1053 = vmatprep.subr.bf16.mxu0 %v1125_v20 }
  0x1e   : > { %1077 = vmatprep.subr.bf16.mxu1 %v1126_v22 }
  0x20   : > { %1054 = vmatpush3.bf16.msra.mxu0 %v1125_v20 }
  0x21   : > { %1078 = vmatpush3.bf16.msra.mxu1 %v1126_v22  ;;  %1055 = vmatprep.subr.bf16.mxu0 %v1127_v28 }
  0x22   : > { %1079 = vmatprep.subr.bf16.mxu1 %v1128_v29 }
  0x24   : > { %1056 = vmatpush3.bf16.msra.mxu0 %v1127_v28 }
  0x25   : > { %1080 = vmatpush3.bf16.msra.mxu1 %v1128_v29 }
  0x27   : > { %1058 = vmatmul.mubr.bf16.vlgmr.msra.gmra.mrb[0].mxu0 %v455_v35 }
  0x28   : > { %1082 = vmatmul.mubr.bf16.vlgmr.msra.gmra.mrb[0].mxu1 %v1130_v38  ;;  %1061 = vmatprep.mubr.bf16.mxu0 %v456_v39 }
  0x29   : > { %1085 = vmatprep.mubr.bf16.mxu1 %v1131_v40 }
  0x2f   : > { %1062 = vmatmul.mubr.bf16.gmra.mrb[4].mxu0 %v457_v43 }
  0x30   : > { %1086 = vmatmul.mubr.bf16.gmra.mrb[4].mxu1 %v1132_v44 }
  0xfa   : > { %v1059_v47 = vpop.f32.mrb[0].mxu0 }
  0xfb   : > { %v596_v49 = vmul.f32 %v1059_v47, %v954_v45  ;;  %v1083_v50 = vpop.f32.mrb[0].mxu1  ;;  %v556_v52 = vpop.f32.mrb[1].mxu0 }
  0xfc   : > { %v775_v53 = vmul.f32 %v1083_v50, %v968_v46  ;;  %v594_v54 = vmul.f32 %v954_v45, %v556_v52  ;;  %v735_v55 = vpop.f32.mrb[1].mxu1  ;;  %v1060_v56 = vpop.f32.mrb[2].mxu0 }
  0xfd   : > { %v611_v57 = vadd.f32 %v955_v48, %v596_v49  ;;  %v773_v58 = vmul.f32 %v968_v46, %v735_v55  ;;  %v597_v59 = vmul.f32 %v1060_v56, %v954_v45  ;;  %v1084_v60 = vpop.f32.mrb[2].mxu1  ;;  %v559_v61 = vpop.f32.mrb[3].mxu0 }
  0xfe   : > { %v790_v62 = vadd.f32 %v969_v51, %v775_v53  ;;  %v609_v63 = vadd.f32 %v955_v48, %v594_v54  ;;  %v776_v0 = vmul.f32 %v1084_v60, %v968_v46  ;;  %v595_v1 = vmul.f32 %v954_v45, %v559_v61  ;;  %v738_v2 = vpop.f32.mrb[3].mxu1 }
  0xff   : > { %v788_v3 = vadd.f32 %v969_v51, %v773_v58  ;;  %v612_v4 = vadd.f32 %v955_v48, %v597_v59  ;;  %v774_v5 = vmul.f32 %v968_v46, %v738_v2 }
 0x100   : > { %v798_v6 = vadd.f32 %v790_v62, %v611_v57  ;;  %v791_v7 = vadd.f32 %v969_v51, %v776_v0  ;;  %v610_v8 = vadd.f32 %v955_v48, %v595_v1 }
 0x101   : > { %v796_v9 = vadd.f32 %v788_v3, %v609_v63  ;;  %v789_v10 = vadd.f32 %v969_v51, %v774_v5 }
 0x102   : > { %v799_v11 = vadd.f32 %v791_v7, %v612_v4  ;;  %v1063_v12 = vpop.f32.mrb[4].mxu0 }
 0x103   : > { %v797_v13 = vadd.f32 %v789_v10, %v610_v8  ;;  %v600_v14 = vmul.f32 %v1063_v12, %v954_v45  ;;  %v1087_v15 = vpop.f32.mrb[4].mxu1  ;;  %v572_v16 = vpop.f32.mrb[5].mxu0 }
 0x104   : > { %v999_v17 = vpack.c.bf16 %v799_v11, %v798_v6  ;;  %v779_v18 = vmul.f32 %v1087_v15, %v968_v46  ;;  %v598_v19 = vmul.f32 %v954_v45, %v572_v16  ;;  %v751_v20 = vpop.f32.mrb[5].mxu1  ;;  %v1064_v21 = vpop.f32.mrb[6].mxu0 }
 0x105   : > { %v994_v22 = vpack.c.bf16 %v797_v13, %v796_v9  ;;  %v615_v23 = vadd.f32 %v955_v48, %v600_v14  ;;  %v777_v24 = vmul.f32 %v968_v46, %v751_v20  ;;  %v601_v25 = vmul.f32 %v1064_v21, %v954_v45  ;;  %v1088_v26 = vpop.f32.mrb[6].mxu1  ;;  %v575_v27 = vpop.f32.mrb[7].mxu0 }
 0x106   : > { %1014 = vst [vmem:[%s1314_s14 + $0x8] sm:$0xff] %v999_v17   ;;  %v794_v28 = vadd.f32 %v969_v51, %v779_v18  ;;  %v613_v29 = vadd.f32 %v955_v48, %v598_v19  ;;  %v780_v30 = vmul.f32 %v1088_v26, %v968_v46  ;;  %v599_v31 = vmul.f32 %v954_v45, %v575_v27  ;;  %v754_v32 = vpop.f32.mrb[7].mxu1 }
 0x107   : > { %995 = vst [vmem:[%s1314_s14] sm:$0xff] %v994_v22   ;;  %v792_v33 = vadd.f32 %v969_v51, %v777_v24  ;;  %v616_v34 = vadd.f32 %v955_v48, %v601_v25  ;;  %v778_v35 = vmul.f32 %v968_v46, %v754_v32 }
 0x108   : > { %v802_v36 = vadd.f32 %v794_v28, %v615_v23  ;;  %v795_v37 = vadd.f32 %v969_v51, %v780_v30  ;;  %v614_v38 = vadd.f32 %v955_v48, %v599_v31 }
 0x109   : > { %v800_v39 = vadd.f32 %v792_v33, %v613_v29  ;;  %v793_v40 = vadd.f32 %v969_v51, %v778_v35 }
 0x10a   : > { %v803_v41 = vadd.f32 %v795_v37, %v616_v34 }
 0x10b   : > { %v801_v42 = vadd.f32 %v793_v40, %v614_v38 }
 0x10c   : > { %v1009_v43 = vpack.c.bf16 %v803_v41, %v802_v36 }
 0x10d   : > { %v1004_v44 = vpack.c.bf16 %v801_v42, %v800_v39 }
 0x10e   : > { %1016 = vst [vmem:[%s1314_s14 + $0x18] sm:$0xff] %v1009_v43  }
 0x10f   : > { %1015 = vst [vmem:[%s1314_s14 + $0x10] sm:$0xff] %v1004_v44  }
 0x110 PF: > { %s19_s11 = sadd.s32 1, %s1155_s11   ;;  %s1339_s30 = smov %s1151_s10 }
 0x111   : > { %p16_p5 = scmp.ge.s32.totalorder %s19_s11, 4   ;;  %s1340_s10 = smov %s1342_s12 }
 0x113   :  { %18 = sbr.rel (!%p16_p5) target bundleno = 2 (0x2), region = 92 }

// kernel: _lambda_.7
= control target key start
LH: loop header
LB: loop body
LE: loop exit
PB: predicated region body
PF: predicated region fallthrough
CT: control target
= control target key end

     0   :  { %s921_s21 = smov 0   ;;  %s923_s22 = smov 0   ;;  %s1001_s0 = inlined_call_operand.vmem [shape: bf16[2,8,8,128], index: 0, kind: input, shape index: {}]   ;;  %s1002_s1 = inlined_call_operand.vmem [shape: f32[2,1,128], index: 1, kind: input, shape index: {}]   ;;  %s1003_s2 = inlined_call_operand.vmem [shape: bf16[128,128], index: 2, kind: input, shape index: {}]   ;;  %s1004_s3 = inlined_call_operand.vmem [shape: f32[1,128], index: 3, kind: input, shape index: {}]   ;;  %s1005_s4 = inlined_call_operand.vmem [shape: f32[1,128], index: 4, kind: input, shape index: {}]   ;;  %s1006_s5 = inlined_call_operand.vmem [shape: bf16[2,8,8,128], index: 5, kind: input, shape index: {}]   ;;  %s1007_s6 = inlined_call_operand.vmem [shape: bf16[2,8,8,128], index: 6, kind: output, shape index: {}]  }
   0x1   :  { %s925_s23 = smov 0  }
   0x2 LB: > { %s28_s24 = sadd.s32 1, %s880_s22  ;;  %p694_p0 = scmp.ge.s32.totalorder %s884_s23, 1  ;;  %s884_s23 = sphi %s925_s23, %s16_s23   ;;  %s880_s22 = sphi %s923_s22, %s1009_s22   ;;  %s876_s21 = sphi %s921_s21, %s1008_s21  }
   0x3   : > { %p30_p1 = scmp.ge.s32.totalorder %s28_s24, 2  ;;  %p258_p2 = scmp.lt.s32.totalorder %s884_s23, 3 }
   0x5   : > { %s1011_s24 = smov (%p30_p1, %s28_s24), 0  ;;  %p259_p3 = pnand %p694_p0, %p258_p2 }
   0x6   : > { %v854_v0 = vld [vmem:[%s1003_s2] sm:$0xff] (!%p259_p3)   ;;  %p309_p4 = scmp.lt.s32.totalorder (!%p259_p3), %s876_s21, 1  ;;  %v855_v1 = vld [vmem:[%s1003_s2 + $0x8] sm:$0xff] (!%p259_p3)   ;;  %v856_v2 = vld [vmem:[%s1003_s2 + $0x10] sm:$0xff] (!%p259_p3)  }
   0x7   : > { %262 = sbr.rel (%p259_p3) target bundleno = 264 (0x108), region = 44  ;;  %790 = vmatprep.subr.bf16.mxu0 (!%p259_p3), %v854_v0  ;;  %814 = vmatprep.subr.bf16.mxu1 (!%p259_p3), %v854_v0  ;;  %v857_v3 = vld [vmem:[%s1003_s2 + $0x18] sm:$0xff] (!%p259_p3)   ;;  %v858_v14 = vld [vmem:[%s1003_s2 + $0x20] sm:$0xff] (!%p259_p3)   ;;  %v859_v18 = vld [vmem:[%s1003_s2 + $0x28] sm:$0xff] (!%p259_p3)  }
   0x8   : > { %791 = vmatpush3.bf16.msra.mxu0 (!%p259_p3), %v854_v0  ;;  %822 = vmatpush3.bf16.msra.mxu1 (!%p259_p3), %v854_v0  ;;  %v860_v21 = vld [vmem:[%s1003_s2 + $0x30] sm:$0xff] (!%p259_p3)   ;;  %v861_v26 = vld [vmem:[%s1003_s2 + $0x38] sm:$0xff] (!%p259_p3)   ;;  %v710_v37 = vld [vmem:[%s1004_s3] ss:$0 sm:$0xff] (!%p259_p3) }
   0x9   : > { %792 = vmatprep.subr.bf16.mxu0 (!%p259_p3), %v855_v1  ;;  %815 = vmatprep.subr.bf16.mxu1 (!%p259_p3), %v855_v1  ;;  %v711_v39 = vld [vmem:[%s1005_s4] ss:$0 sm:$0xff] (!%p259_p3) }
   0xc   : > { %793 = vmatpush3.bf16.msra.mxu0 (!%p259_p3), %v855_v1  ;;  %823 = vmatpush3.bf16.msra.mxu1 (!%p259_p3), %v855_v1 }
   0xd   : > { %794 = vmatprep.subr.bf16.mxu0 (!%p259_p3), %v856_v2  ;;  %816 = vmatprep.subr.bf16.mxu1 (!%p259_p3), %v856_v2 }
   0xe   : > { %s1013_s21 = smov (!%p309_p4, %s876_s21), 1 }
   0xf   : > { %s948_s7 = sshll.u32 %s1013_s21, 5  ;;  %s320_s13 = scalar_lea.vmem %s1002_s1, %s1013_s21 }
  0x10   : > { %s954_s10 = scalar_lea.vmem %s1001_s0, %s948_s7  ;;  %v701_v5 = vld [vmem:[%s320_s13] ss:$0 sm:$0xff]  ;;  %795 = vmatpush3.bf16.msra.mxu0 %v856_v2  ;;  %824 = vmatpush3.bf16.msra.mxu1 %v856_v2  ;;  %s329_s29 = scalar_lea.vmem %s1006_s5, %s948_s7 }
  0x11   : > { %v718_v4 = vld [vmem:[%s954_s10] sm:$0xff]   ;;  %v770_v6 = vld [vmem:[%s954_s10 + $0x10] sm:$0xff]   ;;  %796 = vmatprep.subr.bf16.mxu0 %v857_v3  ;;  %817 = vmatprep.subr.bf16.mxu1 %v857_v3  ;;  %v769_v19 = vld [vmem:[%s954_s10 + $0x8] sm:$0xff]   ;;  %s339_s13 = scalar_lea.vmem %s1007_s6, %s948_s7 }
  0x12   : > { %v719_v7 = vunpack.c.l.bf16 %v718_v4  ;;  %v720_v8 = vunpack.c.h.bf16 %v718_v4  ;;  %v727_v9 = vunpack.c.l.bf16 %v770_v6  ;;  %v728_v10 = vunpack.c.h.bf16 %v770_v6  ;;  %v771_v20 = vld [vmem:[%s954_s10 + $0x18] sm:$0xff]   ;;  %v772_v33 = vld [vmem:[%s329_s29 + $0x8] sm:$0xff]   ;;  %v734_v35 = vld [vmem:[%s329_s29] sm:$0xff]  }
  0x13   : > { %v723_v22 = vunpack.c.l.bf16 %v769_v19  ;;  %v724_v23 = vunpack.c.h.bf16 %v769_v19  ;;  %v731_v24 = vunpack.c.l.bf16 %v771_v20  ;;  %v732_v25 = vunpack.c.h.bf16 %v771_v20  ;;  %v774_v34 = vld [vmem:[%s329_s29 + $0x18] sm:$0xff]   ;;  %v773_v36 = vld [vmem:[%s329_s29 + $0x10] sm:$0xff]  }
  0x14   : > { %v365_v11 = vmul.f32 %v719_v7, %v701_v5  ;;  %v366_v12 = vmul.f32 %v720_v8, %v701_v5  ;;  %v369_v13 = vmul.f32 %v727_v9, %v701_v5  ;;  %v370_v15 = vmul.f32 %v728_v10, %v701_v5  ;;  %797 = vmatpush3.bf16.msra.mxu0 %v857_v3 }
  0x15   : > { %825 = vmatpush3.bf16.msra.mxu1 %v857_v3  ;;  %798 = vmatprep.subr.bf16.mxu0 %v858_v14  ;;  %v367_v27 = vmul.f32 %v723_v22, %v701_v5  ;;  %v368_v28 = vmul.f32 %v724_v23, %v701_v5  ;;  %v371_v29 = vmul.f32 %v731_v24, %v701_v5  ;;  %v739_v40 = vunpack.c.l.bf16 %v772_v33 }
  0x16   : > { %v373_v16 = vpack.c.bf16 %v366_v12, %v365_v11  ;;  %v375_v17 = vpack.c.bf16 %v370_v15, %v369_v13  ;;  %818 = vmatprep.subr.bf16.mxu1 %v858_v14  ;;  %v372_v30 = vmul.f32 %v732_v25, %v701_v5  ;;  %v747_v42 = vunpack.c.l.bf16 %v774_v34 }
  0x17   : > { %v374_v31 = vpack.c.bf16 %v368_v28, %v367_v27  ;;  %v735_v43 = vunpack.c.l.bf16 %v734_v35  ;;  %v743_v44 = vunpack.c.l.bf16 %v773_v36  ;;  %v740_v49 = vunpack.c.h.bf16 %v772_v33 }
  0x18   : > { %806 = vmatprep.mubr.bf16.mxu0 %v373_v16  ;;  %810 = vmatprep.mubr.bf16.mxu1 %v375_v17  ;;  %v376_v32 = vpack.c.bf16 %v372_v30, %v371_v29  ;;  %v748_v50 = vunpack.c.h.bf16 %v774_v34  ;;  %v736_v55 = vunpack.c.h.bf16 %v734_v35  ;;  %v744_v56 = vunpack.c.h.bf16 %v773_v36 }
  0x19   : > { %799 = vmatpush3.bf16.msra.mxu0 %v858_v14  ;;  %826 = vmatpush3.bf16.msra.mxu1 %v858_v14 }
  0x1a   : > { %800 = vmatprep.subr.bf16.mxu0 %v859_v18  ;;  %819 = vmatprep.subr.bf16.mxu1 %v859_v18 }
  0x1d   : > { %801 = vmatpush3.bf16.msra.mxu0 %v859_v18  ;;  %827 = vmatpush3.bf16.msra.mxu1 %v859_v18 }
  0x1e   : > { %802 = vmatprep.subr.bf16.mxu0 %v860_v21  ;;  %820 = vmatprep.subr.bf16.mxu1 %v860_v21 }
  0x21   : > { %803 = vmatpush3.bf16.msra.mxu0 %v860_v21  ;;  %828 = vmatpush3.bf16.msra.mxu1 %v860_v21 }
  0x22   : > { %804 = vmatprep.subr.bf16.mxu0 %v861_v26  ;;  %821 = vmatprep.subr.bf16.mxu1 %v861_v26 }
  0x25   : > { %805 = vmatpush3.bf16.msra.mxu0 %v861_v26  ;;  %829 = vmatpush3.bf16.msra.mxu1 %v861_v26 }
  0x28   : > { %807 = vmatmul.mubr.bf16.vlgmr.msra.gmra.mrb[0].mxu0 %v374_v31  ;;  %811 = vmatmul.mubr.bf16.vlgmr.msra.gmra.mrb[0].mxu1 %v376_v32 }
  0xfb   : > { %v808_v38 = vpop.f32.mrb[0].mxu0  ;;  %v812_v41 = vpop.f32.mrb[0].mxu1 }
  0xfc   : > { %v515_v45 = vmul.f32 %v808_v38, %v710_v37  ;;  %v519_v46 = vmul.f32 %v812_v41, %v710_v37  ;;  %v475_v47 = vpop.f32.mrb[1].mxu0  ;;  %v491_v48 = vpop.f32.mrb[1].mxu1 }
  0xfd   : > { %v513_v51 = vmul.f32 %v710_v37, %v475_v47  ;;  %v517_v52 = vmul.f32 %v710_v37, %v491_v48  ;;  %v809_v53 = vpop.f32.mrb[2].mxu0  ;;  %v813_v54 = vpop.f32.mrb[2].mxu1 }
  0xfe   : > { %v530_v57 = vadd.f32 %v711_v39, %v515_v45  ;;  %v534_v58 = vadd.f32 %v711_v39, %v519_v46  ;;  %v516_v59 = vmul.f32 %v809_v53, %v710_v37  ;;  %v520_v60 = vmul.f32 %v813_v54, %v710_v37  ;;  %v478_v61 = vpop.f32.mrb[3].mxu0  ;;  %v494_v62 = vpop.f32.mrb[3].mxu1 }
  0xff   : > { %v528_v63 = vadd.f32 %v711_v39, %v513_v51  ;;  %v532_v0 = vadd.f32 %v711_v39, %v517_v52  ;;  %v514_v1 = vmul.f32 %v710_v37, %v478_v61  ;;  %v518_v2 = vmul.f32 %v710_v37, %v494_v62 }
 0x100   : > { %v531_v3 = vadd.f32 %v711_v39, %v516_v59  ;;  %v535_v4 = vadd.f32 %v711_v39, %v520_v60  ;;  %v554_v7 = vadd.f32 %v739_v40, %v530_v57  ;;  %v558_v8 = vadd.f32 %v747_v42, %v534_v58 }
 0x101   : > { %v529_v5 = vadd.f32 %v711_v39, %v514_v1  ;;  %v533_v6 = vadd.f32 %v711_v39, %v518_v2  ;;  %v552_v11 = vadd.f32 %v735_v43, %v528_v63  ;;  %v556_v12 = vadd.f32 %v743_v44, %v532_v0 }
 0x102   : > { %v555_v9 = vadd.f32 %v740_v49, %v531_v3  ;;  %v559_v10 = vadd.f32 %v748_v50, %v535_v4 }
 0x103   : > { %v553_v13 = vadd.f32 %v736_v55, %v529_v5  ;;  %v557_v14 = vadd.f32 %v744_v56, %v533_v6 }
 0x104   : > { %v757_v15 = vpack.c.bf16 %v555_v9, %v554_v7  ;;  %v767_v16 = vpack.c.bf16 %v559_v10, %v558_v8 }
 0x105   : > { %v752_v17 = vpack.c.bf16 %v553_v13, %v552_v11  ;;  %v762_v18 = vpack.c.bf16 %v557_v14, %v556_v12 }
 0x106   : > { %775 = vst [vmem:[%s339_s13 + $0x8] sm:$0xff] %v757_v15   ;;  %777 = vst [vmem:[%s339_s13 + $0x18] sm:$0xff] %v767_v16  }
 0x107   : > { %753 = vst [vmem:[%s339_s13] sm:$0xff] %v752_v17   ;;  %776 = vst [vmem:[%s339_s13 + $0x10] sm:$0xff] %v762_v18  }
 0x108 PF: > { %s16_s23 = sadd.s32 1, %s884_s23   ;;  %s1008_s21 = smov %s880_s22 }
 0x109   : > { %p13_p5 = scmp.ge.s32.totalorder %s16_s23, 4   ;;  %s1009_s22 = smov %s1011_s24 }
 0x10b   :  { %15 = sbr.rel (!%p13_p5) target bundleno = 2 (0x2), region = 80 }

// kernel: _lambda_.6
= control target key start
LH: loop header
LB: loop body
LE: loop exit
PB: predicated region body
PF: predicated region fallthrough
CT: control target
= control target key end

     0   :  { %s2093_s27 = smov 0   ;;  %s2095_s28 = smov 0   ;;  %s2830_s0 = inlined_call_operand.vmem [shape: bf16[2,10,16,128], index: 0, kind: input, shape index: {}]   ;;  %s2831_s1 = inlined_call_operand.vmem [shape: bf16[128,128], index: 1, kind: input, shape index: {}]   ;;  %s2832_s2 = inlined_call_operand.vmem [shape: f32[1,128], index: 2, kind: input, shape index: {}]   ;;  %s2833_s3 = inlined_call_operand.vmem [shape: f32[1,128], index: 3, kind: input, shape index: {}]   ;;  %s2834_s4 = inlined_call_operand.vmem [shape: f32[3,3,128], index: 4, kind: input, shape index: {}]   ;;  %s2835_s5 = inlined_call_operand.vmem [shape: f32[1,128], index: 5, kind: input, shape index: {}]   ;;  %s2836_s6 = inlined_call_operand.vmem [shape: f32[1,128], index: 6, kind: input, shape index: {}]   ;;  %s2837_s7 = inlined_call_operand.vmem [shape: bf16[2,8,8,128], index: 7, kind: output, shape index: {0}]   ;;  %s2838_s8 = inlined_call_operand.vmem [shape: f32[2,1,1,128], index: 8, kind: output, shape index: {1}]  }
   0x1   :  { %s2097_s29 = smov 0  }
   0x2 LB: > { %s31_s30 = sadd.s32 1, %s2041_s28  ;;  %p1715_p0 = scmp.ge.s32.totalorder %s2045_s29, 1  ;;  %s2045_s29 = sphi %s2097_s29, %s19_s29   ;;  %s2041_s28 = sphi %s2095_s28, %s2875_s28   ;;  %s2037_s27 = sphi %s2093_s27, %s2874_s27  }
   0x3   : > { %p33_p1 = scmp.ge.s32.totalorder %s31_s30, 2  ;;  %p281_p2 = scmp.lt.s32.totalorder %s2045_s29, 3 }
   0x5   : > { %s2877_s30 = smov (%p33_p1, %s31_s30), 0  ;;  %p282_p3 = pnand %p1715_p0, %p281_p2 }
   0x7   : > { %285 = sbr.rel (%p282_p3) target bundleno = 452 (0x1c4), region = 48 }
   0xe   : > { %v1893_v0 = vld [vmem:[%s2831_s1] sm:$0xff]   ;;  %p325_p4 = scmp.lt.s32.totalorder %s2037_s27, 1  ;;  %v1894_v1 = vld [vmem:[%s2831_s1 + $0x8] sm:$0xff]   ;;  %v1895_v2 = vld [vmem:[%s2831_s1 + $0x10] sm:$0xff]   ;;  %v802_v4 = vlaneseq  ;;  %v2047_v14 = vmov 0.0   ;;  %vm1015_vm8 = vcmask 1046528  }
   0xf   : > { %1815 = vmatprep.subr.bf16.mxu0 %v1893_v0  ;;  %1851 = vmatprep.subr.bf16.mxu1 %v1893_v0  ;;  %v1896_v3 = vld [vmem:[%s2831_s1 + $0x18] sm:$0xff]   ;;  %v1897_v9 = vld [vmem:[%s2831_s1 + $0x20] sm:$0xff]   ;;  %v1898_v10 = vld [vmem:[%s2831_s1 + $0x28] sm:$0xff]   ;;  %vm1092_vm9 = vcmask 1045504  }
  0x10   : > { %s2879_s27 = smov (!%p325_p4, %s2037_s27), 1  ;;  %1816 = vmatpush3.bf16.msra.mxu0 %v1893_v0  ;;  %1859 = vmatpush3.bf16.msra.mxu1 %v1893_v0  ;;  %v2133_v7 = vshrl.u32 %v802_v4, 7  ;;  %v2135_v8 = vand.u32 127, %v802_v4  ;;  %v1899_v13 = vld [vmem:[%s2831_s1 + $0x30] sm:$0xff]   ;;  %v1900_v18 = vld [vmem:[%s2831_s1 + $0x38] sm:$0xff]  }
  0x11   : > { %1817 = vmatprep.subr.bf16.mxu0 %v1894_v1  ;;  %1852 = vmatprep.subr.bf16.mxu1 %v1894_v1  ;;  %s1867_s15 = smul.u32 80, %s2879_s27  ;;  %v2195_v45 = vld [vmem:[%s2832_s2] ss:$0 sm:$0xff]  ;;  %s1773_s25 = sshll.u32 %s2879_s27, 5 }
  0x12   : > { %vm810_vm0 = vcmp.ge.s32.totalorder %v2133_v7, 1  ;;  %vm816_vm1 = vcmp.ge.s32.totalorder %v2135_v8, 1  ;;  %vm819_vm2 = vcmp.lt.s32.totalorder %v2135_v8, 9  ;;  %v2147_v11 = vsub.s32 0, %v2133_v7  ;;  %v2202_v48 = vld [vmem:[%s2833_s3] ss:$0 sm:$0xff]  ;;  %s2804_s10 = scalar_lea.vmem %s2837_s7, %s1773_s25  ;;  %s345_s13 = scalar_lea.vmem %s2838_s8, %s2879_s27 }
  0x13   : > { %s2126_s18 = scalar_lea.vmem %s2830_s0, %s1867_s15  ;;  %v2150_v12 = vsub.s32 1, %v2133_v7  ;;  %vm817_vm3 = vmand %vm810_vm0, %vm816_vm1  ;;  %v2165_v19 = vsub.s32 2, %v2133_v7  ;;  %v861_v21 = vsub.s32 3, %v2133_v7  ;;  %v872_v27 = vsub.s32 4, %v2133_v7 }
  0x14   : > { %1818 = vmatpush3.bf16.msra.mxu0 %v1894_v1  ;;  %1860 = vmatpush3.bf16.msra.mxu1 %v1894_v1  ;;  %v1901_v5 = vld [vmem:[%s2126_s18] sm:$0xff]   ;;  %v1902_v6 = vld [vmem:[%s2126_s18 + $0x30] sm:$0xff]   ;;  %vm820_vm4 = vmand %vm817_vm3, %vm819_vm2  ;;  %v883_v29 = vsub.s32 5, %v2133_v7  ;;  %v804_v30 = vadd.s32 8, %v2133_v7  ;;  %v894_v35 = vsub.s32 6, %v2133_v7  ;;  %v905_v37 = vsub.s32 7, %v2133_v7 }
  0x15   : > { %1819 = vmatprep.subr.bf16.mxu0 %v1895_v2  ;;  %1853 = vmatprep.subr.bf16.mxu1 %v1895_v2  ;;  %v1759_v15 = vsel %vm820_vm4, 1.0, %v2047_v14  ;;  %v1903_v22 = vld [vmem:[%s2126_s18 + $0x8] sm:$0xff]   ;;  %v1904_v23 = vld [vmem:[%s2126_s18 + $0x38] sm:$0xff]   ;;  %v1905_v24 = vld [vmem:[%s2126_s18 + $0x10] sm:$0xff]  }
  0x16   : > { %1831 = vmatprep.mubr.bf16.mxu0 %v1901_v5  ;;  %1843 = vmatprep.mubr.bf16.mxu1 %v1902_v6  ;;  %v829_v16 = vrot.slane %v1759_v15, %v2147_v11  ;;  %v840_v17 = vrot.slane %v1759_v15, %v2150_v12  ;;  %v851_v20 = vrot.slane %v1759_v15, %v2165_v19  ;;  %v1906_v25 = vld [vmem:[%s2126_s18 + $0x40] sm:$0xff]   ;;  %v1907_v31 = vld [vmem:[%s2126_s18 + $0x18] sm:$0xff]   ;;  %v1908_v32 = vld [vmem:[%s2126_s18 + $0x48] sm:$0xff]   ;;  %vm813_vm5 = vcmp.lt.s32.totalorder %v804_v30, 9 }
  0x17   : > { %v862_v26 = vrot.slane %v1759_v15, %v861_v21  ;;  %v873_v28 = vrot.slane %v1759_v15, %v872_v27  ;;  %v1909_v33 = vld [vmem:[%s2126_s18 + $0x20] sm:$0xff]   ;;  %v884_v34 = vrot.slane %v1759_v15, %v883_v29  ;;  %vm818_vm6 = vmand %vm813_vm5, %vm816_vm1  ;;  %v895_v36 = vrot.slane %v1759_v15, %v894_v35  ;;  %v1910_v38 = vld [vmem:[%s2126_s18 + $0x28] sm:$0xff]  }
  0x18   : > { %1820 = vmatpush3.bf16.msra.mxu0 %v1895_v2  ;;  %1861 = vmatpush3.bf16.msra.mxu1 %v1895_v2  ;;  %vm821_vm7 = vmand %vm818_vm6, %vm819_vm2  ;;  %v906_v39 = vrot.slane %v1759_v15, %v905_v37 }
  0x19   : > { %1821 = vmatprep.subr.bf16.mxu0 %v1896_v3  ;;  %1854 = vmatprep.subr.bf16.mxu1 %v1896_v3  ;;  %v1760_v40 = vsel %vm821_vm7, 1.0, %v2047_v14 }
  0x1a   : > { %831 = vbcast.lane.b32.xlu0 %v829_v16, 256  ;;  %842 = vbcast.lane.b32.xlu1 %v840_v17, 256  ;;  %v917_v41 = vrot.slane %v1760_v40, %v2147_v11  ;;  %v928_v42 = vrot.slane %v1760_v40, %v2150_v12 }
  0x1c   : > { %1822 = vmatpush3.bf16.msra.mxu0 %v1896_v3  ;;  %1862 = vmatpush3.bf16.msra.mxu1 %v1896_v3 }
  0x1d   : > { %1823 = vmatprep.subr.bf16.mxu0 %v1897_v9  ;;  %1855 = vmatprep.subr.bf16.mxu1 %v1897_v9 }
  0x1e   : > { %835 = vbcast.lane.b32.xlu0 %v829_v16, 264  ;;  %846 = vbcast.lane.b32.xlu1 %v840_v17, 264 }
  0x20   : > { %1824 = vmatpush3.bf16.msra.mxu0 %v1897_v9  ;;  %1863 = vmatpush3.bf16.msra.mxu1 %v1897_v9 }
  0x21   : > { %1825 = vmatprep.subr.bf16.mxu0 %v1898_v10  ;;  %1856 = vmatprep.subr.bf16.mxu1 %v1898_v10 }
  0x22   : > { %853 = vbcast.lane.b32.xlu0 %v851_v20, 256  ;;  %857 = vbcast.lane.b32.xlu1 %v851_v20, 264 }
  0x24   : > { %1826 = vmatpush3.bf16.msra.mxu0 %v1898_v10  ;;  %1864 = vmatpush3.bf16.msra.mxu1 %v1898_v10 }
  0x25   : > { %1827 = vmatprep.subr.bf16.mxu0 %v1899_v13  ;;  %1857 = vmatprep.subr.bf16.mxu1 %v1899_v13 }
  0x26   : > { %864 = vbcast.lane.b32.xlu0 %v862_v26, 256  ;;  %868 = vbcast.lane.b32.xlu1 %v862_v26, 264 }
  0x28   : > { %1828 = vmatpush3.bf16.msra.mxu0 %v1899_v13  ;;  %1865 = vmatpush3.bf16.msra.mxu1 %v1899_v13 }
  0x29   : > { %1829 = vmatprep.subr.bf16.mxu0 %v1900_v18  ;;  %1858 = vmatprep.subr.bf16.mxu1 %v1900_v18 }
  0x2a   : > { %875 = vbcast.lane.b32.xlu0 %v873_v28, 256  ;;  %879 = vbcast.lane.b32.xlu1 %v873_v28, 264 }
  0x2c   : > { %1830 = vmatpush3.bf16.msra.mxu0 %v1900_v18  ;;  %1866 = vmatpush3.bf16.msra.mxu1 %v1900_v18 }
  0x2e   : > { %886 = vbcast.lane.b32.xlu0 %v884_v34, 256  ;;  %890 = vbcast.lane.b32.xlu1 %v884_v34, 264 }
  0x2f   : > { %1832 = vmatmul.mubr.bf16.vlgmr.msra.gmra.mrb[0].mxu0 %v1903_v22  ;;  %1844 = vmatmul.mubr.bf16.vlgmr.msra.gmra.mrb[0].mxu1 %v1904_v23 }
  0x30   : > { %1835 = vmatprep.mubr.bf16.mxu0 %v1905_v24  ;;  %1847 = vmatprep.mubr.bf16.mxu1 %v1906_v25 }
  0x32   : > { %897 = vbcast.lane.b32.xlu0 %v895_v36, 256  ;;  %901 = vbcast.lane.b32.xlu1 %v895_v36, 264 }
  0x36   : > { %908 = vbcast.lane.b32.xlu0 %v906_v39, 256  ;;  %912 = vbcast.lane.b32.xlu1 %v906_v39, 264 }
  0x37   : > { %1836 = vmatmul.mubr.bf16.gmra.mrb[4].mxu0 %v1907_v31  ;;  %1848 = vmatmul.mubr.bf16.gmra.mrb[4].mxu1 %v1908_v32 }
  0x38   : > { %1839 = vmatprep.mubr.bf16.mxu0 %v1909_v33 }
  0x3a   : > { %919 = vbcast.lane.b32.xlu0 %v917_v41, 256  ;;  %923 = vbcast.lane.b32.xlu1 %v917_v41, 264 }
  0x3e   : > { %930 = vbcast.lane.b32.xlu0 %v928_v42, 256  ;;  %934 = vbcast.lane.b32.xlu1 %v928_v42, 264 }
  0x3f   : > { %1840 = vmatmul.mubr.bf16.gmra.mrb[8].mxu0 %v1910_v38 }
  0x8c   : > { %v2188_v43 = vpop.permute.xlu0 %831 }
  0x90   : > { %v2190_v44 = vpop.permute.xlu0 %835 }
  0x94   : > { %v2197_v46 = vpop.permute.xlu0 %853 }
  0x98   : > { %v2241_v15 = vpop.permute.xlu0 %864 }
  0x9c   : > { %v2268_v40 = vpop.permute.xlu0 %875 }
 0x102   : > { %v1833_v47 = vpop.f32.mrb[0].mxu0  ;;  %v1845_v49 = vpop.f32.mrb[0].mxu1 }
 0x103   : > { %v617_v50 = vmul.f32 %v1833_v47, %v2195_v45  ;;  %v629_v51 = vmul.f32 %v1845_v49, %v2195_v45  ;;  %v529_v52 = vpop.f32.mrb[1].mxu0  ;;  %v577_v53 = vpop.f32.mrb[1].mxu1  ;;  %v956_v49 = vld [vmem:[%s2834_s4] sm:$0x7] }
 0x104   : > { %v615_v54 = vmul.f32 %v2195_v45, %v529_v52  ;;  %v627_v55 = vmul.f32 %v2195_v45, %v577_v53  ;;  %v1834_v56 = vpop.f32.mrb[2].mxu0  ;;  %v1846_v57 = vpop.f32.mrb[2].mxu1  ;;  %v957_v52 = vld [vmem:[%s2834_s4 + $0x4] sm:$0x7] }
 0x105   : > { %v2209_v58 = vadd.f32 %v2202_v48, %v617_v50  ;;  %v2212_v59 = vadd.f32 %v2202_v48, %v629_v51  ;;  %v618_v60 = vmul.f32 %v1834_v56, %v2195_v45  ;;  %v630_v61 = vmul.f32 %v1846_v57, %v2195_v45  ;;  %v532_v62 = vpop.f32.mrb[3].mxu0  ;;  %v580_v63 = vpop.f32.mrb[3].mxu1 }
 0x106   : > { %v2217_v0 = vadd.f32 %v2202_v48, %v615_v54  ;;  %v2220_v1 = vadd.f32 %v2202_v48, %v627_v55  ;;  %v616_v2 = vmul.f32 %v2195_v45, %v532_v62  ;;  %v628_v3 = vmul.f32 %v2195_v45, %v580_v63 }
 0x107   : > { %v1741_v4 = vmul.f32 -1.442695, %v2209_v58  ;;  %v1753_v5 = vmul.f32 -1.442695, %v2212_v59  ;;  %v2227_v6 = vadd.f32 %v2202_v48, %v618_v60  ;;  %v2230_v7 = vadd.f32 %v2202_v48, %v630_v61 }
 0x108   : > { %v1739_v8 = vmul.f32 -1.442695, %v2217_v0  ;;  %v1751_v9 = vmul.f32 -1.442695, %v2220_v1  ;;  %v2235_v10 = vadd.f32 %v2202_v48, %v616_v2  ;;  %v2238_v13 = vadd.f32 %v2202_v48, %v628_v3  ;;  %v2285_v2 = vpop.permute.xlu0 %886 }
 0x109   : > { %1911 = vpow2.f32 %v1741_v4  ;;  %v1742_v14 = vmul.f32 -1.442695, %v2227_v6  ;;  %v1754_v16 = vmul.f32 -1.442695, %v2230_v7  ;;  %v2280_v60 = vrot.slane %v956_v49, %v2147_v11  ;;  %v958_v4 = vld [vmem:[%s2834_s4 + $0x8] sm:$0x7] }
 0x10a   : > { %1913 = vpow2.f32 %v1753_v5  ;;  %v1837_v17 = vpop.f32.mrb[4].mxu0  ;;  %v1849_v18 = vpop.f32.mrb[4].mxu1  ;;  %v1740_v20 = vmul.f32 -1.442695, %v2235_v10  ;;  %v1752_v25 = vmul.f32 -1.442695, %v2238_v13  ;;  %v2283_v61 = vrot.slane %v956_v49, %v2150_v12 }
 0x10b   : > { %1915 = vpow2.f32 %v1739_v8  ;;  %v621_v21 = vmul.f32 %v1837_v17, %v2195_v45  ;;  %v633_v22 = vmul.f32 %v1849_v18, %v2195_v45  ;;  %v545_v23 = vpop.f32.mrb[5].mxu0  ;;  %v593_v24 = vpop.f32.mrb[5].mxu1  ;;  %v2291_v5 = vrot.slane %v956_v49, %v2165_v19 }
 0x10c   : > { %1917 = vpow2.f32 %v1751_v9  ;;  %v619_v26 = vmul.f32 %v2195_v45, %v545_v23  ;;  %v631_v27 = vmul.f32 %v2195_v45, %v593_v24  ;;  %v1838_v28 = vpop.f32.mrb[6].mxu0  ;;  %v1850_v29 = vpop.f32.mrb[6].mxu1  ;;  %v2294_v8 = vrot.slane %v957_v52, %v2147_v11 }
 0x10d   : > { %1919 = vpow2.f32 %v1742_v14  ;;  %v2251_v30 = vadd.f32 %v2202_v48, %v621_v21  ;;  %v2254_v31 = vadd.f32 %v2202_v48, %v633_v22  ;;  %v622_v32 = vmul.f32 %v1838_v28, %v2195_v45  ;;  %v548_v33 = vpop.f32.mrb[7].mxu0  ;;  %v596_v34 = vpop.f32.mrb[7].mxu1 }
 0x10e   : > { %1921 = vpow2.f32 %v1754_v16  ;;  %v2258_v35 = vadd.f32 %v2202_v48, %v619_v26  ;;  %v2261_v36 = vadd.f32 %v2202_v48, %v631_v27  ;;  %v2297_v16 = vrot.slane %v957_v52, %v2150_v12 }
 0x10f   : > { %2845 = vst [vmem:[#allocation2_spill] sm:$0xff] %v2254_v31  ;;  %1923 = vpow2.f32 %v1740_v20  ;;  %v1745_v37 = vmul.f32 -1.442695, %v2251_v30  ;;  %v1757_v38 = vmul.f32 -1.442695, %v2254_v31  ;;  %v2266_v39 = vadd.f32 %v2202_v48, %v622_v32 }
 0x110   : > { %2846 = vst [vmem:[#allocation3_spill] sm:$0xff] %v2261_v36  ;;  %1925 = vpow2.f32 %v1752_v25  ;;  %v1743_v41 = vmul.f32 -1.442695, %v2258_v35  ;;  %v1755_v42 = vmul.f32 -1.442695, %v2261_v36  ;;  %v634_v18 = vmul.f32 %v1850_v29, %v2195_v45 }
 0x111   : > { %1927 = vpow2.f32 %v1745_v37  ;;  %v1746_v47 = vmul.f32 -1.442695, %v2266_v39  ;;  %v2301_v21 = vrot.slane %v957_v52, %v2165_v19  ;;  %v620_v23 = vmul.f32 %v2195_v45, %v548_v33 }
 0x112   : > { %1929 = vpow2.f32 %v1757_v38  ;;  %v1841_v50 = vpop.f32.mrb[8].mxu0  ;;  %v2305_v25 = vrot.slane %v958_v4, %v2147_v11  ;;  %v632_v27 = vmul.f32 %v2195_v45, %v596_v34  ;;  %v2311_v33 = vadd.f32 %v2202_v48, %v634_v18 }
 0x113   : > { %v1912_v51 = vpop.eup %1911  ;;  %1931 = vpow2.f32 %v1743_v41  ;;  %v561_v53 = vpop.f32.mrb[9].mxu0  ;;  %v625_v29 = vmul.f32 %v1841_v50, %v2195_v45  ;;  %v2317_v49 = vadd.f32 %v2202_v48, %v620_v23  ;;  %v2321_v52 = vrot.slane %v958_v4, %v2150_v12 }
 0x114   : > { %v1914_v54 = vpop.eup %1913  ;;  %v724_v55 = vadd.f32 1.0, %v1912_v51  ;;  %1933 = vpow2.f32 %v1755_v42  ;;  %v1842_v56 = vpop.f32.mrb[10].mxu0  ;;  %v623_v37 = vmul.f32 %v2195_v45, %v561_v53  ;;  %2847 = vst [vmem:[#allocation4_spill] sm:$0xff] %v2311_v33  ;;  %v1758_v12 = vmul.f32 -1.442695, %v2311_v33 }
 0x115   : > { %v1916_v57 = vpop.eup %1915  ;;  %v736_v62 = vadd.f32 1.0, %v1914_v54  ;;  %1935 = vpow2.f32 %v1746_v47  ;;  %v564_v63 = vpop.f32.mrb[11].mxu0  ;;  %v626_v11 = vmul.f32 %v1842_v56, %v2195_v45  ;;  %v2324_v54 = vadd.f32 %v2202_v48, %v632_v27 }
 0x116   : > { %v1918_v3 = vpop.eup %1917  ;;  %1937 = vrcp.f32 %v724_v55  ;;  %v722_v9 = vadd.f32 1.0, %v1916_v57  ;;  %v2314_v42 = vpop.permute.xlu0 %897  ;;  %v624_v50 = vmul.f32 %v2195_v45, %v564_v63  ;;  %v2327_v57 = vadd.f32 %v2202_v48, %v625_v29 }
 0x117   : > { %v1920_v14 = vpop.eup %1919  ;;  %1939 = vrcp.f32 %v736_v62  ;;  %v734_v17 = vadd.f32 1.0, %v1918_v3  ;;  %2848 = vst [vmem:[#allocation5_spill] sm:$0xff] %v2324_v54  ;;  %v2330_v62 = vadd.f32 %v2202_v48, %v623_v37  ;;  %v2334_v63 = vadd.f32 %v2202_v48, %v626_v11  ;;  %v843_v23 = vpop.permute.xlu1 %842 }
 0x118   : > { %v1922_v20 = vpop.eup %1921  ;;  %1941 = vrcp.f32 %v722_v9  ;;  %v725_v22 = vadd.f32 1.0, %v1920_v14  ;;  %v2338_v18 = vadd.f32 %v2202_v48, %v624_v50 }
 0x119   : > { %v1924_v24 = vpop.eup %1923  ;;  %1943 = vrcp.f32 %v734_v17  ;;  %v737_v26 = vadd.f32 1.0, %v1922_v20  ;;  %v1744_v17 = vmul.f32 -1.442695, %v2317_v49  ;;  %v2349_v29 = vmul.f32 -1.442695, %v2330_v62 }
 0x11a   : > { %v1926_v28 = vpop.eup %1925  ;;  %1945 = vrcp.f32 %v725_v22  ;;  %v723_v32 = vadd.f32 1.0, %v1924_v24  ;;  %v2341_v22 = vrot.slane %v958_v4, %v2165_v19  ;;  %v909_v27 = vpop.permute.xlu0 %908 }
 0x11b   : > { %v1928_v38 = vpop.eup %1927  ;;  %1947 = vrcp.f32 %v737_v26  ;;  %v735_v41 = vadd.f32 1.0, %v1926_v28  ;;  %v1756_v26 = vmul.f32 -1.442695, %v2324_v54 }
 0x11c   : > { %v1930_v47 = vpop.eup %1929  ;;  %1949 = vrcp.f32 %v723_v32  ;;  %v728_v34 = vadd.f32 1.0, %v1928_v38  ;;  %v2346_v32 = vmul.f32 -1.442695, %v2327_v57 }
 0x11d   : > { %v1932_v51 = vpop.eup %1931  ;;  %1951 = vrcp.f32 %v735_v41  ;;  %v740_v53 = vadd.f32 1.0, %v1930_v47  ;;  %v2357_v41 = vmul.f32 -1.442695, %v2338_v18 }
 0x11e   : > { %v1934_v55 = vpop.eup %1933  ;;  %1953 = vrcp.f32 %v728_v34  ;;  %v726_v56 = vadd.f32 1.0, %v1932_v51 }
 0x11f   : > { %v1936_v3 = vpop.eup %1935  ;;  %1955 = vrcp.f32 %v740_v53  ;;  %v738_v45 = vadd.f32 1.0, %v1934_v55 }
 0x120   : > { %v1938_v9 = vpop.eup %1937  ;;  %1957 = vrcp.f32 %v726_v56  ;;  %v729_v14 = vadd.f32 1.0, %v1936_v3 }
 0x121   : > { %v1940_v20 = vpop.eup %1939  ;;  %v784_v24 = vmul.f32 %v1938_v9, %v2209_v58  ;;  %1959 = vrcp.f32 %v738_v45  ;;  %v2354_v58 = vmul.f32 -1.442695, %v2334_v63 }
 0x122   : > { %v1942_v28 = vpop.eup %1941  ;;  %1961 = vrcp.f32 %v729_v14  ;;  %v796_v48 = vmul.f32 %v1940_v20, %v2212_v59  ;;  %v847_v14 = vpop.permute.xlu1 %846 }
 0x123   : > { %v1944_v37 = vpop.eup %1943  ;;  %v782_v19 = vmul.f32 %v1942_v28, %v2217_v0  ;;  %v938_v4 = vmul.f32 %v843_v23, %v784_v24  ;;  %1963 = vpow2.f32 %v1758_v12 }
 0x124   : > { %v1946_v38 = vpop.eup %1945  ;;  %1965 = vpow2.f32 %v1744_v17  ;;  %v2360_v11 = vmul.f32 %v1944_v37, %v2220_v1  ;;  %v2362_v47 = vmul.f32 %v909_v27, %v796_v48 }
 0x125   : > { %v2364_v59 = vpop.eup %1947  ;;  %v936_v0 = vmul.f32 %v2188_v43, %v782_v19  ;;  %v2368_v34 = vmul.f32 %v2294_v8, %v938_v4  ;;  %v785_v50 = vmul.f32 %v1946_v38, %v2227_v6  ;;  %v964_v51 = vmul.f32 %v2280_v60, %v938_v4 }
 0x126   : > { %v1950_v53 = vpop.eup %1949  ;;  %v985_v55 = vmul.f32 %v2283_v61, %v938_v4  ;;  %v1062_v56 = vmul.f32 %v2291_v5, %v938_v4  ;;  %v1157_v1 = vmul.f32 %v2297_v16, %v938_v4  ;;  %v1233_v3 = vmul.f32 %v2301_v21, %v938_v4 }
 0x127   : > { %v2376_v45 = vpop.eup %1951  ;;  %v963_v43 = vmul.f32 %v2280_v60, %v936_v0  ;;  %v983_v12 = vmul.f32 %v2283_v61, %v936_v0  ;;  %v1060_v9 = vmul.f32 %v2291_v5, %v936_v0  ;;  %v783_v6 = vmul.f32 %v1950_v53, %v2235_v10 }
 0x128   : > { %v1954_v17 = vpop.eup %1953  ;;  %v939_v20 = vmul.f32 %v847_v14, %v785_v50  ;;  %v1019_v23 = vrot.slane %v985_v55, 1  ;;  %v1096_v24 = vrot.slane %v1062_v56, 2  ;;  %v1189_v27 = vrot.slane %v1157_v1, 1 }
 0x129   : > { %v2382_v28 = vpop.eup %1955  ;;  %v1016_v48 = vrot.slane %v983_v12, 1  ;;  %v1093_v37 = vrot.slane %v1060_v9, 2  ;;  %v937_v19 = vmul.f32 %v2190_v44, %v783_v6  ;;  %v1265_v4 = vrot.slane %v1233_v3, 2 }
 0x12a   : > { %2849 = vst [vmem:[#allocation6_spill] sm:$0xff] %v2382_v28  ;;  %v1958_v38 = vpop.eup %1957  ;;  %v986_v33 = vmul.f32 %v2283_v61, %v939_v20  ;;  %v1063_v0 = vmul.f32 %v2291_v5, %v939_v20  ;;  %v1158_v10 = vmul.f32 %v2297_v16, %v939_v20  ;;  %v1234_v53 = vmul.f32 %v2301_v21, %v939_v20 }
 0x12b   : > { %v2389_v50 = vpop.eup %1959  ;;  %v984_v55 = vmul.f32 %v2283_v61, %v937_v19  ;;  %v1061_v56 = vmul.f32 %v2291_v5, %v937_v19  ;;  %1967 = vpow2.f32 %v1756_v26  ;;  %v786_v1 = vmul.f32 %v1958_v38, %v2258_v35 }
 0x12c   : > { %2850 = vst [vmem:[#allocation7_spill] sm:$0xff] %v2389_v50  ;;  %v1962_v44 = vpop.eup %1961  ;;  %v1020_v3 = vrot.slane %v986_v33, 1  ;;  %v1097_v12 = vrot.slane %v1063_v0, 2  ;;  %v1190_v9 = vrot.slane %v1158_v10, 1  ;;  %v1266_v6 = vrot.slane %v1234_v53, 2 }
 0x12d   : > { %v1964_v14 = vpop.eup %1963  ;;  %v1017_v28 = vrot.slane %v984_v55, 1  ;;  %v1094_v31 = vrot.slane %v1061_v56, 2  ;;  %v940_v54 = vmul.f32 %v2197_v46, %v786_v1  ;;  %v788_v20 = vmul.f32 %v1954_v17, %v2251_v30  ;;  %v2402_v46 = vpop.permute.xlu1 %857 }
 0x12e   : > { %v1966_v50 = vpop.eup %1965  ;;  %v1021_v36 = vsel %vm1015_vm8, %v1019_v23, %v1020_v3  ;;  %v1098_v19 = vsel %vm1092_vm9, %v1096_v24, %v1097_v12  ;;  %v1191_v26 = vsel %vm1015_vm8, %v1189_v27, %v1190_v9  ;;  %v1267_v35 = vsel %vm1092_vm9, %v1265_v4, %v1266_v6 }
 0x12f   : > { %v1018_v33 = vsel %vm1015_vm8, %v1016_v48, %v1017_v28  ;;  %v1095_v38 = vsel %vm1092_vm9, %v1093_v37, %v1094_v31  ;;  %v1049_v0 = vadd.f32 %v1021_v36, %v964_v51  ;;  %v741_v10 = vadd.f32 1.0, %v1964_v14 }
 0x130   : > { %v1048_v53 = vadd.f32 %v1018_v33, %v963_v43  ;;  %v727_v55 = vadd.f32 1.0, %v1966_v50  ;;  %v2405_v30 = vmul.f32 %v2280_v60, %v940_v54  ;;  %v2408_v17 = vmul.f32 %v2283_v61, %v940_v54 }
 0x131   : > { %v1126_v23 = vadd.f32 %v1098_v19, %v1049_v0  ;;  %1969 = vrcp.f32 %v741_v10  ;;  %v2411_v24 = vmul.f32 %v2291_v5, %v940_v54  ;;  %v1138_v27 = vmul.f32 %v2294_v8, %v940_v54 }
 0x132   : > { %v1125_v31 = vadd.f32 %v1095_v38, %v1048_v53  ;;  %1971 = vrcp.f32 %v727_v55  ;;  %v1022_v36 = vrot.slane %v2408_v17, 1  ;;  %v2416_v51 = vmul.f32 %v2297_v16, %v940_v54  ;;  %v869_v38 = vpop.permute.xlu1 %868 }
 0x133   : > { %v2419_v28 = vadd.f32 %v1138_v27, %v1126_v23  ;;  %v2422_v48 = vmul.f32 %v2301_v21, %v940_v54  ;;  %v1309_v37 = vmul.f32 %v2305_v25, %v940_v54  ;;  %v2428_v56 = vmul.f32 %v2321_v52, %v940_v54 }
 0x134   : > { %v1145_v4 = vadd.f32 %v2368_v34, %v1125_v31  ;;  %v2431_v1 = vmul.f32 %v2341_v22, %v940_v54  ;;  %v942_v9 = vmul.f32 %v2241_v15, %v788_v20  ;;  %1973 = vpow2.f32 %v2346_v32 }
 0x135   : > { %v1968_v3 = vpop.eup %1967  ;;  %v789_v6 = vmul.f32 %v1962_v44, %v2266_v39  ;;  %1975 = vpow2.f32 %v2349_v29  ;;  %v2855_v17 = vrot.slane %v2428_v56, 1  ;;  %v2515_v56 = vmul.f32 %v2314_v42, %v2360_v11  ;;  %v2531_v42 = vld [vmem:[%s2836_s6] ss:$0 sm:$0xff] }
 0x136   : > { %v1221_v14 = vadd.f32 %v1191_v26, %v1145_v4  ;;  %v739_v19 = vadd.f32 1.0, %v1968_v3  ;;  %v966_v0 = vmul.f32 %v2280_v60, %v942_v9  ;;  %v989_v10 = vmul.f32 %v2283_v61, %v942_v9 }
 0x137   : > { %v943_v54 = vmul.f32 %v869_v38, %v789_v6  ;;  %v1066_v15 = vmul.f32 %v2291_v5, %v942_v9  ;;  %v2444_v39 = vmul.f32 %v2294_v8, %v942_v9  ;;  %v1161_v26 = vmul.f32 %v2297_v16, %v942_v9 }
 0x138   : > { %v1297_v53 = vadd.f32 %v1267_v35, %v1221_v14  ;;  %1977 = vrcp.f32 %v739_v19  ;;  %v1025_v44 = vrot.slane %v989_v10, 1  ;;  %v1237_v27 = vmul.f32 %v2301_v21, %v942_v9 }
 0x139   : > { %v990_v32 = vmul.f32 %v2283_v61, %v943_v54  ;;  %v1067_v20 = vmul.f32 %v2291_v5, %v943_v54  ;;  %v1102_v55 = vrot.slane %v1066_v15, 2  ;;  %v1162_v23 = vmul.f32 %v2297_v16, %v943_v54 }
 0x13a   : > { %v1317_v29 = vadd.f32 %v1309_v37, %v1297_v53  ;;  %v1195_v3 = vrot.slane %v1161_v26, 1  ;;  %v1238_v6 = vmul.f32 %v2301_v21, %v943_v54  ;;  %v1271_v38 = vrot.slane %v1237_v27, 2 }
 0x13b   : > { %v2451_v35 = vpop.eup %1969  ;;  %v1026_v31 = vrot.slane %v990_v32, 1  ;;  %v1103_v4 = vrot.slane %v1067_v20, 2  ;;  %v1196_v19 = vrot.slane %v1162_v23, 1  ;;  %v2455_v10 = vmul.f32 %v2305_v25, %v942_v9  ;;  %v2461_v32 = vpop.permute.xlu1 %879 }
 0x13c   : > { %2851 = vst [vmem:[#allocation8_spill] sm:$0xff] %v2451_v35  ;;  %v1972_v14 = vpop.eup %1971  ;;  %v1331_v37 = vmul.f32 %v2321_v52, %v942_v9  ;;  %v1272_v34 = vrot.slane %v1238_v6, 2  ;;  %v1332_v23 = vmul.f32 %v2321_v52, %v943_v54  ;;  %1979 = vpow2.f32 %v2354_v58 }
 0x13d   : > { %v787_v53 = vmul.f32 %v1972_v14, %v2317_v49  ;;  %v1027_v15 = vsel %vm1015_vm8, %v1025_v44, %v1026_v31  ;;  %v1104_v33 = vsel %vm1092_vm9, %v1102_v55, %v1103_v4  ;;  %v2464_v26 = vsel %vm1015_vm8, %v1195_v3, %v1196_v19 }
 0x13e   : > { %v1051_v20 = vadd.f32 %v1027_v15, %v966_v0  ;;  %v1364_v27 = vrot.slane %v1331_v37, 1  ;;  %v1974_v12 = vpop.eup %1973  ;;  %v2469_v43 = vsel %vm1092_vm9, %v1271_v38, %v1272_v34  ;;  %v1407_v49 = vmul.f32 %v2341_v22, %v942_v9 }
 0x13f   : > { %v941_v50 = vmul.f32 %v2402_v46, %v787_v53  ;;  %v1408_v44 = vmul.f32 %v2341_v22, %v943_v54  ;;  %v732_v55 = vadd.f32 1.0, %v1974_v12  ;;  %v1365_v0 = vrot.slane %v1332_v23, 1  ;;  %v1976_v4 = vpop.eup %1975  ;;  %v2484_v37 = vpop.permute.xlu1 %890 }
 0x140   : > { %v2473_v31 = vadd.f32 %v1104_v33, %v1051_v20  ;;  %v730_v33 = vadd.f32 1.0, %v1976_v4  ;;  %v2852_v35 = vrot.slane %v2411_v24, 2  ;;  %v2856_v24 = vrot.slane %v2431_v1, 2 }
 0x141   : > { %v988_v3 = vmul.f32 %v2283_v61, %v941_v50  ;;  %v1065_v6 = vmul.f32 %v2291_v5, %v941_v50  ;;  %v1160_v46 = vmul.f32 %v2297_v16, %v941_v50  ;;  %v1236_v34 = vmul.f32 %v2301_v21, %v941_v50 }
 0x142   : > { %v2480_v14 = vpop.eup %1977  ;;  %v1330_v9 = vmul.f32 %v2321_v52, %v941_v50  ;;  %v1406_v12 = vmul.f32 %v2341_v22, %v941_v50  ;;  %1981 = vrcp.f32 %v732_v55  ;;  %v1366_v20 = vsel %vm1015_vm8, %v1364_v27, %v1365_v0 }
 0x143   : > { %v1023_v54 = vrot.slane %v988_v3, 1  ;;  %v1100_v19 = vrot.slane %v1065_v6, 2  ;;  %v1193_v58 = vrot.slane %v1160_v46, 1  ;;  %v1269_v38 = vrot.slane %v1236_v34, 2 }
 0x144   : > { %v1362_v53 = vrot.slane %v1330_v9, 1  ;;  %v1438_v15 = vrot.slane %v1406_v12, 2  ;;  %1983 = vrcp.f32 %v730_v33  ;;  %v2853_v55 = vrot.slane %v2416_v51, 1 }
 0x145   : > { %v1024_v23 = vsel %vm1015_vm8, %v1022_v36, %v1023_v54  ;;  %v1101_v50 = vsel %vm1092_vm9, %v2852_v35, %v1100_v19  ;;  %v2854_v3 = vrot.slane %v2422_v48, 2  ;;  %v1440_v51 = vrot.slane %v1407_v49, 2  ;;  %v2511_v48 = vld [vmem:[%s2835_s5] ss:$0 sm:$0xff]  ;;  %v902_v49 = vpop.permute.xlu1 %901 }
 0x146   : > { %v1194_v4 = vsel %vm1015_vm8, %v2853_v55, %v1193_v58  ;;  %v1050_v46 = vadd.f32 %v1024_v23, %v2405_v30  ;;  %v1363_v36 = vsel %vm1015_vm8, %v2855_v17, %v1362_v53  ;;  %v1439_v35 = vsel %vm1092_vm9, %v2856_v24, %v1438_v15  ;;  %v1980_v12 = vpop.eup %1979 }
 0x147   : > { %v1270_v6 = vsel %vm1092_vm9, %v2854_v3, %v1269_v38  ;;  %v1222_v27 = vadd.f32 %v1194_v4, %v2419_v28  ;;  %v1393_v0 = vadd.f32 %v1363_v36, %v1317_v29  ;;  %v1441_v34 = vrot.slane %v1408_v44, 2 }
 0x148   : > { %1985 = vpow2.f32 %v2357_v41  ;;  %v1127_v30 = vadd.f32 %v1101_v50, %v1050_v46  ;;  %v795_v1 = vmul.f32 %v2376_v45, %v2238_v13  ;;  %v2522_v41 = vmul.f32 %v2364_v59, %v2230_v7 }
 0x149   : > { %v1298_v28 = vadd.f32 %v1270_v6, %v1222_v27  ;;  %v1469_v9 = vadd.f32 %v1439_v35, %v1393_v0  ;;  %v1442_v29 = vsel %vm1092_vm9, %v1440_v51, %v1441_v34  ;;  %v2526_v44 = vmul.f32 %v2305_v25, %v2362_v47 }
 0x14a   : > { %v1147_v13 = vadd.f32 %v2444_v39, %v1127_v30  ;;  %v2535_v45 = vmul.f32 %v902_v49, %v795_v1  ;;  %v2539_v7 = vmul.f32 %v2280_v60, %v2515_v56  ;;  %v733_v33 = vadd.f32 1.0, %v1980_v12 }
 0x14b   : > { %v1318_v11 = vadd.f32 %v2455_v10, %v1298_v28  ;;  %v1484_v59 = vmul.f32 %v2511_v48, %v1469_v9  ;;  %v995_v54 = vmul.f32 %v2283_v61, %v2515_v56  ;;  %v2546_v19 = vmul.f32 %v2291_v5, %v2515_v56 }
 0x14c   : > { %v1982_v58 = vpop.eup %1981  ;;  %v1223_v39 = vadd.f32 %v2464_v26, %v1147_v13  ;;  %v996_v38 = vmul.f32 %v2283_v61, %v2535_v45  ;;  %v2553_v53 = vmul.f32 %v2291_v5, %v2535_v45  ;;  %1987 = vrcp.f32 %v733_v33 }
 0x14d   : > { %v1394_v10 = vadd.f32 %v1366_v20, %v1318_v11  ;;  %v2556_v15 = vadd.f32 %v2531_v42, %v1484_v59  ;;  %v792_v23 = vmul.f32 %v1982_v58, %v2327_v57  ;;  %v1034_v50 = vrot.slane %v995_v54, 1 }
 0x14e   : > { %v1984_v55 = vpop.eup %1983  ;;  %v1299_v4 = vadd.f32 %v2469_v43, %v1223_v39  ;;  %v1035_v26 = vrot.slane %v996_v38, 1  ;;  %v1111_v20 = vrot.slane %v2546_v19, 2  ;;  %v1112_v17 = vrot.slane %v2553_v53, 2 }
 0x14f   : > { %2857 = vst [vmem:[#allocation9_spill] sm:$0xff] %v2556_v15  ;;  %v1470_v3 = vadd.f32 %v1442_v29, %v1394_v10  ;;  %v1763_v6 = vmul.f32 -1.442695, %v2556_v15  ;;  %v790_v46 = vmul.f32 %v1984_v55, %v2330_v62  ;;  %v946_v27 = vmul.f32 %v2285_v2, %v792_v23 }
 0x150   : > { %v1036_v57 = vsel %vm1015_vm8, %v1034_v50, %v1035_v26  ;;  %v2569_v24 = vmul.f32 %v2294_v8, %v2515_v56  ;;  %v2573_v43 = vmul.f32 %v2297_v16, %v2515_v56 }
 0x151   : > { %v1485_v36 = vmul.f32 %v2511_v48, %v1470_v3  ;;  %1989 = vpow2.f32 %v1763_v6  ;;  %v944_v62 = vmul.f32 %v2268_v40, %v790_v46  ;;  %v2577_v2 = vmul.f32 %v2280_v60, %v946_v27 }
 0x152   : > { %v1986_v35 = vpop.eup %1985  ;;  %v2580_v0 = vmul.f32 %v2283_v61, %v946_v27  ;;  %v1070_v30 = vmul.f32 %v2291_v5, %v946_v27  ;;  %v2587_v28 = vmul.f32 %v2294_v8, %v946_v27  ;;  %v1165_v3 = vmul.f32 %v2297_v16, %v946_v27 }
 0x153   : > { %v2583_v51 = vadd.f32 %v2531_v42, %v1485_v36  ;;  %v731_v34 = vadd.f32 1.0, %v1986_v35  ;;  %v2590_v1 = vmul.f32 %v2280_v60, %v944_v62  ;;  %v2593_v40 = vmul.f32 %v2283_v61, %v944_v62 }
 0x154   : > { %v2596_v9 = vmul.f32 %v2291_v5, %v944_v62  ;;  %v1140_v29 = vmul.f32 %v2294_v8, %v944_v62  ;;  %v2601_v12 = vmul.f32 %v2297_v16, %v944_v62  ;;  %v2604_v13 = vmul.f32 %v2301_v21, %v944_v62 }
 0x155   : > { %2858 = vst [vmem:[#allocation10_spill] sm:$0xff] %v2583_v51  ;;  %v1764_v49 = vmul.f32 -1.442695, %v2583_v51  ;;  %1991 = vrcp.f32 %v731_v34  ;;  %v1311_v54 = vmul.f32 %v2305_v25, %v944_v62  ;;  %v2615_v39 = vmul.f32 %v2321_v52, %v944_v62 }
 0x156   : > { %v2609_v33 = vadd.f32 %v1140_v29, %v2473_v31  ;;  %v1988_v10 = vpop.eup %1987  ;;  %v2620_v53 = vmul.f32 %v2341_v22, %v944_v62  ;;  %v1031_v23 = vrot.slane %v2580_v0, 1  ;;  %v1108_v31 = vrot.slane %v1070_v30, 2 }
 0x157   : > { %1993 = vpow2.f32 %v1764_v49  ;;  %v2617_v38 = vadd.f32 %v1311_v54, %v1299_v4  ;;  %v793_v55 = vmul.f32 %v1988_v10, %v2334_v63  ;;  %v1241_v26 = vmul.f32 %v2301_v21, %v946_v27 }
 0x158   : > { %v2629_v46 = vmul.f32 %v2305_v25, %v946_v27  ;;  %v1335_v4 = vmul.f32 %v2321_v52, %v946_v27  ;;  %v1411_v36 = vmul.f32 %v2341_v22, %v946_v27  ;;  %v1201_v62 = vrot.slane %v1165_v3, 1 }
 0x159   : > { %v947_v35 = vmul.f32 %v2484_v37, %v793_v55  ;;  %v1277_v0 = vrot.slane %v1241_v26, 2  ;;  %v2635_v34 = vadd.f32 %v1036_v57, %v2539_v7  ;;  %v2638_v49 = vsel %vm1092_vm9, %v1111_v20, %v1112_v17 }
 0x15a   : > { %v1370_v30 = vrot.slane %v1335_v4, 1  ;;  %v1446_v29 = vrot.slane %v1411_v36, 2  ;;  %v1168_v54 = vmul.f32 %v2297_v16, %v2535_v45  ;;  %v1204_v3 = vrot.slane %v2573_v43, 1 }
 0x15b   : > { %v1990_v63 = vpop.eup %1989  ;;  %v994_v6 = vmul.f32 %v2283_v61, %v947_v35  ;;  %v1071_v27 = vmul.f32 %v2291_v5, %v947_v35  ;;  %v1166_v37 = vmul.f32 %v2297_v16, %v947_v35  ;;  %v1242_v55 = vmul.f32 %v2301_v21, %v947_v35 }
 0x15c   : > { %v1531_v10 = vadd.f32 1.0, %v1990_v63  ;;  %v1336_v7 = vmul.f32 %v2321_v52, %v947_v35  ;;  %v1412_v57 = vmul.f32 %v2341_v22, %v947_v35  ;;  %v1205_v35 = vrot.slane %v1168_v54, 1 }
 0x15d   : > { %v1032_v17 = vrot.slane %v994_v6, 1  ;;  %v1109_v26 = vrot.slane %v1071_v27, 2  ;;  %v1202_v4 = vrot.slane %v1166_v37, 1  ;;  %v1278_v63 = vrot.slane %v1242_v55, 2 }
 0x15e   : > { %1995 = vrcp.f32 %v1531_v10  ;;  %v1371_v50 = vrot.slane %v1336_v7, 1  ;;  %v1447_v58 = vrot.slane %v1412_v57, 2  ;;  %v1206_v37 = vsel %vm1015_vm8, %v1204_v3, %v1205_v35 }
 0x15f   : > { %v1992_v20 = vpop.eup %1991  ;;  %v1033_v59 = vsel %vm1015_vm8, %v1031_v23, %v1032_v17  ;;  %v1110_v11 = vsel %vm1092_vm9, %v1108_v31, %v1109_v26  ;;  %v1203_v51 = vsel %vm1015_vm8, %v1201_v62, %v1202_v4  ;;  %v1279_v10 = vsel %vm1092_vm9, %v1277_v0, %v1278_v63 }
 0x160   : > { %v791_v36 = vmul.f32 %v1992_v20, %v2338_v18  ;;  %v1053_v6 = vadd.f32 %v1033_v59, %v2577_v2  ;;  %v1372_v18 = vsel %vm1015_vm8, %v1370_v30, %v1371_v50  ;;  %v1448_v27 = vsel %vm1092_vm9, %v1446_v29, %v1447_v58 }
 0x161   : > { %v1994_v19 = vpop.eup %1993  ;;  %v1243_v23 = vmul.f32 %v2301_v21, %v2515_v56  ;;  %v1244_v29 = vmul.f32 %v2301_v21, %v2535_v45  ;;  %v2859_v57 = vrot.slane %v2593_v40, 1  ;;  %v2860_v20 = vrot.slane %v2596_v9, 2 }
 0x162   : > { %v1532_v15 = vadd.f32 1.0, %v1994_v19  ;;  %v945_v43 = vmul.f32 %v2461_v32, %v791_v36  ;;  %v1130_v62 = vadd.f32 %v1110_v11, %v1053_v6  ;;  %v2861_v11 = vrot.slane %v2601_v12, 1 }
 0x163   : > { %v1280_v4 = vrot.slane %v1243_v23, 2  ;;  %v2864_v12 = vrot.slane %v2620_v53, 2  ;;  %v1413_v53 = vmul.f32 %v2341_v22, %v2515_v56 }
 0x164   : > { %1997 = vrcp.f32 %v1532_v15  ;;  %v992_v31 = vmul.f32 %v2283_v61, %v945_v43  ;;  %v1069_v19 = vmul.f32 %v2291_v5, %v945_v43  ;;  %v1164_v32 = vmul.f32 %v2297_v16, %v945_v43 }
 0x165   : > { %v1240_v2 = vmul.f32 %v2301_v21, %v945_v43  ;;  %v1334_v59 = vmul.f32 %v2321_v52, %v945_v43  ;;  %v1410_v50 = vmul.f32 %v2341_v22, %v945_v43  ;;  %v1150_v7 = vadd.f32 %v2569_v24, %v1130_v62 }
 0x166   : > { %v1029_v58 = vrot.slane %v992_v31, 1  ;;  %v1106_v0 = vrot.slane %v1069_v19, 2  ;;  %v1199_v30 = vrot.slane %v1164_v32, 1  ;;  %v2862_v24 = vrot.slane %v2604_v13, 2 }
 0x167   : > { %v1275_v15 = vrot.slane %v1240_v2, 2  ;;  %v1368_v54 = vrot.slane %v1334_v59, 1  ;;  %v1444_v55 = vrot.slane %v1410_v50, 2  ;;  %v2863_v43 = vrot.slane %v2615_v39, 1  ;;  %v913_v59 = vpop.permute.xlu1 %912 }
 0x168   : > { %v1030_v3 = vsel %vm1015_vm8, %v2859_v57, %v1029_v58  ;;  %v1107_v17 = vsel %vm1092_vm9, %v2860_v20, %v1106_v0  ;;  %v1200_v26 = vsel %vm1015_vm8, %v2861_v11, %v1199_v30  ;;  %v2679_v36 = vpop.eup %1995  ;;  %v1226_v31 = vadd.f32 %v1206_v37, %v1150_v7 }
 0x169   : > { %v1052_v63 = vadd.f32 %v1030_v3, %v2590_v1  ;;  %v1224_v35 = vadd.f32 %v1200_v26, %v2609_v33  ;;  %v1276_v40 = vsel %vm1092_vm9, %v2862_v24, %v1275_v15  ;;  %v1369_v9 = vsel %vm1015_vm8, %v2863_v43, %v1368_v54 }
 0x16a   : > { %v1395_v6 = vadd.f32 %v1369_v9, %v2617_v38  ;;  %v1445_v23 = vsel %vm1092_vm9, %v2864_v12, %v1444_v55  ;;  %v1281_v19 = vrot.slane %v1244_v29, 2  ;;  %v1313_v33 = vmul.f32 %v2305_v25, %v2515_v56 }
 0x16b   : > { %v1129_v32 = vadd.f32 %v1107_v17, %v1052_v63  ;;  %v1300_v1 = vadd.f32 %v1276_v40, %v1224_v35  ;;  %v1337_v13 = vmul.f32 %v2321_v52, %v2515_v56  ;;  %v1338_v38 = vmul.f32 %v2321_v52, %v2535_v45 }
 0x16c   : > { %v1471_v2 = vadd.f32 %v1445_v23, %v1395_v6  ;;  %v1282_v39 = vsel %vm1092_vm9, %v1280_v4, %v1281_v19  ;;  %v1414_v15 = vmul.f32 %v2341_v22, %v2535_v45  ;;  %v1449_v54 = vrot.slane %v1413_v53, 2  ;;  %v2866_v19 = vld [vmem:[#allocation7_spill] sm:$0xff]  ;;  %v920_v53 = vpop.permute.xlu0 %919 }
 0x16d   : > { %v1149_v37 = vadd.f32 %v2587_v28, %v1129_v32  ;;  %v1320_v50 = vadd.f32 %v2629_v46, %v1300_v1  ;;  %v1302_v62 = vadd.f32 %v1282_v39, %v1226_v31  ;;  %v1373_v58 = vrot.slane %v1337_v13, 1  ;;  %v2865_v31 = vld [vmem:[#allocation3_spill] sm:$0xff]  ;;  %v2867_v1 = vld [vmem:[#allocation5_spill] sm:$0xff] }
 0x16e   : > { %v2704_v0 = vpop.eup %1997  ;;  %v1486_v30 = vmul.f32 %v2511_v48, %v1471_v2  ;;  %v1374_v29 = vrot.slane %v1338_v38, 1  ;;  %v951_v56 = vmul.f32 %v913_v59, %v2522_v41  ;;  %v1450_v3 = vrot.slane %v1414_v15, 2  ;;  %v924_v59 = vpop.permute.xlu1 %923 }
 0x16f   : > { %v1225_v55 = vadd.f32 %v1203_v51, %v1149_v37  ;;  %v1396_v7 = vadd.f32 %v1372_v18, %v1320_v50  ;;  %v1322_v57 = vadd.f32 %v2526_v44, %v1302_v62  ;;  %v1339_v20 = vmul.f32 %v2321_v52, %v2362_v47 }
 0x170   : > { %v2712_v28 = vadd.f32 %v2531_v42, %v1486_v30  ;;  %v1375_v46 = vsel %vm1015_vm8, %v1373_v58, %v1374_v29  ;;  %v2718_v45 = vmul.f32 %v2283_v61, %v951_v56  ;;  %v2721_v51 = vmul.f32 %v2291_v5, %v951_v56 }
 0x171   : > { %v1301_v17 = vadd.f32 %v1279_v10, %v1225_v55  ;;  %v1472_v11 = vadd.f32 %v1448_v27, %v1396_v7  ;;  %v1451_v44 = vsel %vm1092_vm9, %v1449_v54, %v1450_v3  ;;  %v1170_v18 = vmul.f32 %v2297_v16, %v951_v56 }
 0x172   : > { %v1765_v41 = vmul.f32 -1.442695, %v2712_v28  ;;  %v1246_v26 = vmul.f32 %v2301_v21, %v951_v56  ;;  %v1038_v10 = vrot.slane %v2718_v45, 1  ;;  %v1115_v27 = vrot.slane %v2721_v51, 2  ;;  %v2870_v45 = vld [vmem:[#allocation4_spill] sm:$0xff] }
 0x173   : > { %v2728_v4 = vmul.f32 %v2511_v48, %v1472_v11  ;;  %v1321_v63 = vadd.f32 %v1313_v33, %v1301_v17  ;;  %v1208_v35 = vrot.slane %v1170_v18, 1  ;;  %v1340_v40 = vmul.f32 %v2321_v52, %v951_v56 }
 0x174   : > { %1999 = vpow2.f32 %v1765_v41  ;;  %v1284_v24 = vrot.slane %v1246_v26, 2  ;;  %v1376_v9 = vrot.slane %v1339_v20, 1  ;;  %v1415_v6 = vmul.f32 %v2341_v22, %v2362_v47 }
 0x175   : > { %v1397_v43 = vadd.f32 %v1375_v46, %v1321_v63  ;;  %v1416_v12 = vmul.f32 %v2341_v22, %v951_v56  ;;  %v1377_v23 = vrot.slane %v1340_v40, 1  ;;  %v798_v32 = vmul.f32 %v2866_v19, %v2865_v31  ;;  %v931_v40 = vpop.permute.xlu0 %930 }
 0x176   : > { %v799_v33 = vmul.f32 %v2480_v14, %v2867_v1  ;;  %v1131_v13 = vadd.f32 %v2638_v49, %v2635_v34  ;;  %v1452_v39 = vrot.slane %v1415_v6, 2  ;;  %v1143_v37 = vmul.f32 %v2294_v8, %v2362_v47 }
 0x177   : > { %v1473_v2 = vadd.f32 %v1451_v44, %v1397_v43  ;;  %v1453_v38 = vrot.slane %v1416_v12, 2  ;;  %v1378_v50 = vsel %vm1015_vm8, %v1376_v9, %v1377_v23  ;;  %v952_v62 = vmul.f32 %v920_v53, %v798_v32  ;;  %v2868_v12 = vld [vmem:[#allocation2_spill] sm:$0xff] }
 0x178   : > { %v953_v58 = vmul.f32 %v924_v59, %v799_v33  ;;  %v1169_v30 = vmul.f32 %v2297_v16, %v2362_v47  ;;  %v1398_v29 = vadd.f32 %v1378_v50, %v1322_v57  ;;  %v1151_v49 = vadd.f32 %v1143_v37, %v1131_v13  ;;  %v2869_v23 = vld [vmem:[#allocation6_spill] sm:$0xff] }
 0x179   : > { %v2748_v14 = vmul.f32 %v2511_v48, %v1473_v2  ;;  %v1454_v34 = vsel %vm1092_vm9, %v1452_v39, %v1453_v38  ;;  %v1245_v55 = vmul.f32 %v2301_v21, %v2362_v47  ;;  %v1315_v46 = vmul.f32 %v2305_v25, %v952_v62 }
 0x17a   : > { %v1172_v15 = vmul.f32 %v2297_v16, %v953_v58  ;;  %v1207_v54 = vrot.slane %v1169_v30, 1  ;;  %v1248_v7 = vmul.f32 %v2301_v21, %v953_v58  ;;  %v1474_v56 = vadd.f32 %v1454_v34, %v1398_v29 }
 0x17b   : > { %v1341_v3 = vmul.f32 %v2321_v52, %v952_v62  ;;  %v1342_v20 = vmul.f32 %v2321_v52, %v953_v58  ;;  %v1283_v11 = vrot.slane %v1245_v55, 2  ;;  %v1417_v63 = vmul.f32 %v2341_v22, %v952_v62 }
 0x17c   : > { %v1209_v57 = vsel %vm1015_vm8, %v1207_v54, %v1208_v35  ;;  %v1211_v17 = vrot.slane %v1172_v15, 1  ;;  %v1287_v41 = vrot.slane %v1248_v7, 2  ;;  %v1418_v6 = vmul.f32 %v2341_v22, %v953_v58  ;;  %v935_v54 = vpop.permute.xlu1 %934  ;;  %v2871_v7 = vld [vmem:[#allocation8_spill] sm:$0xff] }
 0x17d   : > { %v1227_v44 = vadd.f32 %v1209_v57, %v1151_v49  ;;  %v1379_v18 = vrot.slane %v1341_v3, 1  ;;  %v1380_v26 = vrot.slane %v1342_v20, 1  ;;  %v1285_v9 = vsel %vm1092_vm9, %v1283_v11, %v1284_v24  ;;  %v2872_v11 = vld [vmem:[#allocation9_spill] sm:$0xff] }
 0x17e   : > { %v2000_v43 = vpop.eup %1999  ;;  %v800_v31 = vmul.f32 %v2869_v23, %v2868_v12  ;;  %v970_v35 = vmul.f32 %v2280_v60, %v2362_v47  ;;  %v1455_v33 = vrot.slane %v1417_v63, 2  ;;  %v1456_v13 = vrot.slane %v1418_v6, 2 }
 0x17f   : > { %v1533_v19 = vadd.f32 1.0, %v2000_v43  ;;  %v1303_v32 = vadd.f32 %v1285_v9, %v1227_v44  ;;  %v1381_v1 = vsel %vm1015_vm8, %v1379_v18, %v1380_v26  ;;  %v997_v39 = vmul.f32 %v2283_v61, %v2362_v47  ;;  %v2873_v44 = vld [vmem:[#allocation10_spill] sm:$0xff] }
 0x180   : > { %v954_v2 = vmul.f32 %v931_v40, %v800_v31  ;;  %v1074_v24 = vmul.f32 %v2291_v5, %v2362_v47  ;;  %v1144_v53 = vmul.f32 %v2294_v8, %v952_v62  ;;  %v1171_v59 = vmul.f32 %v2297_v16, %v952_v62 }
 0x181   : > { %2001 = vrcp.f32 %v1533_v19  ;;  %v1323_v38 = vadd.f32 %v1315_v46, %v1303_v32  ;;  %v1457_v60 = vsel %vm1092_vm9, %v1455_v33, %v1456_v13  ;;  %v1037_v37 = vrot.slane %v997_v39, 1 }
 0x182   : > { %v1114_v50 = vrot.slane %v1074_v24, 2  ;;  %v1247_v58 = vmul.f32 %v2301_v21, %v952_v62  ;;  %v1210_v29 = vrot.slane %v1171_v59, 1  ;;  %v1316_v61 = vmul.f32 %v2305_v25, %v954_v2 }
 0x183   : > { %v1399_v30 = vadd.f32 %v1381_v1, %v1323_v38  ;;  %v1343_v34 = vmul.f32 %v2321_v52, %v954_v2  ;;  %v1039_v5 = vsel %vm1015_vm8, %v1037_v37, %v1038_v10  ;;  %v1419_v47 = vmul.f32 %v2341_v22, %v954_v2 }
 0x184   : > { %v1116_v8 = vsel %vm1092_vm9, %v1114_v50, %v1115_v27  ;;  %v1286_v16 = vrot.slane %v1247_v58, 2  ;;  %v1055_v21 = vadd.f32 %v1039_v5, %v970_v35  ;;  %v1212_v62 = vsel %vm1015_vm8, %v1210_v29, %v1211_v17 }
 0x185   : > { %v1475_v49 = vadd.f32 %v1457_v60, %v1399_v30  ;;  %v1382_v15 = vrot.slane %v1343_v34, 1  ;;  %v1458_v55 = vrot.slane %v1419_v47, 2  ;;  %v801_v10 = vmul.f32 %v2871_v7, %v2870_v45 }
 0x186   : > { %v1288_v25 = vsel %vm1092_vm9, %v1286_v16, %v1287_v41  ;;  %v1489_v51 = vmul.f32 %v2511_v48, %v1474_v56  ;;  %v1132_v46 = vadd.f32 %v1116_v8, %v1055_v21  ;;  %v1502_v3 = vadd.f32 %v2531_v42, %v2728_v4 }
 0x187   : > { %v1490_v27 = vmul.f32 %v2511_v48, %v1475_v49  ;;  %v1503_v20 = vadd.f32 %v2531_v42, %v2748_v14  ;;  %v955_v57 = vmul.f32 %v935_v54, %v801_v10  ;;  %v1555_v41 = vmul.f32 %v2679_v36, %v2872_v11 }
 0x188   : > { %v1504_v17 = vadd.f32 %v2531_v42, %v1489_v51  ;;  %v1556_v18 = vmul.f32 %v2704_v0, %v2873_v44  ;;  %v1152_v26 = vadd.f32 %v1144_v53, %v1132_v46  ;;  %v1766_v4 = vmul.f32 -1.442695, %v1502_v3 }
 0x189   : > { %v1505_v56 = vadd.f32 %v2531_v42, %v1490_v27  ;;  %v1767_v14 = vmul.f32 -1.442695, %v1503_v20  ;;  %v1344_v63 = vmul.f32 %v2321_v52, %v955_v57  ;;  %v1420_v40 = vmul.f32 %v2341_v22, %v955_v57 }
 0x18a   : > { %v1768_v43 = vmul.f32 -1.442695, %v1504_v17  ;;  %v1777_v36 = vpack.c.bf16 %v1556_v18, %v1555_v41  ;;  %v1228_v0 = vadd.f32 %v1212_v62, %v1152_v26  ;;  %2003 = vpow2.f32 %v1766_v4 }
 0x18b   : > { %v2002_v9 = vpop.eup %2001  ;;  %v1769_v6 = vmul.f32 -1.442695, %v1505_v56  ;;  %v1579_v12 = vadd.f32 %v1556_v18, %v1555_v41  ;;  %v1383_v23 = vrot.slane %v1344_v63, 1  ;;  %v1459_v31 = vrot.slane %v1420_v40, 2 }
 0x18c   : > { %2005 = vpow2.f32 %v1767_v14  ;;  %v1557_v35 = vmul.f32 %v2002_v9, %v2712_v28  ;;  %1778 = vst [vmem:[%s2804_s10] sm:$0xff] %v1777_v36   ;;  %v1304_v19 = vadd.f32 %v1288_v25, %v1228_v0 }
 0x18d   : > { %2007 = vpow2.f32 %v1769_v6  ;;  %v1384_v32 = vsel %vm1015_vm8, %v1382_v15, %v1383_v23  ;;  %v1460_v52 = vsel %vm1092_vm9, %v1458_v55, %v1459_v31 }
 0x18e   : > { %2009 = vpow2.f32 %v1768_v43  ;;  %v1580_v22 = vadd.f32 %v1579_v12, %v1557_v35  ;;  %v1324_v1 = vadd.f32 %v1316_v61, %v1304_v19 }
 0x190   : > { %v1400_v33 = vadd.f32 %v1384_v32, %v1324_v1 }
 0x192   : > { %v1476_v13 = vadd.f32 %v1460_v52, %v1400_v33 }
 0x194   : > { %v2004_v2 = vpop.eup %2003  ;;  %v1491_v39 = vmul.f32 %v2511_v48, %v1476_v13 }
 0x195   : > { %v1534_v38 = vadd.f32 1.0, %v2004_v2 }
 0x196   : > { %v2006_v24 = vpop.eup %2005  ;;  %v1506_v28 = vadd.f32 %v2531_v42, %v1491_v39 }
 0x197   : > { %v2008_v53 = vpop.eup %2007  ;;  %v1535_v59 = vadd.f32 1.0, %v2006_v24  ;;  %2011 = vrcp.f32 %v1534_v38 }
 0x198   : > { %v2010_v60 = vpop.eup %2009  ;;  %v1537_v37 = vadd.f32 1.0, %v2008_v53  ;;  %v1770_v50 = vmul.f32 -1.442695, %v1506_v28 }
 0x199   : > { %v1536_v58 = vadd.f32 1.0, %v2010_v60  ;;  %2013 = vrcp.f32 %v1535_v59 }
 0x19a   : > { %2015 = vrcp.f32 %v1537_v37 }
 0x19b   : > { %2017 = vpow2.f32 %v1770_v50 }
 0x19c   : > { %2019 = vrcp.f32 %v1536_v58 }
 0x1a1   : > { %v2012_v30 = vpop.eup %2011 }
 0x1a2   : > { %v1558_v48 = vmul.f32 %v2012_v30, %v1502_v3 }
 0x1a3   : > { %v2014_v29 = vpop.eup %2013 }
 0x1a4   : > { %v2016_v61 = vpop.eup %2015  ;;  %v1559_v34 = vmul.f32 %v2014_v29, %v1503_v20  ;;  %v1782_v8 = vpack.c.bf16 %v1558_v48, %v1557_v35  ;;  %v1581_v42 = vadd.f32 %v1580_v22, %v1558_v48 }
 0x1a5   : > { %v2018_v5 = vpop.eup %2017  ;;  %v1561_v62 = vmul.f32 %v2016_v61, %v1505_v56 }
 0x1a6   : > { %v2020_v16 = vpop.eup %2019  ;;  %v1538_v47 = vadd.f32 1.0, %v2018_v5  ;;  %1794 = vst [vmem:[%s2804_s10 + $0x8] sm:$0xff] %v1782_v8   ;;  %v1582_v21 = vadd.f32 %v1581_v42, %v1559_v34 }
 0x1a7   : > { %v1560_v49 = vmul.f32 %v2020_v16, %v1504_v17 }
 0x1a8   : > { %2021 = vrcp.f32 %v1538_v47 }
 0x1a9   : > { %v1787_v15 = vpack.c.bf16 %v1560_v49, %v1559_v34  ;;  %v1583_v54 = vadd.f32 %v1582_v21, %v1560_v49 }
 0x1ab   : > { %1795 = vst [vmem:[%s2804_s10 + $0x10] sm:$0xff] %v1787_v15   ;;  %v1584_v25 = vadd.f32 %v1583_v54, %v1561_v62 }
 0x1b2   : > { %v2022_v55 = vpop.eup %2021 }
 0x1b3   : > { %v1562_v45 = vmul.f32 %v2022_v55, %v1506_v28 }
 0x1b5   : > { %v1792_v7 = vpack.c.bf16 %v1562_v45, %v1561_v62  ;;  %v1585_v10 = vadd.f32 %v1584_v25, %v1562_v45 }
 0x1b7   : > { %1796 = vst [vmem:[%s2804_s10 + $0x18] sm:$0xff] %v1792_v7   ;;  %v1586_v51 = vrot.slane %v1585_v10, 4 }
 0x1b9   : > { %v1587_v27 = vadd.f32 %v1586_v51, %v1585_v10 }
 0x1bb   : > { %v1588_v46 = vrot.slane %v1587_v27, 2 }
 0x1bd   : > { %v1589_v3 = vadd.f32 %v1588_v46, %v1587_v27 }
 0x1bf   : > { %v1590_v20 = vrot.slane %v1589_v3, 1 }
 0x1c1   : > { %v1591_v57 = vadd.f32 %v1590_v20, %v1589_v3 }
 0x1c3   : > { %1592 = vst [vmem:[%s345_s13] sm:$0x1] %v1591_v57 }
 0x1c4 PF: > { %s19_s29 = sadd.s32 1, %s2045_s29   ;;  %s2874_s27 = smov %s2041_s28 }
 0x1c5   : > { %p16_p5 = scmp.ge.s32.totalorder %s19_s29, 4   ;;  %s2875_s28 = smov %s2877_s30 }
 0x1c7   :  { %18 = sbr.rel (!%p16_p5) target bundleno = 2 (0x2), region = 91 }

// kernel: _lambda_.4
= control target key start
LH: loop header
LB: loop body
LE: loop exit
PB: predicated region body
PF: predicated region fallthrough
CT: control target
= control target key end

     0   :  { %s3607_s27 = smov 0   ;;  %s3609_s28 = smov 0   ;;  %s5207_s0 = inlined_call_operand.vmem [shape: bf16[2,18,32,128], index: 0, kind: input, shape index: {}]   ;;  %s5208_s1 = inlined_call_operand.vmem [shape: bf16[128,128], index: 1, kind: input, shape index: {}]   ;;  %s5209_s2 = inlined_call_operand.vmem [shape: f32[1,128], index: 2, kind: input, shape index: {}]   ;;  %s5210_s3 = inlined_call_operand.vmem [shape: f32[1,128], index: 3, kind: input, shape index: {}]   ;;  %s5211_s4 = inlined_call_operand.vmem [shape: f32[3,3,128], index: 4, kind: input, shape index: {}]   ;;  %s5212_s5 = inlined_call_operand.vmem [shape: f32[1,128], index: 5, kind: input, shape index: {}]   ;;  %s5213_s6 = inlined_call_operand.vmem [shape: f32[1,128], index: 6, kind: input, shape index: {}]   ;;  %s5214_s7 = inlined_call_operand.vmem [shape: bf16[2,8,8,128], index: 7, kind: output, shape index: {0}]   ;;  %s5215_s8 = inlined_call_operand.vmem [shape: f32[2,1,1,128], index: 8, kind: output, shape index: {1}]  }
   0x1   :  { %s3611_s29 = smov 0  }
   0x2 LB: > { %s31_s30 = sadd.s32 1, %s3555_s28  ;;  %p2941_p0 = scmp.ge.s32.totalorder %s3559_s29, 1  ;;  %s3559_s29 = sphi %s3611_s29, %s19_s29   ;;  %s3555_s28 = sphi %s3609_s28, %s5496_s28   ;;  %s3551_s27 = sphi %s3607_s27, %s5495_s27  }
   0x3   : > { %p33_p1 = scmp.ge.s32.totalorder %s31_s30, 2  ;;  %p281_p2 = scmp.lt.s32.totalorder %s3559_s29, 3 }
   0x5   : > { %s5498_s30 = smov (%p33_p1, %s31_s30), 0  ;;  %p282_p3 = pnand %p2941_p0, %p281_p2 }
   0x7   : > { %285 = sbr.rel (%p282_p3) target bundleno = 590 (0x24e), region = 48 }
   0xe   : > { %v3255_v0 = vld [vmem:[%s5208_s1] sm:$0xff]   ;;  %p325_p4 = scmp.lt.s32.totalorder %s3551_s27, 1  ;;  %v3256_v1 = vld [vmem:[%s5208_s1 + $0x8] sm:$0xff]   ;;  %v3257_v2 = vld [vmem:[%s5208_s1 + $0x10] sm:$0xff]   ;;  %v1476_v10 = vlaneseq  ;;  %v3561_v24 = vmov 0.0   ;;  %vm1906_vm9 = vcmask 1046528  }
   0xf   : > { %3125 = vmatprep.subr.bf16.mxu0 %v3255_v0  ;;  %3213 = vmatprep.subr.bf16.mxu1 %v3255_v0  ;;  %v3258_v3 = vld [vmem:[%s5208_s1 + $0x18] sm:$0xff]   ;;  %v3259_v6 = vld [vmem:[%s5208_s1 + $0x20] sm:$0xff]   ;;  %v3260_v7 = vld [vmem:[%s5208_s1 + $0x28] sm:$0xff]   ;;  %vm2031_vm10 = vcmask 1045504  }
  0x10   : > { %s5500_s27 = smov (!%p325_p4, %s3551_s27), 1  ;;  %3126 = vmatpush3.bf16.msra.mxu0 %v3255_v0  ;;  %3221 = vmatpush3.bf16.msra.mxu1 %v3255_v0  ;;  %v3261_v8 = vld [vmem:[%s5208_s1 + $0x30] sm:$0xff]   ;;  %v3262_v9 = vld [vmem:[%s5208_s1 + $0x38] sm:$0xff]   ;;  %v3663_v15 = vshrl.u32 %v1476_v10, 7  ;;  %v3665_v16 = vand.u32 127, %v1476_v10 }
  0x11   : > { %3127 = vmatprep.subr.bf16.mxu0 %v3256_v1  ;;  %3214 = vmatprep.subr.bf16.mxu1 %v3256_v1  ;;  %s3229_s15 = smul.u32 288, %s5500_s27  ;;  %s3057_s11 = sshll.u32 %s5500_s27, 5 }
  0x12   : > { %vm1486_vm0 = vcmp.ge.s32.totalorder %v3663_v15, 1  ;;  %vm1495_vm1 = vcmp.ge.s32.totalorder %v3665_v16, 1  ;;  %vm1499_vm2 = vcmp.lt.s32.totalorder %v3665_v16, 17  ;;  %v1479_v20 = vadd.s32 16, %v3663_v15  ;;  %s5185_s14 = scalar_lea.vmem %s5214_s7, %s3057_s11  ;;  %s345_s17 = scalar_lea.vmem %s5215_s8, %s5500_s27 }
  0x13   : > { %s3640_s18 = scalar_lea.vmem %s5207_s0, %s3229_s15  ;;  %v3676_v22 = vsub.s32 0, %v3663_v15  ;;  %vm1496_vm3 = vmand %vm1486_vm0, %vm1495_vm1  ;;  %v3683_v23 = vsub.s32 2, %v3663_v15  ;;  %v1571_v32 = vsub.s32 4, %v3663_v15  ;;  %v1601_v36 = vsub.s32 6, %v3663_v15 }
  0x14   : > { %3128 = vmatpush3.bf16.msra.mxu0 %v3256_v1  ;;  %3222 = vmatpush3.bf16.msra.mxu1 %v3256_v1  ;;  %v3263_v4 = vld [vmem:[%s3640_s18] sm:$0xff]   ;;  %v3264_v5 = vld [vmem:[%s3640_s18 + $0x90] sm:$0xff]   ;;  %v3265_v11 = vld [vmem:[%s3640_s18 + $0x8] sm:$0xff]   ;;  %vm1491_vm5 = vcmp.lt.s32.totalorder %v1479_v20, 17  ;;  %v3717_v42 = vsub.s32 1, %v3663_v15  ;;  %v1556_v48 = vsub.s32 3, %v3663_v15 }
  0x15   : > { %3129 = vmatprep.subr.bf16.mxu0 %v3257_v2  ;;  %3215 = vmatprep.subr.bf16.mxu1 %v3257_v2  ;;  %v3266_v12 = vld [vmem:[%s3640_s18 + $0x98] sm:$0xff]   ;;  %v3267_v13 = vld [vmem:[%s3640_s18 + $0x10] sm:$0xff]   ;;  %v3268_v14 = vld [vmem:[%s3640_s18 + $0xa0] sm:$0xff]   ;;  %v1586_v56 = vsub.s32 5, %v3663_v15 }
  0x16   : > { %3141 = vmatprep.mubr.bf16.mxu0 %v3263_v4  ;;  %3177 = vmatprep.mubr.bf16.mxu1 %v3264_v5  ;;  %v3269_v17 = vld [vmem:[%s3640_s18 + $0x18] sm:$0xff]   ;;  %v3270_v18 = vld [vmem:[%s3640_s18 + $0xa8] sm:$0xff]   ;;  %v3271_v19 = vld [vmem:[%s3640_s18 + $0x20] sm:$0xff]  }
  0x17   : > { %v3272_v21 = vld [vmem:[%s3640_s18 + $0xb0] sm:$0xff]   ;;  %vm1500_vm4 = vmand %vm1496_vm3, %vm1499_vm2  ;;  %v3273_v27 = vld [vmem:[%s3640_s18 + $0x28] sm:$0xff]  }
  0x18   : > { %3130 = vmatpush3.bf16.msra.mxu0 %v3257_v2  ;;  %3223 = vmatpush3.bf16.msra.mxu1 %v3257_v2  ;;  %v3686_v25 = vsel %vm1500_vm4, 1.0, %v3561_v24  ;;  %vm1498_vm6 = vmand %vm1491_vm5, %vm1495_vm1  ;;  %v3274_v29 = vld [vmem:[%s3640_s18 + $0xb8] sm:$0xff]   ;;  %v3275_v30 = vld [vmem:[%s3640_s18 + $0x30] sm:$0xff]  }
  0x19   : > { %3131 = vmatprep.subr.bf16.mxu0 %v3258_v3  ;;  %3216 = vmatprep.subr.bf16.mxu1 %v3258_v3  ;;  %v1512_v26 = vrot.slane %v3686_v25, %v3676_v22  ;;  %v1542_v28 = vrot.slane %v3686_v25, %v3683_v23  ;;  %vm1502_vm7 = vmand %vm1498_vm6, %vm1499_vm2  ;;  %v3276_v31 = vld [vmem:[%s3640_s18 + $0xc0] sm:$0xff]   ;;  %v1572_v35 = vrot.slane %v3686_v25, %v1571_v32  ;;  %v3277_v37 = vld [vmem:[%s3640_s18 + $0x38] sm:$0xff]  }
  0x1a   : > { %v3044_v33 = vsel %vm1502_vm7, 1.0, %v3561_v24  ;;  %v3278_v38 = vld [vmem:[%s3640_s18 + $0xc8] sm:$0xff]   ;;  %v3279_v39 = vld [vmem:[%s3640_s18 + $0x40] sm:$0xff]   ;;  %v3280_v40 = vld [vmem:[%s3640_s18 + $0xd0] sm:$0xff]   ;;  %v1602_v41 = vrot.slane %v3686_v25, %v1601_v36  ;;  %v1527_v47 = vrot.slane %v3686_v25, %v3717_v42  ;;  %v1557_v49 = vrot.slane %v3686_v25, %v1556_v48 }
  0x1b   : > { %1522 = vbcast.lane.b32.xlu1 %v1512_v26, 272  ;;  %1514 = vbcast.lane.b32.xlu0 %v1512_v26, 256  ;;  %v3703_v34 = vrot.slane %v3044_v33, %v3676_v22  ;;  %v3281_v43 = vld [vmem:[%s3640_s18 + $0x48] sm:$0xff]   ;;  %v3282_v44 = vld [vmem:[%s3640_s18 + $0xd8] sm:$0xff]   ;;  %v3283_v45 = vld [vmem:[%s3640_s18 + $0x50] sm:$0xff]   ;;  %v1587_v61 = vrot.slane %v3686_v25, %v1586_v56 }
  0x1c   : > { %3132 = vmatpush3.bf16.msra.mxu0 %v3258_v3  ;;  %3224 = vmatpush3.bf16.msra.mxu1 %v3258_v3  ;;  %v3284_v46 = vld [vmem:[%s3640_s18 + $0xe0] sm:$0xff]   ;;  %v3285_v50 = vld [vmem:[%s3640_s18 + $0x58] sm:$0xff]   ;;  %v3286_v51 = vld [vmem:[%s3640_s18 + $0xe8] sm:$0xff]   ;;  %v1616_v3 = vsub.s32 7, %v3663_v15 }
  0x1d   : > { %3133 = vmatprep.subr.bf16.mxu0 %v3259_v6  ;;  %3217 = vmatprep.subr.bf16.mxu1 %v3259_v6  ;;  %v3287_v52 = vld [vmem:[%s3640_s18 + $0x60] sm:$0xff]   ;;  %v3288_v53 = vld [vmem:[%s3640_s18 + $0xf0] sm:$0xff]   ;;  %vm1501_vm8 = vmand %vm1495_vm1, %vm1499_vm2 }
  0x1e   : > { %v3043_v54 = vsel %vm1501_vm8, 1.0, %v3561_v24  ;;  %v3289_v57 = vld [vmem:[%s3640_s18 + $0x68] sm:$0xff]   ;;  %v3290_v58 = vld [vmem:[%s3640_s18 + $0xf8] sm:$0xff]   ;;  %v3291_v59 = vld [vmem:[%s3640_s18 + $0x70] sm:$0xff]   ;;  %v1617_v4 = vrot.slane %v3686_v25, %v1616_v3 }
  0x1f   : > { %1544 = vbcast.lane.b32.xlu1 %v1542_v28, 256  ;;  %1518 = vbcast.lane.b32.xlu0 %v1512_v26, 264  ;;  %v1632_v55 = vrot.slane %v3043_v54, %v3676_v22  ;;  %v3292_v60 = vld [vmem:[%s3640_s18 + $0x100] sm:$0xff]   ;;  %v3293_v62 = vld [vmem:[%s3640_s18 + $0x78] sm:$0xff]   ;;  %v3294_v63 = vld [vmem:[%s3640_s18 + $0x108] sm:$0xff]   ;;  %v1662_v2 = vrot.slane %v3043_v54, %v3683_v23  ;;  %v1677_v10 = vrot.slane %v3043_v54, %v1556_v48 }
  0x20   : > { %3134 = vmatpush3.bf16.msra.mxu0 %v3259_v6  ;;  %3225 = vmatpush3.bf16.msra.mxu1 %v3259_v6  ;;  %v3295_v0 = vld [vmem:[%s3640_s18 + $0x80] sm:$0xff]   ;;  %v3297_v1 = vld [vmem:[%s3640_s18 + $0x110] sm:$0xff]   ;;  %v3296_v5 = vld [vmem:[%s3640_s18 + $0x88] sm:$0xff]  }
  0x21   : > { %3135 = vmatprep.subr.bf16.mxu0 %v3260_v7  ;;  %3218 = vmatprep.subr.bf16.mxu1 %v3260_v7  ;;  %v3298_v6 = vld [vmem:[%s3640_s18 + $0x118] sm:$0xff]  }
  0x23   : > { %1552 = vbcast.lane.b32.xlu1 %v1542_v28, 272  ;;  %1548 = vbcast.lane.b32.xlu0 %v1542_v28, 264 }
  0x24   : > { %3136 = vmatpush3.bf16.msra.mxu0 %v3260_v7  ;;  %3226 = vmatpush3.bf16.msra.mxu1 %v3260_v7  ;;  %v1692_v7 = vrot.slane %v3043_v54, %v1571_v32 }
  0x25   : > { %3137 = vmatprep.subr.bf16.mxu0 %v3261_v8  ;;  %3219 = vmatprep.subr.bf16.mxu1 %v3261_v8 }
  0x27   : > { %1578 = vbcast.lane.b32.xlu1 %v1572_v35, 264  ;;  %1574 = vbcast.lane.b32.xlu0 %v1572_v35, 256 }
  0x28   : > { %3138 = vmatpush3.bf16.msra.mxu0 %v3261_v8  ;;  %3227 = vmatpush3.bf16.msra.mxu1 %v3261_v8  ;;  %v1647_v8 = vrot.slane %v3043_v54, %v3717_v42 }
  0x29   : > { %3139 = vmatprep.subr.bf16.mxu0 %v3262_v9  ;;  %3220 = vmatprep.subr.bf16.mxu1 %v3262_v9 }
  0x2b   : > { %1604 = vbcast.lane.b32.xlu1 %v1602_v41, 256  ;;  %1582 = vbcast.lane.b32.xlu0 %v1572_v35, 272 }
  0x2c   : > { %3140 = vmatpush3.bf16.msra.mxu0 %v3262_v9  ;;  %3228 = vmatpush3.bf16.msra.mxu1 %v3262_v9  ;;  %v1722_v9 = vrot.slane %v3043_v54, %v1601_v36 }
  0x2f   : > { %3142 = vmatmul.mubr.bf16.vlgmr.msra.gmra.mrb[0].mxu0 %v3265_v11  ;;  %3178 = vmatmul.mubr.bf16.vlgmr.msra.gmra.mrb[0].mxu1 %v3266_v12  ;;  %v1707_v11 = vrot.slane %v3043_v54, %v1586_v56  ;;  %v1737_v12 = vrot.slane %v3043_v54, %v1616_v3 }
  0x30   : > { %3145 = vmatprep.mubr.bf16.mxu0 %v3267_v13  ;;  %3181 = vmatprep.mubr.bf16.mxu1 %v3268_v14 }
  0x31   : > { %1612 = vbcast.lane.b32.xlu1 %v1602_v41, 272  ;;  %1608 = vbcast.lane.b32.xlu0 %v1602_v41, 264 }
  0x35   : > { %1533 = vbcast.lane.b32.xlu1 %v1527_v47, 264  ;;  %1529 = vbcast.lane.b32.xlu0 %v1527_v47, 256 }
  0x37   : > { %3146 = vmatmul.mubr.bf16.gmra.mrb[4].mxu0 %v3269_v17  ;;  %3182 = vmatmul.mubr.bf16.gmra.mrb[4].mxu1 %v3270_v18 }
  0x38   : > { %3149 = vmatprep.mubr.bf16.mxu0 %v3271_v19  ;;  %3185 = vmatprep.mubr.bf16.mxu1 %v3272_v21 }
  0x39   : > { %1559 = vbcast.lane.b32.xlu1 %v1557_v49, 256  ;;  %1537 = vbcast.lane.b32.xlu0 %v1527_v47, 272 }
  0x3d   : > { %1567 = vbcast.lane.b32.xlu1 %v1557_v49, 272  ;;  %1563 = vbcast.lane.b32.xlu0 %v1557_v49, 264 }
  0x3f   : > { %3150 = vmatmul.mubr.bf16.gmra.mrb[8].mxu0 %v3273_v27  ;;  %3186 = vmatmul.mubr.bf16.gmra.mrb[8].mxu1 %v3274_v29 }
  0x40   : > { %3153 = vmatprep.mubr.bf16.mxu0 %v3275_v30  ;;  %3189 = vmatprep.mubr.bf16.mxu1 %v3276_v31 }
  0x41   : > { %1638 = vbcast.lane.b32.xlu1 %v1632_v55, 264  ;;  %1634 = vbcast.lane.b32.xlu0 %v1632_v55, 256 }
  0x45   : > { %1589 = vbcast.lane.b32.xlu1 %v1587_v61, 256  ;;  %1642 = vbcast.lane.b32.xlu0 %v1632_v55, 272 }
  0x47   : > { %3154 = vmatmul.mubr.bf16.gmra.mrb[12].mxu0 %v3277_v37  ;;  %3190 = vmatmul.mubr.bf16.gmra.mrb[12].mxu1 %v3278_v38  ;;  %v3814_v38 = vld [vmem:[%s5210_s3] ss:$0 sm:$0xff] }
  0x48   : > { %3157 = vmatprep.mubr.bf16.mxu0 %v3279_v39  ;;  %3193 = vmatprep.mubr.bf16.mxu1 %v3280_v40 }
  0x49   : > { %1597 = vbcast.lane.b32.xlu1 %v1587_v61, 272  ;;  %1593 = vbcast.lane.b32.xlu0 %v1587_v61, 264 }
  0x4d   : > { %1668 = vbcast.lane.b32.xlu1 %v1662_v2, 264  ;;  %1664 = vbcast.lane.b32.xlu0 %v1662_v2, 256 }
  0x4f   : > { %3158 = vmatmul.mubr.bf16.gmra.mrb[16].mxu0 %v3281_v43  ;;  %3194 = vmatmul.mubr.bf16.gmra.mrb[16].mxu1 %v3282_v44 }
  0x50   : > { %3161 = vmatprep.mubr.bf16.mxu0 %v3283_v45  ;;  %3197 = vmatprep.mubr.bf16.mxu1 %v3284_v46 }
  0x51   : > { %1619 = vbcast.lane.b32.xlu1 %v1617_v4, 256  ;;  %1672 = vbcast.lane.b32.xlu0 %v1662_v2, 272 }
  0x55   : > { %1627 = vbcast.lane.b32.xlu1 %v1617_v4, 272  ;;  %1623 = vbcast.lane.b32.xlu0 %v1617_v4, 264 }
  0x57   : > { %3162 = vmatmul.mubr.bf16.gmra.mrb[20].mxu0 %v3285_v50  ;;  %3198 = vmatmul.mubr.bf16.gmra.mrb[20].mxu1 %v3286_v51 }
  0x58   : > { %3165 = vmatprep.mubr.bf16.mxu0 %v3287_v52  ;;  %3201 = vmatprep.mubr.bf16.mxu1 %v3288_v53 }
  0x59   : > { %1698 = vbcast.lane.b32.xlu1 %v1692_v7, 264  ;;  %1694 = vbcast.lane.b32.xlu0 %v1692_v7, 256 }
  0x5d   : > { %1649 = vbcast.lane.b32.xlu1 %v1647_v8, 256  ;;  %1702 = vbcast.lane.b32.xlu0 %v1692_v7, 272 }
  0x5f   : > { %3166 = vmatmul.mubr.bf16.gmra.mrb[24].mxu0 %v3289_v57  ;;  %3202 = vmatmul.mubr.bf16.gmra.mrb[24].mxu1 %v3290_v58 }
  0x60   : > { %3169 = vmatprep.mubr.bf16.mxu0 %v3291_v59  ;;  %3205 = vmatprep.mubr.bf16.mxu1 %v3292_v60 }
  0x61   : > { %1657 = vbcast.lane.b32.xlu1 %v1647_v8, 272  ;;  %1653 = vbcast.lane.b32.xlu0 %v1647_v8, 264 }
  0x65   : > { %1728 = vbcast.lane.b32.xlu1 %v1722_v9, 264  ;;  %1724 = vbcast.lane.b32.xlu0 %v1722_v9, 256 }
  0x67   : > { %3170 = vmatmul.mubr.bf16.gmra.mrb[28].mxu0 %v3293_v62  ;;  %3206 = vmatmul.mubr.bf16.gmra.mrb[28].mxu1 %v3294_v63 }
  0x68   : > { %3173 = vmatprep.mubr.bf16.mxu0 %v3295_v0  ;;  %3209 = vmatprep.mubr.bf16.mxu1 %v3297_v1 }
  0x69   : > { %1679 = vbcast.lane.b32.xlu1 %v1677_v10, 256  ;;  %1732 = vbcast.lane.b32.xlu0 %v1722_v9, 272 }
  0x6d   : > { %1687 = vbcast.lane.b32.xlu1 %v1677_v10, 272  ;;  %1683 = vbcast.lane.b32.xlu0 %v1677_v10, 264 }
  0x6f   : > { %3174 = vmatmul.mubr.bf16.gmra.mrb[32].mxu0 %v3296_v5  ;;  %3210 = vmatmul.mubr.bf16.gmra.mrb[32].mxu1 %v3298_v6 }
  0x71   : > { %1709 = vbcast.lane.b32.xlu0 %v1707_v11, 256  ;;  %1713 = vbcast.lane.b32.xlu1 %v1707_v11, 264 }
  0x75   : > { %1717 = vbcast.lane.b32.xlu0 %v1707_v11, 272  ;;  %1739 = vbcast.lane.b32.xlu1 %v1737_v12, 256 }
  0x79   : > { %1747 = vbcast.lane.b32.xlu1 %v1737_v12, 272  ;;  %1743 = vbcast.lane.b32.xlu0 %v1737_v12, 264 }
  0x7d   : > { %1754 = vbcast.lane.b32.xlu0 %v3703_v34, 256  ;;  %1758 = vbcast.lane.b32.xlu1 %v3703_v34, 264 }
  0x81   : > { %1762 = vbcast.lane.b32.xlu0 %v3703_v34, 272  ;;  %v3805_v34 = vld [vmem:[%s5209_s2] ss:$0 sm:$0xff] }
  0x8d   : > { %v3764_v13 = vpop.permute.xlu1 %1522  ;;  %v3774_v18 = vpop.permute.xlu0 %1514 }
  0x91   : > { %v3766_v14 = vpop.permute.xlu1 %1544  ;;  %v3778_v20 = vpop.permute.xlu0 %1518 }
  0x95   : > { %v3768_v15 = vpop.permute.xlu1 %1552  ;;  %v3782_v24 = vpop.permute.xlu0 %1548 }
  0x96   : > { %5269 = vst [vmem:[#allocation6_spill] sm:$0xff] %v3782_v24 }
  0x99   : > { %v3770_v16 = vpop.permute.xlu1 %1578  ;;  %v3786_v26 = vpop.permute.xlu0 %1574 }
  0x9a   : > { %5266 = vst [vmem:[#allocation3_spill] sm:$0xff] %v3770_v16  ;;  %5271 = vst [vmem:[#allocation8_spill] sm:$0xff] %v3786_v26 }
  0x9d   : > { %v3772_v17 = vpop.permute.xlu1 %1604  ;;  %v3790_v28 = vpop.permute.xlu0 %1582 }
  0x9e   : > { %5267 = vst [vmem:[#allocation4_spill] sm:$0xff] %v3772_v17  ;;  %5273 = vst [vmem:[#allocation10_spill] sm:$0xff] %v3790_v28 }
  0xa3   : > { %v3776_v19 = vpop.permute.xlu1 %1612  ;;  %v3794_v30 = vpop.permute.xlu0 %1608 }
  0xa4   : > { %5268 = vst [vmem:[#allocation5_spill] sm:$0xff] %v3776_v19  ;;  %5275 = vst [vmem:[#allocation12_spill] sm:$0xff] %v3794_v30  ;;  %v1816_v30 = vld [vmem:[%s5211_s4 + $0x4] sm:$0x7] }
  0xa5   : > { %v3941_v26 = vrot.slane %v1816_v30, %v3676_v22 }
  0xa7   : > { %v3780_v21 = vpop.permute.xlu1 %1533  ;;  %v3798_v32 = vpop.permute.xlu0 %1529  ;;  %5288 = vst [vmem:[#allocation25_spill] sm:$0xff] %v3941_v26 }
  0xab   : > { %v3784_v25 = vpop.permute.xlu1 %1559  ;;  %v3807_v35 = vpop.permute.xlu0 %1537 }
  0xac   : > { %5270 = vst [vmem:[#allocation7_spill] sm:$0xff] %v3784_v25 }
  0xaf   : > { %v3788_v27 = vpop.permute.xlu1 %1567  ;;  %v3839_v60 = vpop.permute.xlu0 %1563 }
  0xb0   : > { %5272 = vst [vmem:[#allocation9_spill] sm:$0xff] %v3788_v27  ;;  %5278 = vst [vmem:[#allocation15_spill] sm:$0xff] %v3839_v60 }
  0xb3   : > { %v3792_v29 = vpop.permute.xlu1 %1638 }
  0xb4   : > { %5274 = vst [vmem:[#allocation11_spill] sm:$0xff] %v3792_v29 }
  0xb7   : > { %v3796_v31 = vpop.permute.xlu1 %1589 }
  0xb8   : > { %5276 = vst [vmem:[#allocation13_spill] sm:$0xff] %v3796_v31 }
  0xbb   : > { %v3800_v33 = vpop.permute.xlu1 %1597 }
  0xbc   : > { %5277 = vst [vmem:[#allocation14_spill] sm:$0xff] %v3800_v33 }
  0xbf   : > { %v3809_v36 = vpop.permute.xlu1 %1668 }
  0xc3   : > { %v3841_v61 = vpop.permute.xlu1 %1619 }
  0xc4   : > { %5279 = vst [vmem:[#allocation16_spill] sm:$0xff] %v3841_v61 }
 0x102   : > { %v3143_v37 = vpop.f32.mrb[0].mxu0  ;;  %v3179_v39 = vpop.f32.mrb[0].mxu1 }
 0x103   : > { %v1012_v40 = vmul.f32 %v3143_v37, %v3805_v34  ;;  %v1039_v41 = vmul.f32 %v3179_v39, %v3805_v34  ;;  %v737_v43 = vpop.f32.mrb[1].mxu0  ;;  %v872_v44 = vpop.f32.mrb[1].mxu1 }
 0x104   : > { %v1010_v45 = vmul.f32 %v3805_v34, %v737_v43  ;;  %v1037_v46 = vmul.f32 %v3805_v34, %v872_v44  ;;  %v3144_v47 = vpop.f32.mrb[2].mxu0  ;;  %v3180_v48 = vpop.f32.mrb[2].mxu1 }
 0x105   : > { %v3821_v49 = vadd.f32 %v3814_v38, %v1012_v40  ;;  %v740_v50 = vpop.f32.mrb[3].mxu0  ;;  %v875_v51 = vpop.f32.mrb[3].mxu1  ;;  %v3832_v56 = vadd.f32 %v3814_v38, %v1039_v41 }
 0x106   : > { %v3824_v52 = vadd.f32 %v3814_v38, %v1010_v45  ;;  %v3827_v53 = vadd.f32 %v3814_v38, %v1037_v46  ;;  %v1011_v54 = vmul.f32 %v3805_v34, %v740_v50  ;;  %v3870_v50 = vpop.permute.xlu0 %1634 }
 0x107   : > { %v2993_v55 = vmul.f32 -1.442695, %v3821_v49  ;;  %v3020_v1 = vmul.f32 -1.442695, %v3832_v56  ;;  %5280 = vst [vmem:[#allocation17_spill] sm:$0xff] %v3870_v50 }
 0x108   : > { %v2991_v57 = vmul.f32 -1.442695, %v3824_v52  ;;  %v3018_v58 = vmul.f32 -1.442695, %v3827_v53  ;;  %v3837_v59 = vadd.f32 %v3814_v38, %v1011_v54  ;;  %v3872_v54 = vpop.permute.xlu1 %1627 }
 0x109   : > { %3299 = vpow2.f32 %v2993_v55  ;;  %5281 = vst [vmem:[#allocation18_spill] sm:$0xff] %v3872_v54 }
 0x10a   : > { %v2992_v62 = vmul.f32 -1.442695, %v3837_v59  ;;  %v3147_v63 = vpop.f32.mrb[4].mxu0  ;;  %v3183_v0 = vpop.f32.mrb[4].mxu1  ;;  %3301 = vpow2.f32 %v2991_v57 }
 0x10b   : > { %v1015_v2 = vmul.f32 %v3147_v63, %v3805_v34  ;;  %v1042_v3 = vmul.f32 %v3183_v0, %v3805_v34  ;;  %v752_v4 = vpop.f32.mrb[5].mxu0  ;;  %v887_v5 = vpop.f32.mrb[5].mxu1  ;;  %3303 = vpow2.f32 %v3018_v58 }
 0x10c   : > { %v1013_v6 = vmul.f32 %v3805_v34, %v752_v4  ;;  %v1040_v7 = vmul.f32 %v3805_v34, %v887_v5  ;;  %v3148_v8 = vpop.f32.mrb[6].mxu0  ;;  %v3184_v9 = vpop.f32.mrb[6].mxu1  ;;  %3305 = vpow2.f32 %v2992_v62 }
 0x10d   : > { %v3850_v10 = vadd.f32 %v3814_v38, %v1015_v2  ;;  %v3853_v11 = vadd.f32 %v3814_v38, %v1042_v3  ;;  %v755_v12 = vpop.f32.mrb[7].mxu0  ;;  %v890_v37 = vpop.f32.mrb[7].mxu1  ;;  %3307 = vpow2.f32 %v3020_v1 }
 0x10e   : > { %v3856_v39 = vadd.f32 %v3814_v38, %v1013_v6  ;;  %v3859_v40 = vadd.f32 %v3814_v38, %v1040_v7  ;;  %v1014_v41 = vmul.f32 %v3805_v34, %v755_v12  ;;  %v1041_v48 = vmul.f32 %v3805_v34, %v890_v37 }
 0x10f   : > { %v2996_v43 = vmul.f32 -1.442695, %v3850_v10  ;;  %v3023_v44 = vmul.f32 -1.442695, %v3853_v11  ;;  %v1038_v7 = vmul.f32 %v3805_v34, %v875_v51 }
 0x110   : > { %v2994_v45 = vmul.f32 -1.442695, %v3856_v39  ;;  %v3021_v46 = vmul.f32 -1.442695, %v3859_v40  ;;  %v3867_v47 = vadd.f32 %v3814_v38, %v1014_v41  ;;  %v3877_v3 = vadd.f32 %v3814_v38, %v1041_v48 }
 0x111   : > { %3309 = vpow2.f32 %v2996_v43  ;;  %v3887_v51 = vadd.f32 %v3814_v38, %v1038_v7 }
 0x112   : > { %3311 = vpow2.f32 %v3023_v44  ;;  %v2995_v55 = vmul.f32 -1.442695, %v3867_v47  ;;  %v3151_v57 = vpop.f32.mrb[8].mxu0  ;;  %v3187_v58 = vpop.f32.mrb[8].mxu1 }
 0x113   : > { %v3300_v62 = vpop.eup %3299  ;;  %3313 = vpow2.f32 %v2994_v45  ;;  %v1018_v63 = vmul.f32 %v3151_v57, %v3805_v34  ;;  %v767_v0 = vpop.f32.mrb[9].mxu0  ;;  %5282 = vst [vmem:[#allocation19_spill] sm:$0xff] %v3887_v51  ;;  %v3019_v61 = vmul.f32 -1.442695, %v3887_v51 }
 0x114   : > { %v902_v1 = vpop.f32.mrb[9].mxu1  ;;  %v1274_v2 = vadd.f32 1.0, %v3300_v62  ;;  %3315 = vpow2.f32 %v3021_v46  ;;  %v3152_v4 = vpop.f32.mrb[10].mxu0  ;;  %v3022_v46 = vmul.f32 -1.442695, %v3877_v3  ;;  %v1016_v7 = vmul.f32 %v3805_v34, %v767_v0 }
 0x115   : > { %v3188_v5 = vpop.f32.mrb[10].mxu1  ;;  %v3302_v6 = vpop.eup %3301  ;;  %3317 = vpow2.f32 %v2995_v55  ;;  %v3881_v8 = vadd.f32 %v3814_v38, %v1018_v63 }
 0x116   : > { %v770_v9 = vpop.f32.mrb[11].mxu0  ;;  %v3883_v12 = vpop.f32.mrb[11].mxu1  ;;  %3319 = vrcp.f32 %v1274_v2  ;;  %v1272_v41 = vadd.f32 1.0, %v3302_v6  ;;  %v1815_v5 = vld [vmem:[%s5211_s4] sm:$0x7]  ;;  %v1045_v6 = vmul.f32 %v3187_v58, %v3805_v34  ;;  %v3934_v31 = vadd.f32 %v3814_v38, %v1016_v7 }
 0x117   : > { %v3304_v37 = vpop.eup %3303  ;;  %v3889_v55 = vpop.permute.xlu0 %1642  ;;  %v2999_v57 = vmul.f32 -1.442695, %v3881_v8  ;;  %v3912_v0 = vrot.slane %v1815_v5, %v3676_v22  ;;  %v1017_v16 = vmul.f32 %v3805_v34, %v770_v9 }
 0x118   : > { %v3306_v43 = vpop.eup %3305  ;;  %v1299_v44 = vadd.f32 1.0, %v3304_v37  ;;  %3321 = vrcp.f32 %v1272_v41  ;;  %5283 = vst [vmem:[#allocation20_spill] sm:$0xff] %v3889_v55  ;;  %v3892_v62 = vpop.permute.xlu1 %1698  ;;  %v3931_v19 = vadd.f32 %v3814_v38, %v1045_v6 }
 0x119   : > { %v1273_v45 = vadd.f32 1.0, %v3306_v43  ;;  %v3308_v48 = vpop.eup %3307  ;;  %5284 = vst [vmem:[#allocation21_spill] sm:$0xff] %v3892_v62  ;;  %v3947_v62 = vrot.slane %v1816_v30, %v3683_v23  ;;  %v3967_v25 = vadd.f32 %v3814_v38, %v1017_v16 }
 0x11a   : > { %3323 = vrcp.f32 %v1299_v44  ;;  %v3894_v63 = vpop.f32.mrb[12].mxu0  ;;  %v3896_v2 = vpop.f32.mrb[12].mxu1  ;;  %v1301_v17 = vadd.f32 1.0, %v3308_v48  ;;  %5286 = vst [vmem:[#allocation23_spill] sm:$0xff] %v3931_v19 }
 0x11b   : > { %3325 = vrcp.f32 %v1273_v45  ;;  %v3310_v4 = vpop.eup %3309  ;;  %v3903_v37 = vpop.f32.mrb[13].mxu0  ;;  %v1043_v45 = vmul.f32 %v3805_v34, %v902_v1  ;;  %5292 = vst [vmem:[#allocation29_spill] sm:$0xff] %v3967_v25 }
 0x11c   : > { %v3905_v41 = vpop.f32.mrb[13].mxu1  ;;  %v3312_v43 = vpop.eup %3311  ;;  %v1277_v44 = vadd.f32 1.0, %v3310_v4  ;;  %3327 = vpow2.f32 %v3022_v46  ;;  %v3918_v46 = vrot.slane %v1815_v5, %v3683_v23  ;;  %v3928_v4 = vrot.slane %v1815_v5, %v3717_v42 }
 0x11d   : > { %v3156_v29 = vpop.f32.mrb[14].mxu0  ;;  %v3192_v50 = vpop.f32.mrb[14].mxu1  ;;  %3329 = vpow2.f32 %v2999_v57  ;;  %v3925_v57 = vld [vmem:[%s5211_s4 + $0x8] sm:$0x7]  ;;  %v3937_v33 = vadd.f32 %v3814_v38, %v1043_v45  ;;  %v1304_v48 = vadd.f32 1.0, %v3312_v43 }
 0x11e   : > { %v3314_v55 = vpop.eup %3313  ;;  %v3909_v54 = vpop.f32.mrb[15].mxu0  ;;  %5285 = vst [vmem:[#allocation22_spill] sm:$0xff] %v3918_v46  ;;  %3331 = vrcp.f32 %v1277_v44  ;;  %v3951_v45 = vrot.slane %v3925_v57, %v3676_v22 }
 0x11f   : > { %v3316_v58 = vpop.eup %3315  ;;  %v1275_v29 = vadd.f32 1.0, %v3314_v55  ;;  %v3920_v50 = vpop.f32.mrb[15].mxu1  ;;  %5287 = vst [vmem:[#allocation24_spill] sm:$0xff] %v3937_v33 }
 0x120   : > { %v3318_v1 = vpop.eup %3317  ;;  %v3944_v6 = vpop.permute.xlu0 %1593  ;;  %5290 = vst [vmem:[#allocation27_spill] sm:$0xff] %v3951_v45 }
 0x121   : > { %v3320_v44 = vpop.eup %3319  ;;  %3333 = vrcp.f32 %v1275_v29  ;;  %v1276_v55 = vadd.f32 1.0, %v3318_v1  ;;  %5289 = vst [vmem:[#allocation26_spill] sm:$0xff] %v3944_v6  ;;  %v1650_v28 = vpop.permute.xlu1 %1649  ;;  %v1302_v29 = vadd.f32 1.0, %v3316_v58  ;;  %v2997_v58 = vmul.f32 -1.442695, %v3934_v31 }
 0x122   : > { %v1427_v5 = vmul.f32 %v3320_v44, %v3821_v49  ;;  %3335 = vpow2.f32 %v3019_v61  ;;  %v3322_v7 = vpop.eup %3321  ;;  %v3953_v9 = vpop.f32.mrb[16].mxu0  ;;  %v3026_v44 = vmul.f32 -1.442695, %v3931_v19 }
 0x123   : > { %3337 = vrcp.f32 %v1276_v55  ;;  %v3955_v1 = vpop.f32.mrb[16].mxu1  ;;  %v1425_v43 = vmul.f32 %v3322_v7, %v3824_v52  ;;  %v3960_v6 = vpop.f32.mrb[17].mxu0  ;;  %v3024_v55 = vmul.f32 -1.442695, %v3937_v33  ;;  %v3978_v33 = vrot.slane %v1816_v30, %v3717_v42 }
 0x124   : > { %v3324_v49 = vpop.eup %3323  ;;  %v1766_v61 = vmul.f32 %v3764_v13, %v1427_v5  ;;  %3339 = vrcp.f32 %v1301_v17  ;;  %v3962_v60 = vpop.f32.mrb[17].mxu1 }
 0x125   : > { %5291 = vst [vmem:[#allocation28_spill] sm:$0xff] %v3962_v60  ;;  %v3326_v22 = vpop.eup %3325  ;;  %v1452_v27 = vmul.f32 %v3324_v49, %v3827_v53  ;;  %v3160_v13 = vpop.f32.mrb[18].mxu0  ;;  %v1764_v5 = vmul.f32 %v3774_v18, %v1425_v43  ;;  %3341 = vrcp.f32 %v1304_v48 }
 0x126   : > { %v3196_v17 = vpop.f32.mrb[18].mxu1  ;;  %v1860_v52 = vmul.f32 %v3928_v4, %v1766_v61  ;;  %v1426_v7 = vmul.f32 %v3326_v22, %v3837_v59  ;;  %v3973_v19 = vpop.f32.mrb[19].mxu0  ;;  %v1985_v16 = vmul.f32 %v3918_v46, %v1766_v61  ;;  %3343 = vrcp.f32 %v1302_v29 }
 0x127   : > { %5293 = vst [vmem:[#allocation30_spill] sm:$0xff] %v3973_v19  ;;  %v3975_v24 = vpop.f32.mrb[19].mxu1  ;;  %v3328_v60 = vpop.eup %3327  ;;  %v3981_v53 = vmul.f32 %v1650_v28, %v1452_v27  ;;  %v1858_v13 = vmul.f32 %v3928_v4, %v1764_v5  ;;  %3345 = vpow2.f32 %v3026_v44  ;;  %v1983_v59 = vmul.f32 %v3918_v46, %v1764_v5 }
 0x128   : > { %5294 = vst [vmem:[#allocation31_spill] sm:$0xff] %v3975_v24  ;;  %v3330_v49 = vpop.eup %3329  ;;  %v1765_v48 = vmul.f32 %v3778_v20, %v1426_v7  ;;  %3347 = vpow2.f32 %v2997_v58  ;;  %v1910_v30 = vrot.slane %v1860_v52, 1  ;;  %v3987_v61 = vpop.permute.xlu0 %1664  ;;  %v2998_v27 = vmul.f32 -1.442695, %v3967_v25 }
 0x129   : > { %5295 = vst [vmem:[#allocation32_spill] sm:$0xff] %v3981_v53  ;;  %v3332_v18 = vpop.eup %3331  ;;  %v1280_v43 = vadd.f32 1.0, %v3330_v49  ;;  %3349 = vpow2.f32 %v3024_v55  ;;  %v2035_v29 = vrot.slane %v1985_v16, 2  ;;  %v1822_v17 = vmul.f32 %v3912_v0, %v1764_v5 }
 0x12a   : > { %v1430_v22 = vmul.f32 %v3332_v18, %v3850_v10  ;;  %v1859_v44 = vmul.f32 %v3928_v4, %v1765_v48  ;;  %v1984_v24 = vmul.f32 %v3918_v46, %v1765_v48  ;;  %v3993_v19 = vpop.f32.mrb[20].mxu0  ;;  %v3995_v20 = vpop.f32.mrb[20].mxu1  ;;  %v1907_v10 = vrot.slane %v1858_v13, 1 }
 0x12b   : > { %v3334_v28 = vpop.eup %3333  ;;  %5296 = vst [vmem:[#allocation33_spill] sm:$0xff] %v3993_v19  ;;  %5297 = vst [vmem:[#allocation34_spill] sm:$0xff] %v3995_v20  ;;  %v2032_v52 = vrot.slane %v1983_v59, 2  ;;  %v1303_v7 = vadd.f32 1.0, %v3328_v60  ;;  %v4000_v49 = vpop.f32.mrb[21].mxu0  ;;  %3351 = vrcp.f32 %v1280_v43  ;;  %v1823_v13 = vmul.f32 %v3912_v0, %v1765_v48 }
 0x12c   : > { %v3997_v58 = vpop.eup %3335  ;;  %v1428_v55 = vmul.f32 %v3334_v28, %v3856_v39  ;;  %5298 = vst [vmem:[#allocation35_spill] sm:$0xff] %v4000_v49  ;;  %v4002_v16 = vpop.f32.mrb[21].mxu1  ;;  %v1908_v18 = vrot.slane %v1859_v44, 1  ;;  %v2033_v51 = vrot.slane %v1984_v24, 2  ;;  %v1769_v25 = vmul.f32 %v3807_v35, %v1430_v22 }
 0x12d   : > { %5299 = vst [vmem:[#allocation36_spill] sm:$0xff] %v4002_v16  ;;  %v3338_v5 = vpop.eup %3337  ;;  %v3164_v19 = vpop.f32.mrb[22].mxu0  ;;  %3353 = vpow2.f32 %v2998_v27 }
 0x12e   : > { %v3200_v45 = vpop.f32.mrb[22].mxu1  ;;  %v4005_v20 = vpop.eup %3339  ;;  %v1767_v59 = vmul.f32 %v3798_v32, %v1428_v55  ;;  %v1429_v60 = vmul.f32 %v3338_v5, %v3867_v47  ;;  %v1909_v24 = vsel %vm1906_vm9, %v1907_v10, %v1908_v18  ;;  %v1911_v35 = vsel %vm1906_vm9, %v1908_v18, %v1910_v30 }
 0x12f   : > { %v4010_v39 = vpop.f32.mrb[23].mxu0  ;;  %v4012_v28 = vpop.f32.mrb[23].mxu1  ;;  %v2034_v19 = vsel %vm2031_vm10, %v2032_v52, %v2033_v51  ;;  %v2036_v45 = vsel %vm2031_vm10, %v2033_v51, %v2035_v29  ;;  %v1964_v22 = vadd.f32 %v1911_v35, %v1823_v13  ;;  %v1963_v48 = vadd.f32 %v1909_v24, %v1822_v17 }
 0x130   : > { %5300 = vst [vmem:[#allocation37_spill] sm:$0xff] %v4010_v39  ;;  %5301 = vst [vmem:[#allocation38_spill] sm:$0xff] %v4012_v28  ;;  %v3342_v43 = vpop.eup %3341  ;;  %3355 = vrcp.f32 %v1303_v7  ;;  %v1044_v32 = vmul.f32 %v3805_v34, %v3883_v12  ;;  %v2146_v27 = vmul.f32 %v3978_v33, %v1769_v25  ;;  %v2108_v44 = vmul.f32 %v3941_v26, %v1767_v59  ;;  %v1673_v7 = vpop.permute.xlu0 %1672 }
 0x131   : > { %v4020_v47 = vpop.eup %3343  ;;  %v2144_v10 = vmul.f32 %v3978_v33, %v1767_v59  ;;  %v1768_v30 = vmul.f32 %v3780_v21, %v1429_v60  ;;  %v2270_v51 = vmul.f32 %v3947_v62, %v1769_v25  ;;  %v2088_v29 = vadd.f32 %v2034_v19, %v1963_v48 }
 0x132   : > { %v3346_v52 = vpop.eup %3345  ;;  %v2268_v17 = vmul.f32 %v3947_v62, %v1767_v59  ;;  %v2089_v55 = vadd.f32 %v2036_v45, %v1964_v22  ;;  %v1021_v13 = vmul.f32 %v3894_v63, %v3805_v34  ;;  %v1048_v24 = vmul.f32 %v3896_v2, %v3805_v34  ;;  %v4034_v21 = vpop.f32.mrb[24].mxu0 }
 0x133   : > { %v3348_v5 = vpop.eup %3347  ;;  %v2109_v12 = vmul.f32 %v3941_v26, %v1768_v30  ;;  %v2145_v18 = vmul.f32 %v3978_v33, %v1768_v30  ;;  %5302 = vst [vmem:[#allocation39_spill] sm:$0xff] %v4034_v21  ;;  %v4036_v60 = vpop.f32.mrb[24].mxu1  ;;  %v2124_v35 = vadd.f32 %v2108_v44, %v2088_v29  ;;  %v2269_v59 = vmul.f32 %v3947_v62, %v1768_v30 }
 0x134   : > { %5303 = vst [vmem:[#allocation40_spill] sm:$0xff] %v4036_v60  ;;  %v3350_v25 = vpop.eup %3349  ;;  %v1019_v19 = vmul.f32 %v3805_v34, %v3903_v37  ;;  %v1046_v45 = vmul.f32 %v3805_v34, %v3905_v41  ;;  %v4043_v22 = vpop.f32.mrb[25].mxu0  ;;  %v2195_v48 = vrot.slane %v2146_v27, 1  ;;  %v2192_v2 = vrot.slane %v2144_v10, 1 }
 0x135   : > { %5304 = vst [vmem:[#allocation41_spill] sm:$0xff] %v4043_v22  ;;  %v4045_v63 = vpop.f32.mrb[25].mxu1  ;;  %v2125_v28 = vadd.f32 %v2109_v12, %v2089_v55  ;;  %v2193_v21 = vrot.slane %v2145_v18, 1  ;;  %v3168_v39 = vpop.f32.mrb[26].mxu0  ;;  %v2319_v16 = vrot.slane %v2270_v51, 2  ;;  %v2316_v44 = vrot.slane %v2268_v17, 2 }
 0x136   : > { %5305 = vst [vmem:[#allocation42_spill] sm:$0xff] %v4045_v63  ;;  %v3204_v60 = vpop.f32.mrb[26].mxu1  ;;  %v2317_v29 = vrot.slane %v2269_v59, 2  ;;  %v1278_v30 = vadd.f32 1.0, %v3348_v5  ;;  %v4047_v49 = vpop.f32.mrb[27].mxu0  ;;  %v1457_v27 = vmul.f32 %v3342_v43, %v3853_v11  ;;  %v1020_v10 = vmul.f32 %v3805_v34, %v3909_v54 }
 0x137   : > { %5306 = vst [vmem:[#allocation43_spill] sm:$0xff] %v4047_v49  ;;  %v4049_v37 = vpop.f32.mrb[27].mxu1  ;;  %v3352_v26 = vpop.eup %3351  ;;  %v2194_v41 = vsel %vm1906_vm9, %v2192_v2, %v2193_v21  ;;  %v2196_v22 = vsel %vm1906_vm9, %v2193_v21, %v2195_v48  ;;  %v4060_v12 = vrot.slane %v3925_v57, %v3683_v23  ;;  %v1300_v18 = vadd.f32 1.0, %v3997_v58 }
 0x138   : > { %5307 = vst [vmem:[#allocation44_spill] sm:$0xff] %v4049_v37  ;;  %v3354_v39 = vpop.eup %3353  ;;  %v2248_v55 = vadd.f32 %v2194_v41, %v2124_v35  ;;  %v2249_v51 = vadd.f32 %v2196_v22, %v2125_v28  ;;  %v2318_v17 = vsel %vm2031_vm10, %v2316_v44, %v2317_v29  ;;  %v2320_v5 = vsel %vm2031_vm10, %v2317_v29, %v2319_v16  ;;  %v4073_v16 = vpop.permute.xlu0 %1623 }
 0x139   : > { %5308 = vst [vmem:[#allocation45_spill] sm:$0xff] %v4060_v12  ;;  %3357 = vrcp.f32 %v1278_v30  ;;  %v1047_v11 = vmul.f32 %v3805_v34, %v3920_v50  ;;  %v1433_v28 = vmul.f32 %v3352_v26, %v3881_v8  ;;  %v4071_v60 = vadd.f32 %v3814_v38, %v1044_v32  ;;  %5310 = vst [vmem:[#allocation47_spill] sm:$0xff] %v4073_v16  ;;  %v5332_v16 = vld [vmem:[#allocation6_spill] sm:$0xff] }
 0x13a   : > { %v3356_v43 = vpop.eup %3355  ;;  %v4065_v21 = vadd.f32 %v2318_v17, %v2248_v55  ;;  %v4067_v54 = vadd.f32 %v2320_v5, %v2249_v51  ;;  %v4077_v23 = vrot.slane %v3925_v57, %v3717_v42  ;;  %v4080_v58 = vadd.f32 %v3814_v38, %v1021_v13  ;;  %v4088_v59 = vpop.f32.mrb[28].mxu0 }
 0x13b   : > { %5309 = vst [vmem:[#allocation46_spill] sm:$0xff] %v4071_v60  ;;  %v4083_v50 = vadd.f32 %v3814_v38, %v1048_v24  ;;  %v4086_v35 = vadd.f32 %v3814_v38, %v1019_v19  ;;  %5312 = vst [vmem:[#allocation49_spill] sm:$0xff] %v4088_v59  ;;  %v4090_v26 = vpop.f32.mrb[28].mxu1  ;;  %v1307_v8 = vadd.f32 1.0, %v3346_v52  ;;  %v4092_v32 = vmul.f32 %v1673_v7, %v1457_v27  ;;  %v4100_v57 = vpop.f32.mrb[29].mxu0 }
 0x13c   : > { %5311 = vst [vmem:[#allocation48_spill] sm:$0xff] %v4077_v23  ;;  %5313 = vst [vmem:[#allocation50_spill] sm:$0xff] %v4090_v26  ;;  %v4095_v22 = vadd.f32 %v3814_v38, %v1046_v45  ;;  %v4098_v42 = vadd.f32 %v3814_v38, %v1020_v10  ;;  %v4102_v13 = vpop.f32.mrb[29].mxu1  ;;  %v1456_v24 = vmul.f32 %v3356_v43, %v3877_v3  ;;  %v1279_v48 = vadd.f32 1.0, %v3354_v39  ;;  %v3172_v7 = vpop.f32.mrb[30].mxu0 }
 0x13d   : > { %5314 = vst [vmem:[#allocation51_spill] sm:$0xff] %v4092_v32  ;;  %5315 = vst [vmem:[#allocation52_spill] sm:$0xff] %v4100_v57  ;;  %v1455_v19 = vmul.f32 %v4020_v47, %v3859_v40  ;;  %v4108_v52 = vadd.f32 %v3814_v38, %v1047_v11  ;;  %v3208_v2 = vpop.f32.mrb[30].mxu1  ;;  %3359 = vrcp.f32 %v1300_v18  ;;  %v1772_v45 = vmul.f32 %v3768_v15, %v1433_v28  ;;  %v4112_v30 = vpop.f32.mrb[31].mxu0 }
 0x13e   : > { %5316 = vst [vmem:[#allocation53_spill] sm:$0xff] %v4102_v13  ;;  %v1305_v44 = vadd.f32 1.0, %v3350_v25  ;;  %v3025_v29 = vmul.f32 -1.442695, %v4071_v60  ;;  %5317 = vst [vmem:[#allocation54_spill] sm:$0xff] %v4112_v30  ;;  %v4114_v41 = vpop.f32.mrb[31].mxu1  ;;  %v1454_v27 = vmul.f32 %v4005_v20, %v3832_v56  ;;  %3361 = vrcp.f32 %v1307_v8  ;;  %v4126_v10 = vpop.permute.xlu0 %1694 }
 0x13f   : > { %5318 = vst [vmem:[#allocation55_spill] sm:$0xff] %v4114_v41  ;;  %v3002_v3 = vmul.f32 -1.442695, %v4080_v58  ;;  %v3029_v40 = vmul.f32 -1.442695, %v4083_v50  ;;  %v4123_v15 = vmul.f32 %v3928_v4, %v4092_v32  ;;  %v4130_v55 = vmul.f32 %v3809_v36, %v1456_v24 }
 0x140   : > { %v3000_v47 = vmul.f32 -1.442695, %v4086_v35  ;;  %v3027_v25 = vmul.f32 -1.442695, %v4095_v22  ;;  %v3001_v39 = vmul.f32 -1.442695, %v4098_v42  ;;  %v4133_v51 = vmul.f32 %v3987_v61, %v1455_v19 }
 0x141   : > { %5319 = vst [vmem:[#allocation56_spill] sm:$0xff] %v4123_v15  ;;  %5320 = vst [vmem:[#allocation57_spill] sm:$0xff] %v4130_v55  ;;  %3363 = vrcp.f32 %v1279_v48  ;;  %v3028_v56 = vmul.f32 -1.442695, %v4108_v52  ;;  %v4137_v20 = vmul.f32 %v3928_v4, %v1772_v45  ;;  %v4140_v17 = vmul.f32 %v3918_v46, %v1772_v45 }
 0x142   : > { %5321 = vst [vmem:[#allocation58_spill] sm:$0xff] %v4133_v51  ;;  %3365 = vrcp.f32 %v1305_v44  ;;  %v1024_v5 = vmul.f32 %v3953_v9, %v3805_v34  ;;  %v4145_v36 = vmul.f32 %v4077_v23, %v1772_v45  ;;  %v4148_v61 = vmul.f32 %v4060_v12, %v1772_v45  ;;  %v4154_v43 = vpop.f32.mrb[32].mxu0  ;;  %v3211_v28 = vpop.f32.mrb[32].mxu1 }
 0x143   : > { %v3358_v18 = vpop.eup %3357  ;;  %v4152_v11 = vmul.f32 %v3918_v46, %v4092_v32  ;;  %3367 = vpow2.f32 %v3002_v3  ;;  %5322 = vst [vmem:[#allocation59_spill] sm:$0xff] %v4154_v43  ;;  %v1658_v9 = vpop.permute.xlu1 %1657  ;;  %v4165_v7 = vmul.f32 %v3978_v33, %v3981_v53  ;;  %v1051_v2 = vmul.f32 %v3955_v1, %v3805_v34 }
 0x144   : > { %v1431_v8 = vmul.f32 %v3358_v18, %v3934_v31  ;;  %3369 = vpow2.f32 %v3029_v40  ;;  %v4159_v19 = vadd.f32 %v3814_v38, %v1024_v5  ;;  %v4161_v48 = vpop.f32.mrb[33].mxu0  ;;  %v1022_v31 = vmul.f32 %v3805_v34, %v3960_v6  ;;  %v992_v44 = vpop.f32.mrb[33].mxu1  ;;  %v5325_v40 = vld [vmem:[#allocation27_spill] sm:$0xff] }
 0x145   : > { %5323 = vst [vmem:[#allocation60_spill] sm:$0xff] %v4161_v48  ;;  %3371 = vpow2.f32 %v3000_v47  ;;  %v3176_v45 = vpop.f32.mrb[34].mxu0  ;;  %v4174_v47 = vpop.permute.xlu0 %1702  ;;  %v4178_v1 = vadd.f32 %v3814_v38, %v1051_v2  ;;  %v2479_v24 = vrot.slane %v4145_v36, 1  ;;  %v5328_v2 = vld [vmem:[#allocation29_spill] sm:$0xff] }
 0x146   : > { %v1770_v5 = vmul.f32 %v3766_v14, %v1431_v8  ;;  %3373 = vpow2.f32 %v3027_v25  ;;  %v3212_v18 = vpop.f32.mrb[34].mxu1  ;;  %v3005_v28 = vmul.f32 -1.442695, %v4159_v19  ;;  %v4181_v6 = vadd.f32 %v3814_v38, %v1022_v31  ;;  %v4214_v13 = vpop.f32.mrb[35].mxu0 }
 0x147   : > { %3375 = vpow2.f32 %v3001_v39  ;;  %5324 = vst [vmem:[#allocation61_spill] sm:$0xff] %v4178_v1  ;;  %v994_v45 = vpop.f32.mrb[35].mxu1  ;;  %v3360_v44 = vpop.eup %3359  ;;  %v4187_v14 = vmul.f32 %v3947_v62, %v3981_v53  ;;  %v4189_v25 = vmul.f32 %v1658_v9, %v1454_v27  ;;  %v2603_v39 = vrot.slane %v4148_v61, 2  ;;  %5331 = vst [vmem:[#allocation29_spill] sm:$0xff] %v4214_v13 }
 0x148   : > { %v2392_v3 = vmul.f32 %v5325_v40, %v1770_v5  ;;  %v2428_v8 = vmul.f32 %v4077_v23, %v1770_v5  ;;  %3377 = vpow2.f32 %v3025_v29  ;;  %v4194_v31 = vpop.eup %3361  ;;  %v2552_v36 = vmul.f32 %v4060_v12, %v1770_v5 }
 0x149   : > { %5326 = vst [vmem:[#allocation27_spill] sm:$0xff] %v4194_v31  ;;  %v1861_v45 = vmul.f32 %v3928_v4, %v1770_v5  ;;  %3379 = vpow2.f32 %v3028_v56  ;;  %v1986_v27 = vmul.f32 %v3918_v46, %v1770_v5  ;;  %v3032_v61 = vmul.f32 -1.442695, %v4178_v1  ;;  %v5329_v56 = vld [vmem:[#allocation19_spill] sm:$0xff]  ;;  %v5330_v1 = vld [vmem:[#allocation28_spill] sm:$0xff] }
 0x14a   : > { %v2408_v18 = vadd.f32 %v2392_v3, %v4065_v21  ;;  %3381 = vpow2.f32 %v3005_v28  ;;  %v3003_v9 = vmul.f32 -1.442695, %v4181_v6  ;;  %v4208_v21 = vmul.f32 %v3978_v33, %v4189_v25  ;;  %v1654_v3 = vpop.permute.xlu0 %1653 }
 0x14b   : > { %v3364_v32 = vpop.eup %3363  ;;  %v1453_v48 = vmul.f32 %v3360_v44, %v5329_v56  ;;  %v2476_v41 = vrot.slane %v2428_v8, 1  ;;  %v1824_v28 = vmul.f32 %v3912_v0, %v1770_v5  ;;  %v1049_v30 = vmul.f32 %v3805_v34, %v5330_v1 }
 0x14c   : > { %v4202_v29 = vpop.eup %3365  ;;  %v1432_v53 = vmul.f32 %v3364_v32, %v5328_v2  ;;  %3383 = vpow2.f32 %v3003_v9  ;;  %v2600_v2 = vrot.slane %v2552_v36, 2  ;;  %v1912_v59 = vrot.slane %v1861_v45, 1 }
 0x14d   : > { %5327 = vst [vmem:[#allocation62_spill] sm:$0xff] %v4202_v29  ;;  %v3368_v43 = vpop.eup %3367  ;;  %v2037_v15 = vrot.slane %v1986_v27, 2  ;;  %3385 = vpow2.f32 %v3032_v61  ;;  %v4217_v44 = vmul.f32 %v1654_v3, %v1453_v48 }
 0x14e   : > { %v3370_v32 = vpop.eup %3369  ;;  %v1771_v57 = vmul.f32 %v5332_v16, %v1432_v53  ;;  %v1283_v26 = vadd.f32 1.0, %v3368_v43 }
 0x14f   : > { %v3372_v37 = vpop.eup %3371  ;;  %v1310_v49 = vadd.f32 1.0, %v3370_v32  ;;  %5333 = vst [vmem:[#allocation19_spill] sm:$0xff] %v4217_v44 }
 0x150   : > { %v3374_v8 = vpop.eup %3373  ;;  %v2393_v5 = vmul.f32 %v5325_v40, %v1771_v57  ;;  %v2429_v9 = vmul.f32 %v4077_v23, %v1771_v57  ;;  %v2553_v1 = vmul.f32 %v4060_v12, %v1771_v57  ;;  %3387 = vrcp.f32 %v1283_v26 }
 0x151   : > { %v3376_v56 = vpop.eup %3375  ;;  %3389 = vrcp.f32 %v1310_v49  ;;  %v1281_v36 = vadd.f32 1.0, %v3372_v37  ;;  %v1862_v53 = vmul.f32 %v3928_v4, %v1771_v57  ;;  %v1987_v16 = vmul.f32 %v3918_v46, %v1771_v57 }
 0x152   : > { %v2409_v43 = vadd.f32 %v2393_v5, %v4067_v54  ;;  %v2477_v45 = vrot.slane %v2429_v9, 1  ;;  %v2601_v48 = vrot.slane %v2553_v1, 2  ;;  %v1308_v27 = vadd.f32 1.0, %v3374_v8  ;;  %v3378_v61 = vpop.eup %3377 }
 0x153   : > { %3391 = vrcp.f32 %v1281_v36  ;;  %v1913_v3 = vrot.slane %v1862_v53, 1  ;;  %v2038_v32 = vrot.slane %v1987_v16, 2  ;;  %v1282_v13 = vadd.f32 1.0, %v3376_v56  ;;  %v3380_v60 = vpop.eup %3379 }
 0x154   : > { %v2478_v26 = vsel %vm1906_vm9, %v2476_v41, %v2477_v45  ;;  %v2480_v49 = vsel %vm1906_vm9, %v2477_v45, %v2479_v24  ;;  %v2602_v37 = vsel %vm2031_vm10, %v2600_v2, %v2601_v48  ;;  %v2604_v63 = vsel %vm2031_vm10, %v2601_v48, %v2603_v39  ;;  %v3382_v31 = vpop.eup %3381 }
 0x155   : > { %v2532_v29 = vadd.f32 %v2478_v26, %v2408_v18  ;;  %v2533_v54 = vadd.f32 %v2480_v49, %v2409_v43  ;;  %v1914_v5 = vsel %vm1906_vm9, %v1912_v59, %v1913_v3  ;;  %v2039_v8 = vsel %vm2031_vm10, %v2037_v15, %v2038_v32  ;;  %v5338_v26 = vld [vmem:[#allocation31_spill] sm:$0xff] }
 0x156   : > { %v1965_v9 = vadd.f32 %v1914_v5, %v1824_v28  ;;  %3393 = vrcp.f32 %v1308_v27  ;;  %v1825_v1 = vmul.f32 %v3912_v0, %v1771_v57  ;;  %v5334_v56 = vrot.slane %v4137_v20, 1  ;;  %v3384_v24 = vpop.eup %3383 }
 0x157   : > { %v2656_v36 = vadd.f32 %v2602_v37, %v2532_v29  ;;  %v2657_v2 = vadd.f32 %v2604_v63, %v2533_v54  ;;  %3395 = vrcp.f32 %v1282_v13  ;;  %v5335_v39 = vrot.slane %v4140_v17, 2  ;;  %v3386_v28 = vpop.eup %3385  ;;  %v5337_v63 = vld [vmem:[#allocation30_spill] sm:$0xff]  ;;  %v5339_v54 = vld [vmem:[#allocation9_spill] sm:$0xff] }
 0x158   : > { %v1916_v41 = vsel %vm1906_vm9, %v1913_v3, %v5334_v56  ;;  %v2090_v53 = vadd.f32 %v2039_v8, %v1965_v9  ;;  %v1309_v16 = vadd.f32 1.0, %v3380_v60  ;;  %v1286_v15 = vadd.f32 1.0, %v3382_v31 }
 0x159   : > { %v2041_v18 = vsel %vm2031_vm10, %v2038_v32, %v5335_v39  ;;  %v1966_v59 = vadd.f32 %v1916_v41, %v1825_v1  ;;  %2672 = vst [vmem:[#allocation2] sm:$0xff] %v2656_v36  ;;  %2673 = vst [vmem:[#allocation2 + $0x8] sm:$0xff] %v2657_v2  ;;  %v2282_v57 = vmul.f32 %v3947_v62, %v4189_v25  ;;  %v1284_v20 = vadd.f32 1.0, %v3384_v24 }
 0x15a   : > { %v4241_v43 = vadd.f32 %v3814_v38, %v1049_v30  ;;  %v1023_v13 = vmul.f32 %v3805_v34, %v5337_v63  ;;  %v3388_v17 = vpop.eup %3387  ;;  %3397 = vrcp.f32 %v1309_v16  ;;  %v2157_v60 = vmul.f32 %v3978_v33, %v4217_v44 }
 0x15b   : > { %v4245_v29 = vadd.f32 %v2041_v18, %v1966_v59  ;;  %v2281_v31 = vmul.f32 %v3947_v62, %v4217_v44  ;;  %v3390_v45 = vpop.eup %3389  ;;  %v1306_v48 = vadd.f32 1.0, %v3378_v61  ;;  %v1436_v25 = vmul.f32 %v3388_v17, %v4080_v58  ;;  %v5347_v18 = vld [vmem:[#allocation7_spill] sm:$0xff] }
 0x15c   : > { %5336 = vst [vmem:[#allocation28_spill] sm:$0xff] %v4241_v43  ;;  %v2215_v30 = vrot.slane %v4208_v21, 1  ;;  %3399 = vrcp.f32 %v1286_v15  ;;  %v1463_v27 = vmul.f32 %v3390_v45, %v4083_v50  ;;  %v2213_v3 = vrot.slane %v2157_v60, 1 }
 0x15d   : > { %v2337_v32 = vrot.slane %v2281_v31, 2  ;;  %v1050_v49 = vmul.f32 %v3805_v34, %v5338_v26  ;;  %v3392_v37 = vpop.eup %3391  ;;  %v1775_v5 = vmul.f32 %v5339_v54, %v1436_v25  ;;  %v2339_v8 = vrot.slane %v2282_v57, 2 }
 0x15e   : > { %3401 = vrcp.f32 %v1284_v20  ;;  %v3030_v9 = vmul.f32 -1.442695, %v4241_v43  ;;  %v1434_v61 = vmul.f32 %v3392_v37, %v4086_v35  ;;  %v5340_v58 = vrot.slane %v4165_v7, 1  ;;  %v5346_v7 = vld [vmem:[#allocation33_spill] sm:$0xff] }
 0x15f   : > { %v4265_v50 = vsel %vm1906_vm9, %v2213_v3, %v2215_v30  ;;  %v4268_v1 = vadd.f32 %v3814_v38, %v1023_v13  ;;  %v1802_v56 = vmul.f32 %v4174_v47, %v1463_v27  ;;  %v5343_v41 = vrot.slane %v4187_v14, 2  ;;  %v5349_v20 = vld [vmem:[#allocation25_spill] sm:$0xff]  ;;  %v5350_v27 = vld [vmem:[#allocation15_spill] sm:$0xff] }
 0x160   : > { %v4262_v21 = vsel %vm1906_vm9, %v5340_v58, %v2213_v3  ;;  %5342 = vst [vmem:[#allocation30_spill] sm:$0xff] %v4265_v50  ;;  %v4277_v35 = vsel %vm2031_vm10, %v2337_v32, %v2339_v8  ;;  %v1027_v36 = vmul.f32 %v5346_v7, %v3805_v34  ;;  %v3394_v2 = vpop.eup %3393  ;;  %3403 = vrcp.f32 %v1306_v48 }
 0x161   : > { %5341 = vst [vmem:[#allocation6_spill] sm:$0xff] %v4262_v21  ;;  %v4274_v24 = vsel %vm2031_vm10, %v5343_v41, %v2337_v32  ;;  %5345 = vst [vmem:[#allocation9_spill] sm:$0xff] %v4277_v35  ;;  %v1773_v59 = vmul.f32 %v5347_v18, %v1434_v61  ;;  %v4284_v16 = vadd.f32 %v3814_v38, %v1050_v49  ;;  %v3396_v47 = vpop.eup %3395  ;;  %v1313_v57 = vadd.f32 1.0, %v3386_v28 }
 0x162   : > { %5344 = vst [vmem:[#allocation31_spill] sm:$0xff] %v4274_v24  ;;  %v2149_v14 = vmul.f32 %v3978_v33, %v1775_v5  ;;  %v2273_v15 = vmul.f32 %v3947_v62, %v1775_v5  ;;  %3405 = vpow2.f32 %v3030_v9  ;;  %v1461_v13 = vmul.f32 %v3394_v2, %v4095_v22  ;;  %v5352_v22 = vld [vmem:[#allocation34_spill] sm:$0xff] }
 0x163   : > { %5348 = vst [vmem:[#allocation33_spill] sm:$0xff] %v4284_v16  ;;  %v2110_v63 = vmul.f32 %v5349_v20, %v1773_v59  ;;  %v1435_v17 = vmul.f32 %v3396_v47, %v4098_v42  ;;  %v3004_v60 = vmul.f32 -1.442695, %v4268_v1  ;;  %v2147_v31 = vmul.f32 %v3978_v33, %v1773_v59 }
 0x164   : > { %v2271_v45 = vmul.f32 %v3947_v62, %v1773_v59  ;;  %v2445_v48 = vmul.f32 %v4077_v23, %v1802_v56  ;;  %v4296_v25 = vadd.f32 %v3814_v38, %v1027_v36  ;;  %v3398_v30 = vpop.eup %3397  ;;  %v4300_v32 = vmul.f32 %v3928_v4, %v1802_v56 }
 0x165   : > { %v2126_v28 = vadd.f32 %v2110_v63, %v2090_v53  ;;  %v1774_v3 = vmul.f32 %v5350_v27, %v1435_v17  ;;  %v1054_v42 = vmul.f32 %v5352_v22, %v3805_v34  ;;  %v2200_v49 = vrot.slane %v2149_v14, 1  ;;  %v5353_v34 = vld [vmem:[#allocation21_spill] sm:$0xff] }
 0x166   : > { %5351 = vst [vmem:[#allocation7_spill] sm:$0xff] %v4300_v32  ;;  %v3400_v26 = vpop.eup %3399  ;;  %v2324_v37 = vrot.slane %v2273_v15, 2  ;;  %v1462_v54 = vmul.f32 %v3398_v30, %v4108_v52  ;;  %v2569_v5 = vmul.f32 %v4060_v12, %v1802_v56  ;;  %v4307_v38 = vmul.f32 %v4126_v10, %v1461_v13 }
 0x167   : > { %v2111_v53 = vmul.f32 %v5349_v20, %v1774_v3  ;;  %v2148_v8 = vmul.f32 %v3978_v33, %v1774_v3  ;;  %v2272_v9 = vmul.f32 %v3947_v62, %v1774_v3  ;;  %v2197_v58 = vrot.slane %v2147_v31, 1 }
 0x168   : > { %v3402_v61 = vpop.eup %3401  ;;  %v2321_v41 = vrot.slane %v2271_v45, 2  ;;  %v4313_v7 = vmul.f32 %v5353_v34, %v1462_v54  ;;  %v2504_v36 = vrot.slane %v2445_v48, 1  ;;  %v1439_v10 = vmul.f32 %v3400_v26, %v4159_v19  ;;  %v5367_v34 = vld [vmem:[#allocation38_spill] sm:$0xff] }
 0x169   : > { %v2127_v52 = vadd.f32 %v2111_v53, %v4245_v29  ;;  %v2198_v2 = vrot.slane %v2148_v8, 1  ;;  %v2322_v18 = vrot.slane %v2272_v9, 2  ;;  %v2628_v14 = vrot.slane %v2569_v5, 2  ;;  %v5361_v8 = vld [vmem:[#allocation8_spill] sm:$0xff] }
 0x16a   : > { %5354 = vst [vmem:[#allocation25_spill] sm:$0xff] %v4313_v7  ;;  %v4319_v59 = vmul.f32 %v4077_v23, %v4313_v7  ;;  %v4323_v47 = vmul.f32 %v4060_v12, %v4313_v7  ;;  %v1437_v15 = vmul.f32 %v3402_v61, %v4181_v6  ;;  %v4326_v63 = vpop.eup %3403  ;;  %v4335_v3 = vmul.f32 %v3918_v46, %v1802_v56  ;;  %v5357_v6 = vld [vmem:[#allocation10_spill] sm:$0xff] }
 0x16b   : > { %v2199_v13 = vsel %vm1906_vm9, %v2197_v58, %v2198_v2  ;;  %v2201_v29 = vsel %vm1906_vm9, %v2198_v2, %v2200_v49  ;;  %v2323_v17 = vsel %vm2031_vm10, %v2321_v41, %v2322_v18  ;;  %v2325_v19 = vsel %vm2031_vm10, %v2322_v18, %v2324_v37  ;;  %v4365_v58 = vld [vmem:[%s5210_s3] ss:$0 sm:$0xff] }
 0x16c   : > { %5355 = vst [vmem:[#allocation15_spill] sm:$0xff] %v4323_v47  ;;  %v3406_v31 = vpop.eup %3405  ;;  %v2250_v45 = vadd.f32 %v2199_v13, %v2126_v28  ;;  %v2251_v48 = vadd.f32 %v2201_v29, %v2127_v52  ;;  %v5230_v30 = vrot.slane %v4319_v59, 1  ;;  %v5229_v27 = vrot.slane %v4323_v47, 2  ;;  %5356 = vst [vmem:[#allocation34_spill] sm:$0xff] %v4335_v3  ;;  %v4374_v52 = vpop.permute.xlu1 %1728  ;;  %v5364_v2 = vld [vmem:[#allocation35_spill] sm:$0xff]  ;;  %v5366_v13 = vld [vmem:[#allocation37_spill] sm:$0xff] }
 0x16d   : > { %v1778_v22 = vmul.f32 %v5357_v6, %v1439_v10  ;;  %3407 = vrcp.f32 %v1313_v57  ;;  %v3031_v26 = vmul.f32 -1.442695, %v4284_v16  ;;  %v4353_v56 = vmul.f32 %v4077_v23, %v4307_v38  ;;  %5362 = vst [vmem:[#allocation8_spill] sm:$0xff] %v4365_v58  ;;  %v5365_v10 = vld [vmem:[#allocation36_spill] sm:$0xff]  ;;  %v5372_v16 = vld [vmem:[#allocation23_spill] sm:$0xff] }
 0x16e   : > { %v2374_v49 = vadd.f32 %v2323_v17, %v2250_v45  ;;  %v4339_v54 = vadd.f32 %v2325_v19, %v2251_v48  ;;  %v4344_v28 = vsel %vm1906_vm9, %v5230_v30, %v2504_v36  ;;  %v4349_v37 = vsel %vm2031_vm10, %v5229_v27, %v2628_v14  ;;  %v5369_v48 = vld [vmem:[#allocation24_spill] sm:$0xff]  ;;  %v5370_v27 = vld [vmem:[#allocation62_spill] sm:$0xff]  ;;  %v4438_v17 = vpop.permute.xlu0 %1724 }
 0x16f   : > { %5358 = vst [vmem:[#allocation21_spill] sm:$0xff] %v4344_v28  ;;  %5359 = vst [vmem:[#allocation10_spill] sm:$0xff] %v4349_v37  ;;  %v4357_v57 = vmul.f32 %v4060_v12, %v4307_v38  ;;  %v1311_v53 = vadd.f32 1.0, %v3406_v31  ;;  %v1776_v9 = vmul.f32 %v5361_v8, %v1437_v15  ;;  %3409 = vpow2.f32 %v3004_v60  ;;  %v4379_v60 = vld [vmem:[%s5209_s2] ss:$0 sm:$0xff] }
 0x170   : > { %v3008_v61 = vmul.f32 -1.442695, %v4296_v25  ;;  %v4368_v41 = vadd.f32 %v4365_v58, %v1054_v42  ;;  %v4372_v36 = vmul.f32 %v3928_v4, %v1778_v22  ;;  %5363 = vst [vmem:[#allocation64_spill] sm:$0xff] %v4379_v60  ;;  %v1025_v18 = vmul.f32 %v4379_v60, %v5364_v2 }
 0x171   : > { %5360 = vst [vmem:[#allocation63_spill] sm:$0xff] %v4357_v57  ;;  %v1052_v14 = vmul.f32 %v4379_v60, %v5365_v10  ;;  %v4386_v42 = vmul.f32 %v3918_v46, %v1778_v22  ;;  %v2394_v15 = vmul.f32 %v5325_v40, %v1776_v9  ;;  %v1026_v29 = vmul.f32 %v4379_v60, %v5366_v13 }
 0x172   : > { %3411 = vpow2.f32 %v3008_v61  ;;  %v4393_v19 = vmul.f32 %v4077_v23, %v1778_v22  ;;  %v3035_v31 = vmul.f32 -1.442695, %v4368_v41  ;;  %v4397_v45 = vadd.f32 %v4365_v58, %v1025_v18 }
 0x173   : > { %v4401_v6 = vmul.f32 %v4060_v12, %v1778_v22  ;;  %v4403_v8 = vadd.f32 %v2394_v15, %v2374_v49  ;;  %3413 = vrcp.f32 %v1311_v53  ;;  %v4408_v10 = vadd.f32 %v4365_v58, %v1052_v14 }
 0x174   : > { %3415 = vpow2.f32 %v3035_v31  ;;  %v3006_v2 = vmul.f32 -1.442695, %v4397_v45  ;;  %v4412_v18 = vadd.f32 %v4365_v58, %v1026_v29  ;;  %v1053_v22 = vmul.f32 %v4379_v60, %v5367_v34  ;;  %v1680_v31 = vpop.permute.xlu1 %1679 }
 0x175   : > { %3417 = vpow2.f32 %v3031_v26  ;;  %v3033_v15 = vmul.f32 -1.442695, %v4408_v10  ;;  %v1873_v14 = vmul.f32 %v3928_v4, %v4133_v51  ;;  %v4423_v5 = vmul.f32 %v4077_v23, %v1776_v9 }
 0x176   : > { %3419 = vpow2.f32 %v3006_v2  ;;  %v3007_v26 = vmul.f32 -1.442695, %v4412_v18  ;;  %v4427_v29 = vadd.f32 %v4365_v58, %v1053_v22  ;;  %v4431_v34 = vmul.f32 %v3928_v4, %v4130_v55 }
 0x177   : > { %v4416_v49 = vpop.eup %3407  ;;  %v4434_v2 = vmul.f32 %v4060_v12, %v1776_v9  ;;  %3421 = vpow2.f32 %v3033_v15  ;;  %v1458_v13 = vmul.f32 %v5370_v27, %v5369_v48  ;;  %v1932_v61 = vrot.slane %v1873_v14, 1 }
 0x178   : > { %5368 = vst [vmem:[#allocation35_spill] sm:$0xff] %v4416_v49  ;;  %3423 = vpow2.f32 %v3007_v26  ;;  %v3034_v30 = vmul.f32 -1.442695, %v4427_v29  ;;  %v5235_v22 = vrot.slane %v4431_v34, 1  ;;  %v4444_v39 = vmul.f32 %v3918_v46, %v4130_v55  ;;  %v1688_v44 = vpop.permute.xlu1 %1687 }
 0x179   : > { %v3410_v53 = vpop.eup %3409  ;;  %v4448_v15 = vmul.f32 %v3912_v0, %v1776_v9  ;;  %v4451_v27 = vmul.f32 %v3928_v4, %v1776_v9  ;;  %v4454_v14 = vmul.f32 %v3918_v46, %v1776_v9  ;;  %v1998_v50 = vmul.f32 %v3918_v46, %v4133_v51 }
 0x17a   : > { %v1285_v24 = vadd.f32 1.0, %v3410_v53  ;;  %3425 = vpow2.f32 %v3034_v30  ;;  %v1934_v26 = vsel %vm1906_vm9, %v1932_v61, %v5235_v22  ;;  %v1797_v35 = vmul.f32 %v1680_v31, %v1458_v13  ;;  %v5373_v61 = vld [vmem:[#allocation27_spill] sm:$0xff]  ;;  %v5375_v31 = vld [vmem:[#allocation40_spill] sm:$0xff]  ;;  %v4475_v30 = vpop.permute.xlu0 %1732 }
 0x17b   : > { %v1832_v21 = vmul.f32 %v3912_v0, %v4133_v51  ;;  %v1460_v22 = vmul.f32 %v5373_v61, %v5372_v16  ;;  %v1057_v51 = vmul.f32 %v4379_v60, %v5375_v31  ;;  %v2057_v37 = vrot.slane %v1998_v50, 2 }
 0x17c   : > { %v3412_v48 = vpop.eup %3411  ;;  %3427 = vrcp.f32 %v1285_v24  ;;  %v4496_v57 = vmul.f32 %v3947_v62, %v1797_v35 }
 0x17d   : > { %v1289_v53 = vadd.f32 1.0, %v3412_v48  ;;  %v4463_v3 = vpop.eup %3413  ;;  %v1973_v24 = vadd.f32 %v1934_v26, %v1832_v21  ;;  %v5374_v48 = vld [vmem:[#allocation39_spill] sm:$0xff]  ;;  %v1799_v32 = vmul.f32 %v1688_v44, %v1460_v22  ;;  %v5377_v26 = vld [vmem:[#allocation41_spill] sm:$0xff]  ;;  %v4488_v50 = vadd.f32 %v4365_v58, %v1057_v51  ;;  %v5380_v44 = vld [vmem:[#allocation42_spill] sm:$0xff] }
 0x17e   : > { %5371 = vst [vmem:[#allocation36_spill] sm:$0xff] %v4463_v3  ;;  %v3416_v49 = vpop.eup %3415  ;;  %v1030_v13 = vmul.f32 %v4379_v60, %v5374_v48  ;;  %v1028_v61 = vmul.f32 %v4379_v60, %v5377_v26  ;;  %v1055_v22 = vmul.f32 %v4379_v60, %v5380_v44 }
 0x17f   : > { %3429 = vrcp.f32 %v1289_v53  ;;  %v3418_v43 = vpop.eup %3417  ;;  %v1316_v3 = vadd.f32 1.0, %v3416_v49  ;;  %v2118_v53 = vmul.f32 %v5349_v20, %v1797_v35  ;;  %v5378_v49 = vrot.slane %v4444_v39, 2  ;;  %5379 = vst [vmem:[#allocation38_spill] sm:$0xff] %v4488_v50 }
 0x180   : > { %v3420_v28 = vpop.eup %3419  ;;  %v4480_v21 = vadd.f32 %v4365_v58, %v1030_v13  ;;  %v4493_v13 = vmul.f32 %v3978_v33, %v1797_v35  ;;  %v4502_v51 = vmul.f32 %v3947_v62, %v1799_v32  ;;  %v4510_v60 = vadd.f32 1.0, %v3418_v43 }
 0x181   : > { %v1287_v48 = vadd.f32 1.0, %v3420_v28  ;;  %v2059_v31 = vsel %vm2031_vm10, %v2057_v37, %v5378_v49  ;;  %v3422_v16 = vpop.eup %3421  ;;  %3431 = vrcp.f32 %v1316_v3  ;;  %v4499_v37 = vmul.f32 %v3978_v33, %v1799_v32  ;;  %v1684_v32 = vpop.permute.xlu0 %1683 }
 0x182   : > { %5376 = vst [vmem:[#allocation37_spill] sm:$0xff] %v4480_v21  ;;  %v2098_v9 = vadd.f32 %v2059_v31, %v1973_v24  ;;  %v3424_v28 = vpop.eup %3423  ;;  %v1314_v26 = vadd.f32 1.0, %v3422_v16  ;;  %v3011_v44 = vmul.f32 -1.442695, %v4480_v21  ;;  %v4506_v3 = vadd.f32 %v4365_v58, %v1028_v61  ;;  %v5381_v24 = vld [vmem:[#allocation46_spill] sm:$0xff]  ;;  %5382 = vst [vmem:[#allocation24_spill] sm:$0xff] %v4510_v60 }
 0x183   : > { %3433 = vrcp.f32 %v1287_v48  ;;  %v1288_v49 = vadd.f32 1.0, %v3424_v28  ;;  %v1459_v31 = vmul.f32 %v4326_v63, %v5381_v24  ;;  %v3038_v16 = vmul.f32 -1.442695, %v4488_v50  ;;  %v5387_v61 = vld [vmem:[#allocation3_spill] sm:$0xff] }
 0x184   : > { %v3426_v35 = vpop.eup %3425  ;;  %3435 = vrcp.f32 %v1314_v26  ;;  %v4514_v48 = vadd.f32 %v4365_v58, %v1055_v22  ;;  %v4519_v63 = vadd.f32 %v2118_v53, %v2098_v9  ;;  %v3009_v22 = vmul.f32 -1.442695, %v4506_v3  ;;  %v5384_v58 = vld [vmem:[#allocation56_spill] sm:$0xff] }
 0x185   : > { %3437 = vrcp.f32 %v1288_v49  ;;  %v1315_v28 = vadd.f32 1.0, %v3426_v35  ;;  %v1798_v50 = vmul.f32 %v1684_v32, %v1459_v31  ;;  %v5385_v49 = vrot.slane %v5384_v58, 1 }
 0x186   : > { %5383 = vst [vmem:[#allocation62_spill] sm:$0xff] %v4514_v48  ;;  %v3428_v47 = vpop.eup %3427  ;;  %3439 = vpow2.f32 %v3011_v44  ;;  %v5386_v35 = vrot.slane %v4431_v34, 1  ;;  %v5388_v53 = vrot.slane %v4152_v11, 2  ;;  %v5389_v58 = vrot.slane %v4444_v39, 2 }
 0x187   : > { %v1438_v7 = vmul.f32 %v3428_v47, %v4268_v1  ;;  %3441 = vpow2.f32 %v3038_v16  ;;  %v4531_v1 = vmul.f32 -1.442695, %v4514_v48  ;;  %v1833_v47 = vmul.f32 %v3912_v0, %v4130_v55 }
 0x188   : > { %v1936_v21 = vsel %vm1906_vm9, %v5386_v35, %v5385_v49  ;;  %3443 = vrcp.f32 %v1315_v28  ;;  %v2061_v34 = vsel %vm2031_vm10, %v5389_v58, %v5388_v53  ;;  %v5390_v44 = vrot.slane %v4319_v59, 1  ;;  %v5392_v58 = vld [vmem:[#allocation14_spill] sm:$0xff] }
 0x189   : > { %v3430_v24 = vpop.eup %3429  ;;  %v1777_v60 = vmul.f32 %v5387_v61, %v1438_v7  ;;  %v5391_v7 = vrot.slane %v4353_v56, 1  ;;  %v1974_v28 = vadd.f32 %v1936_v21, %v1833_v47  ;;  %v4557_v59 = vmul.f32 %v3978_v33, %v1798_v50 }
 0x18a   : > { %v1442_v9 = vmul.f32 %v3430_v24, %v4296_v25  ;;  %v4554_v24 = vmul.f32 %v5349_v20, %v1798_v50  ;;  %3445 = vpow2.f32 %v3009_v22  ;;  %v5393_v43 = vrot.slane %v4423_v5, 1 }
 0x18b   : > { %v4546_v31 = vsel %vm1906_vm9, %v5391_v7, %v5390_v44  ;;  %v2395_v16 = vmul.f32 %v5325_v40, %v1777_v60  ;;  %v2432_v32 = vmul.f32 %v4077_v23, %v1777_v60  ;;  %v2556_v25 = vmul.f32 %v4060_v12, %v1777_v60  ;;  %v3432_v61 = vpop.eup %3431 }
 0x18c   : > { %v1865_v11 = vmul.f32 %v3928_v4, %v1777_v60  ;;  %v1990_v39 = vmul.f32 %v3918_v46, %v1777_v60  ;;  %v1781_v44 = vmul.f32 %v5392_v58, %v1442_v9  ;;  %v5394_v48 = vrot.slane %v4393_v19, 1 }
 0x18d   : > { %v3434_v56 = vpop.eup %3433  ;;  %v2411_v49 = vadd.f32 %v2395_v16, %v4339_v54  ;;  %v2482_v35 = vrot.slane %v2432_v32, 1  ;;  %v2606_v53 = vrot.slane %v2556_v25, 2  ;;  %v5395_v54 = vrot.slane %v4434_v2, 2 }
 0x18e   : > { %v1440_v21 = vmul.f32 %v3434_v56, %v4397_v45  ;;  %v1918_v47 = vrot.slane %v1865_v11, 1  ;;  %v2043_v7 = vrot.slane %v1990_v39, 2  ;;  %v3436_v26 = vpop.eup %3435  ;;  %v5396_v22 = vrot.slane %v4401_v6, 2  ;;  %v5397_v11 = vld [vmem:[#allocation13_spill] sm:$0xff] }
 0x18f   : > { %v2483_v55 = vsel %vm1906_vm9, %v5393_v43, %v2482_v35  ;;  %v2485_v46 = vsel %vm1906_vm9, %v2482_v35, %v5394_v48  ;;  %v2607_v16 = vsel %vm2031_vm10, %v5395_v54, %v2606_v53  ;;  %v3438_v45 = vpop.eup %3437  ;;  %v1827_v5 = vmul.f32 %v3912_v0, %v1777_v60 }
 0x190   : > { %v2609_v9 = vsel %vm2031_vm10, %v2606_v53, %v5396_v22  ;;  %v2534_v32 = vadd.f32 %v2483_v55, %v4403_v8  ;;  %v2535_v25 = vadd.f32 %v2485_v46, %v2411_v49  ;;  %v1469_v43 = vmul.f32 %v3432_v61, %v4368_v41  ;;  %v3440_v35 = vpop.eup %3439 }
 0x191   : > { %v1779_v19 = vmul.f32 %v5397_v11, %v1440_v21  ;;  %v5398_v48 = vrot.slane %v4451_v27, 1  ;;  %v5399_v39 = vrot.slane %v4454_v14, 2  ;;  %v1467_v56 = vmul.f32 %v3436_v26, %v4408_v10  ;;  %v4587_v41 = vpop.eup %3441  ;;  %v5400_v26 = vld [vmem:[#allocation26_spill] sm:$0xff] }
 0x192   : > { %v2658_v53 = vadd.f32 %v2607_v16, %v2534_v32  ;;  %v2659_v55 = vadd.f32 %v2609_v9, %v2535_v25  ;;  %v1441_v60 = vmul.f32 %v3438_v45, %v4412_v18  ;;  %v2152_v8 = vmul.f32 %v3978_v33, %v1781_v44  ;;  %v3444_v49 = vpop.eup %3443 }
 0x193   : > { %v1919_v2 = vsel %vm1906_vm9, %v5398_v48, %v1918_v47  ;;  %v2044_v6 = vsel %vm2031_vm10, %v5399_v39, %v2043_v7  ;;  %v2112_v27 = vmul.f32 %v5349_v20, %v1779_v19  ;;  %v2150_v61 = vmul.f32 %v3978_v33, %v1779_v19 }
 0x194   : > { %v1967_v46 = vadd.f32 %v1919_v2, %v4448_v15  ;;  %v4593_v14 = vmul.f32 %v4438_v17, %v1467_v56  ;;  %2674 = vst [vmem:[#allocation2 + $0x10] sm:$0xff] %v2658_v53  ;;  %2675 = vst [vmem:[#allocation2 + $0x18] sm:$0xff] %v2659_v55  ;;  %v1780_v58 = vmul.f32 %v5400_v26, %v1441_v60  ;;  %v5401_v15 = vrot.slane %v4372_v36, 1  ;;  %v3446_v36 = vpop.eup %3445 }
 0x195   : > { %v5402_v21 = vrot.slane %v4386_v42, 2  ;;  %v2276_v16 = vmul.f32 %v3947_v62, %v1781_v44  ;;  %v2274_v22 = vmul.f32 %v3947_v62, %v1779_v19  ;;  %v2099_v17 = vadd.f32 %v2061_v34, %v1974_v28 }
 0x196   : > { %v2092_v10 = vadd.f32 %v2044_v6, %v1967_v46  ;;  %v1921_v18 = vsel %vm1906_vm9, %v1918_v47, %v5401_v15  ;;  %v2284_v9 = vmul.f32 %v3947_v62, %v1798_v50  ;;  %v2113_v25 = vmul.f32 %v5349_v20, %v1780_v58 }
 0x197   : > { %v2046_v54 = vsel %vm2031_vm10, %v2043_v7, %v5402_v21  ;;  %v1968_v32 = vadd.f32 %v1921_v18, %v1827_v5  ;;  %v2151_v11 = vmul.f32 %v3978_v33, %v1780_v58  ;;  %v2205_v48 = vrot.slane %v2152_v8, 1  ;;  %v5403_v18 = vld [vmem:[#allocation25_spill] sm:$0xff] }
 0x198   : > { %v2128_v45 = vadd.f32 %v2112_v27, %v2092_v10  ;;  %v2275_v47 = vmul.f32 %v3947_v62, %v1780_v58  ;;  %v1468_v42 = vmul.f32 %v3444_v49, %v4427_v29  ;;  %3447 = vpow2.f32 %v4531_v1 }
 0x199   : > { %v2202_v44 = vrot.slane %v2150_v61, 1  ;;  %v2093_v7 = vadd.f32 %v2046_v54, %v1968_v32  ;;  %v2203_v19 = vrot.slane %v2151_v11, 1  ;;  %v4611_v34 = vmul.f32 %v4475_v30, %v1469_v43 }
 0x19a   : > { %v2329_v50 = vrot.slane %v2276_v16, 2  ;;  %v2326_v28 = vrot.slane %v2274_v22, 2  ;;  %v2327_v5 = vrot.slane %v2275_v47, 2  ;;  %v4614_v2 = vmul.f32 %v4374_v52, %v1468_v42 }
 0x19b   : > { %v2129_v39 = vadd.f32 %v2113_v25, %v2093_v7  ;;  %v2204_v6 = vsel %vm1906_vm9, %v2202_v44, %v2203_v19  ;;  %v2206_v56 = vsel %vm1906_vm9, %v2203_v19, %v2205_v48  ;;  %v1292_v29 = vadd.f32 1.0, %v3440_v35  ;;  %v5408_v44 = vld [vmem:[#allocation15_spill] sm:$0xff] }
 0x19c   : > { %v2252_v53 = vadd.f32 %v2204_v6, %v2128_v45  ;;  %v2328_v1 = vsel %vm2031_vm10, %v2326_v28, %v2327_v5  ;;  %v2330_v55 = vsel %vm2031_vm10, %v2327_v5, %v2329_v50  ;;  %v2218_v30 = vrot.slane %v4557_v59, 1  ;;  %v5410_v19 = vld [vmem:[#allocation63_spill] sm:$0xff] }
 0x19d   : > { %v2253_v43 = vadd.f32 %v2206_v56, %v2129_v39  ;;  %v4623_v46 = vmul.f32 %v4077_v23, %v4614_v2  ;;  %v2448_v52 = vmul.f32 %v4077_v23, %v4611_v34  ;;  %v1290_v60 = vadd.f32 1.0, %v3446_v36  ;;  %v5412_v5 = vld [vmem:[#allocation43_spill] sm:$0xff]  ;;  %v5413_v39 = vld [vmem:[#allocation64_spill] sm:$0xff] }
 0x19e   : > { %v4627_v8 = vadd.f32 %v2328_v1, %v2252_v53  ;;  %v4631_v35 = vmul.f32 %v4060_v12, %v4614_v2  ;;  %v2572_v27 = vmul.f32 %v4060_v12, %v4611_v34  ;;  %v2342_v61 = vrot.slane %v2284_v9, 2  ;;  %v5416_v53 = vld [vmem:[#allocation24_spill] sm:$0xff]  ;;  %v5417_v1 = vld [vmem:[#allocation50_spill] sm:$0xff] }
 0x19f   : > { %v4635_v59 = vadd.f32 %v2330_v55, %v2253_v43  ;;  %v5255_v49 = vrot.slane %v4623_v46, 1  ;;  %v2509_v10 = vrot.slane %v2448_v52, 1  ;;  %3449 = vrcp.f32 %v1292_v29 }
 0x1a0   : > { %v5254_v26 = vrot.slane %v4631_v35, 2  ;;  %v2633_v58 = vrot.slane %v2572_v27, 2  ;;  %v2402_v15 = vmul.f32 %v5325_v40, %v4307_v38  ;;  %v2403_v21 = vmul.f32 %v5325_v40, %v5403_v18 }
 0x1a1   : > { %v4646_v54 = vsel %vm1906_vm9, %v5255_v49, %v2509_v10  ;;  %3451 = vrcp.f32 %v1290_v60  ;;  %v2135_v16 = vadd.f32 %v4554_v24, %v2099_v17  ;;  %v5404_v22 = vrot.slane %v4493_v13, 1  ;;  %v5419_v60 = vld [vmem:[#allocation8_spill] sm:$0xff] }
 0x1a2   : > { %v3448_v45 = vpop.eup %3447  ;;  %v4654_v32 = vmul.f32 %v4077_v23, %v4593_v14  ;;  %v4659_v25 = vsel %vm2031_vm10, %v5254_v26, %v2633_v58  ;;  %v5405_v11 = vrot.slane %v4499_v37, 1  ;;  %v5406_v13 = vrot.slane %v4496_v57, 2  ;;  %v5415_v57 = vld [vmem:[#allocation49_spill] sm:$0xff] }
 0x1a3   : > { %v2219_v9 = vsel %vm1906_vm9, %v5404_v22, %v2218_v30  ;;  %v5407_v47 = vrot.slane %v4502_v51, 2  ;;  %v5409_v7 = vrot.slane %v5408_v44, 2  ;;  %v5411_v50 = vrot.slane %v5410_v19, 2 }
 0x1a4   : > { %v2221_v36 = vsel %vm1906_vm9, %v2218_v30, %v5405_v11  ;;  %v2258_v24 = vadd.f32 %v2219_v9, %v4519_v63  ;;  %v2343_v48 = vsel %vm2031_vm10, %v5406_v13, %v2342_v61  ;;  %v1029_v6 = vmul.f32 %v5413_v39, %v5412_v5  ;;  %v5414_v63 = vld [vmem:[#allocation44_spill] sm:$0xff]  ;;  %v5421_v13 = vld [vmem:[#allocation21_spill] sm:$0xff] }
 0x1a5   : > { %v2259_v17 = vadd.f32 %v2221_v36, %v2135_v16  ;;  %v2345_v42 = vsel %vm2031_vm10, %v2342_v61, %v5407_v47  ;;  %v2627_v28 = vsel %vm2031_vm10, %v5411_v50, %v5409_v7  ;;  %v1056_v56 = vmul.f32 %v5413_v39, %v5414_v63  ;;  %v5418_v30 = vld [vmem:[#allocation52_spill] sm:$0xff]  ;;  %v5424_v7 = vld [vmem:[#allocation37_spill] sm:$0xff] }
 0x1a6   : > { %v2382_v37 = vadd.f32 %v2343_v48, %v2258_v24  ;;  %v1033_v29 = vmul.f32 %v5413_v39, %v5415_v57  ;;  %3453 = vrcp.f32 %v5416_v53  ;;  %v1060_v55 = vmul.f32 %v5413_v39, %v5417_v1  ;;  %v5427_v57 = vld [vmem:[#allocation55_spill] sm:$0xff]  ;;  %v5428_v53 = vld [vmem:[#allocation5_spill] sm:$0xff] }
 0x1a7   : > { %v2383_v51 = vadd.f32 %v2345_v42, %v2259_v17  ;;  %v1031_v43 = vmul.f32 %v5413_v39, %v5418_v30  ;;  %v4688_v27 = vadd.f32 %v5419_v60, %v1029_v6  ;;  %v4691_v61 = vadd.f32 %v5419_v60, %v1056_v56  ;;  %v5426_v6 = vld [vmem:[#allocation10_spill] sm:$0xff] }
 0x1a8   : > { %v2418_v52 = vadd.f32 %v2402_v15, %v2382_v37  ;;  %v4694_v10 = vadd.f32 %v5419_v60, %v1033_v29  ;;  %v4699_v16 = vmul.f32 %v4060_v12, %v4593_v14  ;;  %v1319_v15 = vadd.f32 1.0, %v4587_v41 }
 0x1a9   : > { %5420 = vst [vmem:[#allocation23_spill] sm:$0xff] %v4691_v61  ;;  %v2419_v22 = vadd.f32 %v2403_v21, %v2383_v51  ;;  %v4702_v9 = vadd.f32 %v5419_v60, %v1031_v43  ;;  %v3010_v36 = vmul.f32 -1.442695, %v4688_v27  ;;  %v3450_v17 = vpop.eup %3449  ;;  %v3037_v47 = vmul.f32 -1.442695, %v4691_v61  ;;  %v5423_v21 = vld [vmem:[#allocation53_spill] sm:$0xff] }
 0x1aa   : > { %v2542_v11 = vadd.f32 %v4546_v31, %v2418_v52  ;;  %v3014_v24 = vmul.f32 -1.442695, %v4694_v10  ;;  %v4711_v42 = vadd.f32 %v5419_v60, %v1060_v55  ;;  %v1058_v44 = vmul.f32 %v5413_v39, %v5423_v21  ;;  %v5425_v31 = vld [vmem:[#allocation54_spill] sm:$0xff]  ;;  %v5432_v52 = vld [vmem:[#allocation28_spill] sm:$0xff] }
 0x1ab   : > { %v2543_v48 = vadd.f32 %v5421_v13, %v2419_v22  ;;  %v1445_v19 = vmul.f32 %v3450_v17, %v5424_v7  ;;  %3455 = vpow2.f32 %v3010_v36  ;;  %v1032_v50 = vmul.f32 %v5413_v39, %v5425_v31  ;;  %v3452_v37 = vpop.eup %3451  ;;  %v5433_v22 = vld [vmem:[#allocation36_spill] sm:$0xff]  ;;  %v1710_v31 = vpop.permute.xlu0 %1709 }
 0x1ac   : > { %5422 = vst [vmem:[#allocation27_spill] sm:$0xff] %v4711_v42  ;;  %v2666_v41 = vadd.f32 %v2627_v28, %v2542_v11  ;;  %v1317_v5 = vadd.f32 1.0, %v3448_v45  ;;  %v3012_v56 = vmul.f32 -1.442695, %v4702_v9  ;;  %v1059_v29 = vmul.f32 %v5413_v39, %v5427_v57 }
 0x1ad   : > { %v2667_v63 = vadd.f32 %v5426_v6, %v2543_v48  ;;  %v1784_v51 = vmul.f32 %v5428_v53, %v1445_v19  ;;  %v1443_v1 = vmul.f32 %v3452_v37, %v4506_v3  ;;  %3457 = vpow2.f32 %v3014_v24  ;;  %v5435_v48 = vld [vmem:[#allocation22_spill] sm:$0xff] }
 0x1ae   : > { %2682 = vst [vmem:[#allocation2 + $0x50] sm:$0xff] %v2666_v41  ;;  %v4725_v28 = vadd.f32 %v5419_v60, %v1032_v50  ;;  %v4729_v55 = vmul.f32 %v3928_v4, %v4611_v34  ;;  %3459 = vrcp.f32 %v1319_v15  ;;  %v3041_v45 = vmul.f32 -1.442695, %v4711_v42  ;;  %v5434_v15 = vld [vmem:[#allocation4_spill] sm:$0xff] }
 0x1af   : > { %2683 = vst [vmem:[#allocation2 + $0x58] sm:$0xff] %v2667_v63  ;;  %v4733_v30 = vadd.f32 %v5419_v60, %v1058_v44  ;;  %3461 = vpow2.f32 %v3037_v47  ;;  %v4737_v3 = vadd.f32 %v5419_v60, %v1059_v29  ;;  %v1464_v11 = vmul.f32 %v5433_v22, %v5432_v52 }
 0x1b0   : > { %5429 = vst [vmem:[#allocation39_spill] sm:$0xff] %v4729_v55  ;;  %v4741_v36 = vpop.eup %3453  ;;  %v4744_v24 = vmul.f32 %v3928_v4, %v1784_v51  ;;  %v1782_v17 = vmul.f32 %v5434_v15, %v1443_v1  ;;  %3463 = vpow2.f32 %v3012_v56  ;;  %v3013_v13 = vmul.f32 -1.442695, %v4725_v28 }
 0x1b1   : > { %5430 = vst [vmem:[#allocation40_spill] sm:$0xff] %v4733_v30  ;;  %5431 = vst [vmem:[#allocation41_spill] sm:$0xff] %v4737_v3  ;;  %v4750_v21 = vmul.f32 %v5435_v48, %v4611_v34  ;;  %v4753_v47 = vmul.f32 %v5435_v48, %v1784_v51  ;;  %v4756_v44 = vmul.f32 %v4077_v23, %v1784_v51  ;;  %3465 = vrcp.f32 %v1317_v5  ;;  %v5446_v5 = vld [vmem:[#allocation34_spill] sm:$0xff] }
 0x1b2   : > { %v2396_v19 = vmul.f32 %v5325_v40, %v1782_v17  ;;  %3467 = vpow2.f32 %v3041_v45  ;;  %v3039_v41 = vmul.f32 -1.442695, %v4733_v30  ;;  %v4762_v50 = vmul.f32 %v4060_v12, %v1784_v51  ;;  %v5440_v30 = vld [vmem:[#allocation59_spill] sm:$0xff] }
 0x1b3   : > { %5436 = vst [vmem:[#allocation42_spill] sm:$0xff] %v4750_v21  ;;  %v1803_v34 = vmul.f32 %v1710_v31, %v1464_v11  ;;  %v1834_v37 = vmul.f32 %v3912_v0, %v4307_v38  ;;  %v1876_v6 = vmul.f32 %v3928_v4, %v4307_v38  ;;  %3469 = vpow2.f32 %v3013_v13 }
 0x1b4   : > { %v4770_v63 = vadd.f32 %v2396_v19, %v4627_v8  ;;  %v3040_v56 = vmul.f32 -1.442695, %v4737_v3  ;;  %v4776_v51 = vmul.f32 %v4077_v23, %v1782_v17  ;;  %v4780_v1 = vmul.f32 %v3928_v4, %v5403_v18  ;;  %v1718_v3 = vpop.permute.xlu0 %1717 }
 0x1b5   : > { %v3456_v57 = vpop.eup %3455  ;;  %v4783_v45 = vmul.f32 %v4060_v12, %v1782_v17  ;;  %v4786_v52 = vmul.f32 %v3928_v4, %v1782_v17  ;;  %v2001_v22 = vmul.f32 %v5435_v48, %v4307_v38  ;;  %3471 = vpow2.f32 %v3039_v41 }
 0x1b6   : > { %v1291_v8 = vadd.f32 1.0, %v3456_v57  ;;  %v1937_v15 = vrot.slane %v1876_v6, 1  ;;  %v1938_v13 = vrot.slane %v4780_v1, 1  ;;  %v2002_v19 = vmul.f32 %v5435_v48, %v5403_v18 }
 0x1b7   : > { %v3458_v11 = vpop.eup %3457  ;;  %v4797_v43 = vmul.f32 %v3912_v0, %v1782_v17  ;;  %v4800_v38 = vmul.f32 %v5435_v48, %v1782_v17  ;;  %v2062_v6 = vrot.slane %v2001_v22, 2  ;;  %v2120_v7 = vmul.f32 %v5349_v20, %v1803_v34 }
 0x1b8   : > { %v4793_v31 = vpop.eup %3459  ;;  %3473 = vrcp.f32 %v1291_v8  ;;  %v1295_v57 = vadd.f32 1.0, %v3458_v11  ;;  %v1939_v41 = vsel %vm1906_vm9, %v1937_v15, %v1938_v13  ;;  %v2063_v1 = vrot.slane %v2002_v19, 2  ;;  %v5441_v11 = vld [vmem:[#allocation60_spill] sm:$0xff] }
 0x1b9   : > { %5437 = vst [vmem:[#allocation46_spill] sm:$0xff] %v4793_v31  ;;  %v3462_v26 = vpop.eup %3461  ;;  %v1975_v53 = vadd.f32 %v1939_v41, %v1834_v37  ;;  %v4811_v42 = vmul.f32 %v3978_v33, %v1803_v34  ;;  %v5439_v37 = vld [vmem:[#allocation35_spill] sm:$0xff]  ;;  %v1034_v49 = vmul.f32 %v5413_v39, %v5441_v11  ;;  %v5442_v31 = vld [vmem:[#allocation33_spill] sm:$0xff]  ;;  %v5447_v21 = vrot.slane %v5446_v5, 2 }
 0x1ba   : > { %v3464_v29 = vpop.eup %3463  ;;  %3475 = vrcp.f32 %v1295_v57  ;;  %v2064_v17 = vsel %vm2031_vm10, %v2062_v6, %v2063_v1  ;;  %v1318_v22 = vadd.f32 1.0, %v3462_v26  ;;  %v5438_v57 = vld [vmem:[#allocation61_spill] sm:$0xff]  ;;  %v4823_v26 = vmul.f32 %v3947_v62, %v1803_v34 }
 0x1bb   : > { %v4805_v8 = vpop.eup %3465  ;;  %v1293_v58 = vadd.f32 1.0, %v3464_v29  ;;  %v2100_v19 = vadd.f32 %v2064_v17, %v1975_v53  ;;  %v1466_v41 = vmul.f32 %v5439_v37, %v5438_v57  ;;  %v1036_v29 = vmul.f32 %v5413_v39, %v5440_v30  ;;  %v1714_v17 = vpop.permute.xlu1 %1713 }
 0x1bc   : > { %v3468_v15 = vpop.eup %3467  ;;  %v1465_v57 = vmul.f32 %v4741_v36, %v5442_v31  ;;  %v4831_v30 = vadd.f32 %v5419_v60, %v1034_v49  ;;  %v2066_v55 = vsel %vm2031_vm10, %v2063_v1, %v5447_v21  ;;  %v4869_v1 = vmul.f32 %v5325_v40, %v4593_v14 }
 0x1bd   : > { %3477 = vrcp.f32 %v1293_v58  ;;  %v3470_v6 = vpop.eup %3469  ;;  %v4820_v61 = vadd.f32 %v2120_v7, %v2100_v19  ;;  %v1805_v53 = vmul.f32 %v1718_v3, %v1466_v41  ;;  %v4828_v37 = vadd.f32 %v5419_v60, %v1036_v29 }
 0x1be   : > { %v1294_v58 = vadd.f32 1.0, %v3470_v6  ;;  %3479 = vpow2.f32 %v3040_v56  ;;  %5443 = vst [vmem:[#allocation56_spill] sm:$0xff] %v4831_v30  ;;  %v4833_v11 = vadd.f32 1.0, %v3468_v15  ;;  %v1835_v3 = vmul.f32 %v3912_v0, %v5403_v18 }
 0x1bf   : > { %3481 = vrcp.f32 %v1318_v22  ;;  %v3472_v34 = vpop.eup %3471  ;;  %v4839_v19 = vmul.f32 %v3978_v33, %v1805_v53  ;;  %v3017_v36 = vmul.f32 -1.442695, %v4828_v37  ;;  %v3015_v56 = vmul.f32 -1.442695, %v4831_v30  ;;  %v5444_v22 = vld [vmem:[#allocation7_spill] sm:$0xff] }
 0x1c0   : > { %v1804_v31 = vmul.f32 %v1714_v17, %v1465_v57  ;;  %3483 = vrcp.f32 %v1294_v58  ;;  %v4845_v15 = vmul.f32 %v3947_v62, %v1805_v53  ;;  %v5445_v29 = vrot.slane %v5444_v22, 1  ;;  %v5448_v22 = vld [vmem:[#allocation12_spill] sm:$0xff] }
 0x1c1   : > { %3485 = vpow2.f32 %v3017_v36  ;;  %v4854_v57 = vadd.f32 1.0, %v3472_v34  ;;  %v5449_v34 = vrot.slane %v4623_v46, 1 }
 0x1c2   : > { %v3474_v41 = vpop.eup %3473  ;;  %v1941_v18 = vsel %vm1906_vm9, %v1938_v13, %v5445_v29  ;;  %3487 = vpow2.f32 %v3015_v56  ;;  %v4857_v58 = vmul.f32 %v3978_v33, %v1804_v31  ;;  %v4860_v53 = vmul.f32 %v3947_v62, %v1804_v31 }
 0x1c3   : > { %v1444_v6 = vmul.f32 %v3474_v41, %v4688_v27  ;;  %v1976_v7 = vadd.f32 %v1941_v18, %v1835_v3  ;;  %v2225_v3 = vrot.slane %v4839_v19, 1  ;;  %v2121_v21 = vmul.f32 %v5349_v20, %v1804_v31  ;;  %v5451_v31 = vld [vmem:[#allocation18_spill] sm:$0xff] }
 0x1c4   : > { %v3476_v17 = vpop.eup %3475  ;;  %v5450_v56 = vrot.slane %v4654_v32, 1  ;;  %v2223_v19 = vrot.slane %v4857_v58, 1  ;;  %v2347_v32 = vrot.slane %v4860_v53, 2 }
 0x1c5   : > { %v1783_v13 = vmul.f32 %v5448_v22, %v1444_v6  ;;  %v1448_v27 = vmul.f32 %v3476_v17, %v4694_v10  ;;  %v2101_v36 = vadd.f32 %v2066_v55, %v1976_v7 }
 0x1c6   : > { %v4876_v41 = vsel %vm1906_vm9, %v5450_v56, %v5449_v34 }
 0x1c7   : > { %v3478_v29 = vpop.eup %3477  ;;  %v2397_v10 = vmul.f32 %v5325_v40, %v1783_v13  ;;  %v2435_v55 = vmul.f32 %v4077_v23, %v1783_v13  ;;  %v2559_v7 = vmul.f32 %v4060_v12, %v1783_v13  ;;  %v1787_v18 = vmul.f32 %v5451_v31, %v1448_v27  ;;  %v5453_v31 = vld [vmem:[#allocation16_spill] sm:$0xff] }
 0x1c8   : > { %v1446_v6 = vmul.f32 %v3478_v29, %v4702_v9  ;;  %v1868_v46 = vmul.f32 %v3928_v4, %v1783_v13  ;;  %v4886_v17 = vpop.eup %3479  ;;  %v1993_v5 = vmul.f32 %v5435_v48, %v1783_v13  ;;  %v5454_v12 = vrot.slane %v4776_v51, 1 }
 0x1c9   : > { %v2413_v22 = vadd.f32 %v2397_v10, %v4635_v59  ;;  %v2487_v34 = vrot.slane %v2435_v55, 1  ;;  %v2611_v56 = vrot.slane %v2559_v7, 2  ;;  %v4890_v49 = vpop.eup %3481  ;;  %v2155_v58 = vmul.f32 %v3978_v33, %v1787_v18 }
 0x1ca   : > { %5452 = vst [vmem:[#allocation3_spill] sm:$0xff] %v4890_v49  ;;  %v2279_v27 = vmul.f32 %v3947_v62, %v1787_v18  ;;  %v1785_v9 = vmul.f32 %v5453_v31, %v1446_v6  ;;  %v1923_v29 = vrot.slane %v1868_v46, 1  ;;  %v5455_v23 = vrot.slane %v4756_v44, 1  ;;  %v3484_v18 = vpop.eup %3483 }
 0x1cb   : > { %v2488_v53 = vsel %vm1906_vm9, %v5454_v12, %v2487_v34  ;;  %v5456_v10 = vrot.slane %v4783_v45, 2  ;;  %v5457_v7 = vrot.slane %v4762_v50, 2  ;;  %v2210_v31 = vrot.slane %v2155_v58, 1  ;;  %v3486_v51 = vpop.eup %3485 }
 0x1cc   : > { %v2490_v59 = vsel %vm1906_vm9, %v2487_v34, %v5455_v23  ;;  %v2536_v6 = vadd.f32 %v2488_v53, %v4770_v63  ;;  %v2405_v12 = vmul.f32 %v5325_v40, %v4614_v2  ;;  %v2334_v44 = vrot.slane %v2279_v27, 2  ;;  %v3488_v50 = vpop.eup %3487 }
 0x1cd   : > { %v2612_v55 = vsel %vm2031_vm10, %v5456_v10, %v2611_v56  ;;  %v2614_v49 = vsel %vm2031_vm10, %v2611_v56, %v5457_v7  ;;  %v2537_v46 = vadd.f32 %v2490_v59, %v2413_v22  ;;  %v5458_v23 = vrot.slane %v4786_v52, 1 }
 0x1ce   : > { %v2048_v34 = vrot.slane %v1993_v5, 2  ;;  %v2153_v10 = vmul.f32 %v3978_v33, %v1785_v9  ;;  %v2660_v30 = vadd.f32 %v2612_v55, %v2536_v6  ;;  %v2114_v63 = vmul.f32 %v5349_v20, %v1785_v9  ;;  %v5462_v6 = vld [vmem:[#allocation47_spill] sm:$0xff] }
 0x1cf   : > { %v1924_v45 = vsel %vm1906_vm9, %v5458_v23, %v1923_v29  ;;  %v2661_v56 = vadd.f32 %v2614_v49, %v2537_v46  ;;  %v5459_v22 = vrot.slane %v4800_v38, 2  ;;  %v2277_v27 = vmul.f32 %v3947_v62, %v1785_v9 }
 0x1d0   : > { %v1969_v7 = vadd.f32 %v1924_v45, %v4797_v43  ;;  %v1447_v52 = vmul.f32 %v3484_v18, %v4725_v28  ;;  %v1829_v53 = vmul.f32 %v3912_v0, %v1783_v13  ;;  %2676 = vst [vmem:[#allocation2 + $0x20] sm:$0xff] %v2660_v30  ;;  %v2207_v59 = vrot.slane %v2153_v10, 1 }
 0x1d1   : > { %v2049_v58 = vsel %vm2031_vm10, %v5459_v22, %v2048_v34  ;;  %2677 = vst [vmem:[#allocation2 + $0x28] sm:$0xff] %v2661_v56  ;;  %v5460_v49 = vrot.slane %v4744_v24, 1  ;;  %v5461_v55 = vrot.slane %v4753_v47, 2  ;;  %v1298_v9 = vadd.f32 1.0, %v3486_v51 }
 0x1d2   : > { %v2094_v5 = vadd.f32 %v2049_v58, %v1969_v7  ;;  %v1786_v46 = vmul.f32 %v5462_v6, %v1447_v52  ;;  %v1296_v45 = vadd.f32 1.0, %v3488_v50  ;;  %v2137_v18 = vadd.f32 %v2121_v21, %v2101_v36 }
 0x1d3   : > { %v1926_v43 = vsel %vm1906_vm9, %v1923_v29, %v5460_v49  ;;  %v2051_v38 = vsel %vm2031_vm10, %v2048_v34, %v5461_v55  ;;  %v5463_v30 = vrot.slane %v4811_v42, 1  ;;  %v2226_v10 = vsel %vm1906_vm9, %v2223_v19, %v2225_v3 }
 0x1d4   : > { %v1970_v23 = vadd.f32 %v1926_v43, %v1829_v53  ;;  %v2130_v28 = vadd.f32 %v2114_v63, %v2094_v5  ;;  %v2115_v29 = vmul.f32 %v5349_v20, %v1786_v46  ;;  %v2154_v47 = vmul.f32 %v3978_v33, %v1786_v46 }
 0x1d5   : > { %v2224_v13 = vsel %vm1906_vm9, %v5463_v30, %v2223_v19  ;;  %v2278_v34 = vmul.f32 %v3947_v62, %v1786_v46  ;;  %v2331_v56 = vrot.slane %v2277_v27, 2  ;;  %3489 = vrcp.f32 %v1298_v9  ;;  %v1740_v46 = vpop.permute.xlu1 %1739 }
 0x1d6   : > { %v2095_v24 = vadd.f32 %v2051_v38, %v1970_v23  ;;  %v2260_v51 = vadd.f32 %v2224_v13, %v4820_v61  ;;  %v2261_v50 = vadd.f32 %v2226_v10, %v2137_v18  ;;  %v2208_v36 = vrot.slane %v2154_v47, 1  ;;  %v5468_v61 = vld [vmem:[#allocation29_spill] sm:$0xff] }
 0x1d7   : > { %v2332_v21 = vrot.slane %v2278_v34, 2  ;;  %3491 = vrcp.f32 %v1296_v45  ;;  %v5464_v42 = vrot.slane %v4823_v26, 2  ;;  %v5465_v19 = vrot.slane %v4845_v15, 2  ;;  %v1744_v34 = vpop.permute.xlu0 %1743 }
 0x1d8   : > { %v2131_v7 = vadd.f32 %v2115_v29, %v2095_v24  ;;  %v5466_v22 = vrot.slane %v4631_v35, 2  ;;  %v5467_v58 = vrot.slane %v4699_v16, 2  ;;  %v1035_v52 = vmul.f32 %v5413_v39, %v5468_v61  ;;  %v5469_v39 = vld [vmem:[#allocation62_spill] sm:$0xff]  ;;  %v5476_v61 = vld [vmem:[#allocation17_spill] sm:$0xff] }
 0x1d9   : > { %v2348_v3 = vsel %vm2031_vm10, %v5464_v42, %v2347_v32  ;;  %v2350_v63 = vsel %vm2031_vm10, %v2347_v32, %v5465_v19  ;;  %v2209_v53 = vsel %vm1906_vm9, %v2207_v59, %v2208_v36  ;;  %v2211_v5 = vsel %vm1906_vm9, %v2208_v36, %v2210_v31  ;;  %v5472_v36 = vld [vmem:[#allocation48_spill] sm:$0xff] }
 0x1da   : > { %v2632_v27 = vsel %vm2031_vm10, %v5467_v58, %v5466_v22  ;;  %v2333_v26 = vsel %vm2031_vm10, %v2331_v56, %v2332_v21  ;;  %v2335_v49 = vsel %vm2031_vm10, %v2332_v21, %v2334_v44  ;;  %3493 = vrcp.f32 %v4833_v11  ;;  %v5473_v42 = vld [vmem:[#allocation32_spill] sm:$0xff]  ;;  %v5475_v58 = vld [vmem:[#allocation57_spill] sm:$0xff] }
 0x1db   : > { %v2254_v15 = vadd.f32 %v2209_v53, %v2130_v28  ;;  %v2255_v32 = vadd.f32 %v2211_v5, %v2131_v7  ;;  %v2384_v35 = vadd.f32 %v2348_v3, %v2260_v51  ;;  %3495 = vrcp.f32 %v4854_v57  ;;  %v5474_v3 = vld [vmem:[#allocation20_spill] sm:$0xff]  ;;  %v5477_v5 = vld [vmem:[#allocation39_spill] sm:$0xff] }
 0x1dc   : > { %v2385_v16 = vadd.f32 %v2350_v63, %v2261_v50  ;;  %v4957_v43 = vadd.f32 %v5419_v60, %v1035_v52  ;;  %v1470_v59 = vmul.f32 %v4805_v8, %v5469_v39  ;;  %v1879_v11 = vmul.f32 %v3928_v4, %v4593_v14 }
 0x1dd   : > { %v2378_v55 = vadd.f32 %v2333_v26, %v2254_v15  ;;  %v4961_v31 = vadd.f32 %v2335_v49, %v2255_v32  ;;  %v2420_v38 = vadd.f32 %v4869_v1, %v2384_v35  ;;  %v1321_v44 = vadd.f32 1.0, %v4886_v17  ;;  %v5479_v32 = vld [vmem:[#allocation42_spill] sm:$0xff] }
 0x1de   : > { %v2421_v6 = vadd.f32 %v2405_v12, %v2385_v16  ;;  %v3016_v57 = vmul.f32 -1.442695, %v4957_v43  ;;  %v1880_v60 = vmul.f32 %v3928_v4, %v4614_v2  ;;  %v1809_v8 = vmul.f32 %v1740_v46, %v1470_v59  ;;  %v5010_v16 = vld [vmem:[%s5212_s5] ss:$0 sm:$0xff]  ;;  %v5480_v59 = vld [vmem:[#allocation38_spill] sm:$0xff] }
 0x1df   : > { %v2544_v23 = vadd.f32 %v4876_v41, %v2420_v38  ;;  %v2004_v9 = vmul.f32 %v5435_v48, %v4593_v14  ;;  %v2005_v1 = vmul.f32 %v5435_v48, %v4614_v2  ;;  %v1942_v17 = vrot.slane %v1879_v11, 1  ;;  %v3490_v28 = vpop.eup %3489  ;;  %v5481_v38 = vld [vmem:[#allocation46_spill] sm:$0xff] }
 0x1e0   : > { %v2545_v45 = vadd.f32 %v4646_v54, %v2421_v6  ;;  %3497 = vpow2.f32 %v3016_v57  ;;  %v1943_v12 = vrot.slane %v1880_v60, 1  ;;  %v1836_v30 = vmul.f32 %v3912_v0, %v4593_v14  ;;  %v5470_v54 = vld [vmem:[#allocation56_spill] sm:$0xff]  ;;  %v5471_v14 = vld [vmem:[#allocation58_spill] sm:$0xff]  ;;  %v5483_v6 = vld [vmem:[#allocation3_spill] sm:$0xff] }
 0x1e1   : > { %v2668_v18 = vadd.f32 %v2632_v27, %v2544_v23  ;;  %v2067_v13 = vrot.slane %v2004_v9, 2  ;;  %v2068_v10 = vrot.slane %v2005_v1, 2  ;;  %v3492_v41 = vpop.eup %3491  ;;  %3499 = vrcp.f32 %v1321_v44  ;;  %v5482_v44 = vld [vmem:[#allocation23_spill] sm:$0xff]  ;;  %v1748_v1 = vpop.permute.xlu1 %1747 }
 0x1e2   : > { %v1451_v24 = vmul.f32 %v3490_v28, %v4828_v37  ;;  %v2669_v29 = vadd.f32 %v4659_v25, %v2545_v45  ;;  %v1944_v47 = vsel %vm1906_vm9, %v1942_v17, %v1943_v12  ;;  %v1449_v56 = vmul.f32 %v3492_v41, %v5470_v54  ;;  %v2692_v25 = vld [vmem:[#allocation2 + $0x20] ss:$2 sm:$0xff]  ;;  %v5484_v17 = vld [vmem:[#allocation45_spill] sm:$0xff] }
 0x1e3   : > { %2684 = vst [vmem:[#allocation2 + $0x60] sm:$0xff] %v2668_v18  ;;  %v1977_v51 = vadd.f32 %v1944_v47, %v1836_v30  ;;  %v2069_v50 = vsel %vm2031_vm10, %v2067_v13, %v2068_v10  ;;  %v4984_v7 = vmul.f32 %v3978_v33, %v1809_v8  ;;  %v4988_v21 = vmul.f32 %v5472_v36, %v5471_v14  ;;  %v1755_v18 = vpop.permute.xlu0 %1754 }
 0x1e4   : > { %v4992_v37 = vmul.f32 %v5349_v20, %v5473_v42  ;;  %v1790_v19 = vmul.f32 %v5474_v3, %v1451_v24  ;;  %2685 = vst [vmem:[#allocation2 + $0x68] sm:$0xff] %v2669_v29  ;;  %v4996_v63 = vmul.f32 %v3947_v62, %v1809_v8  ;;  %v3494_v22 = vpop.eup %3493  ;;  %v5000_v27 = vmul.f32 %v5472_v36, %v5475_v58 }
 0x1e5   : > { %v1788_v52 = vmul.f32 %v5476_v61, %v1449_v56  ;;  %v2102_v53 = vadd.f32 %v2069_v50, %v1977_v51  ;;  %v5478_v26 = vrot.slane %v5477_v5, 1  ;;  %v3496_v15 = vpop.eup %3495  ;;  %v2070_v35 = vrot.slane %v5479_v32, 2 }
 0x1e6   : > { %v2122_v39 = vmul.f32 %v5349_v20, %v1809_v8  ;;  %v1472_v11 = vmul.f32 %v5481_v38, %v5480_v59  ;;  %v1471_v57 = vmul.f32 %v5483_v6, %v5482_v44  ;;  %v5018_v46 = vmul.f32 %v5010_v16, %v2692_v25  ;;  %v5485_v59 = vld [vmem:[#allocation40_spill] sm:$0xff] }
 0x1e7   : > { %v1946_v49 = vsel %vm1906_vm9, %v1943_v12, %v5478_v26  ;;  %v5021_v60 = vmul.f32 %v3928_v4, %v1790_v19  ;;  %v2398_v23 = vmul.f32 %v5325_v40, %v1788_v52  ;;  %v2227_v9 = vrot.slane %v4984_v7, 1  ;;  %v1763_v32 = vpop.permute.xlu0 %1762 }
 0x1e8   : > { %v5026_v45 = vmul.f32 %v5435_v48, %v1790_v19  ;;  %v5029_v8 = vmul.f32 %v5472_v36, %v1790_v19  ;;  %v5032_v12 = vmul.f32 %v5484_v17, %v1790_v19  ;;  %v2351_v28 = vrot.slane %v4996_v63, 2 }
 0x1e9   : > { %v5036_v30 = vmul.f32 %v3912_v0, %v1788_v52  ;;  %v5039_v13 = vmul.f32 %v3928_v4, %v1788_v52  ;;  %v5041_v41 = vadd.f32 %v2398_v23, %v2378_v55  ;;  %v1837_v24 = vmul.f32 %v3912_v0, %v4614_v2  ;;  %v5487_v23 = vld [vmem:[#allocation41_spill] sm:$0xff] }
 0x1ea   : > { %v3498_v29 = vpop.eup %3497  ;;  %v5046_v47 = vmul.f32 %v5435_v48, %v1788_v52  ;;  %v2138_v54 = vadd.f32 %v2122_v39, %v2102_v53  ;;  %v1811_v56 = vmul.f32 %v1748_v1, %v1472_v11  ;;  %v1810_v51 = vmul.f32 %v1744_v34, %v1471_v57  ;;  %v5486_v11 = vld [vmem:[#allocation27_spill] sm:$0xff] }
 0x1eb   : > { %v1930_v50 = vrot.slane %v5021_v60, 1  ;;  %v1297_v7 = vadd.f32 1.0, %v3498_v29  ;;  %v1978_v42 = vadd.f32 %v1946_v49, %v1837_v24  ;;  %v2071_v25 = vsel %vm2031_vm10, %v2068_v10, %v2070_v35  ;;  %v3500_v3 = vpop.eup %3499 }
 0x1ec   : > { %v2055_v55 = vrot.slane %v5026_v45, 2  ;;  %v2494_v19 = vrot.slane %v5029_v8, 1  ;;  %v2618_v2 = vrot.slane %v5032_v12, 2  ;;  %v2167_v63 = vmul.f32 %v3978_v33, %v1811_v56 }
 0x1ed   : > { %3501 = vrcp.f32 %v1297_v7  ;;  %v2103_v61 = vadd.f32 %v2071_v25, %v1978_v42  ;;  %v2123_v53 = vmul.f32 %v5349_v20, %v1810_v51  ;;  %v2166_v34 = vmul.f32 %v3978_v33, %v1810_v51  ;;  %v2688_v7 = vld [vmem:[#allocation2] ss:$2 sm:$0xff] }
 0x1ee   : > { %v5057_v5 = vmul.f32 %v5472_v36, %v1788_v52  ;;  %v2230_v26 = vrot.slane %v2167_v63, 1  ;;  %v2291_v10 = vmul.f32 %v3947_v62, %v1811_v56  ;;  %v2290_v49 = vmul.f32 %v3947_v62, %v1810_v51  ;;  %v1759_v51 = vpop.permute.xlu1 %1758 }
 0x1ef   : > { %v2139_v35 = vadd.f32 %v2123_v53, %v2103_v61  ;;  %v2228_v39 = vrot.slane %v2166_v34, 1  ;;  %v1473_v38 = vmul.f32 %v3496_v15, %v5485_v59  ;;  %v1475_v44 = vmul.f32 %v3494_v22, %v5486_v11  ;;  %v2700_v53 = vld [vmem:[#allocation2 + $0x60] ss:$2 sm:$0xff] }
 0x1f0   : > { %v1927_v6 = vrot.slane %v5039_v13, 1  ;;  %v5065_v57 = vmul.f32 %v5484_v17, %v1788_v52  ;;  %v2352_v33 = vrot.slane %v2290_v49, 2  ;;  %v1474_v1 = vmul.f32 %v3500_v3, %v5487_v23 }
 0x1f1   : > { %v2229_v24 = vsel %vm1906_vm9, %v2227_v9, %v2228_v39  ;;  %v2231_v29 = vsel %vm1906_vm9, %v2228_v39, %v2230_v26  ;;  %v1812_v62 = vmul.f32 %v1755_v18, %v1473_v38  ;;  %v1814_v56 = vmul.f32 %v1763_v32, %v1475_v44  ;;  %v2690_v9 = vld [vmem:[#allocation2 + $0x10] ss:$2 sm:$0xff]  ;;  %v5083_v32 = vld [vmem:[%s5213_s6] ss:$0 sm:$0xff] }
 0x1f2   : > { %v2354_v42 = vrot.slane %v2291_v10, 2  ;;  %v2263_v15 = vadd.f32 %v2231_v29, %v2139_v35  ;;  %v2262_v25 = vadd.f32 %v2229_v24, %v2138_v54  ;;  %v2353_v22 = vsel %vm2031_vm10, %v2351_v28, %v2352_v33 }
 0x1f3   : > { %v2052_v63 = vrot.slane %v5046_v47, 2  ;;  %v2491_v52 = vrot.slane %v5057_v5, 1  ;;  %v2406_v61 = vmul.f32 %v5325_v40, %v1812_v62  ;;  %v2449_v3 = vmul.f32 %v5472_v36, %v1812_v62 }
 0x1f4   : > { %v2386_v34 = vadd.f32 %v2353_v22, %v2262_v25  ;;  %v2451_v18 = vmul.f32 %v5472_v36, %v1814_v56  ;;  %v1813_v26 = vmul.f32 %v1759_v51, %v1474_v1  ;;  %v2355_v10 = vsel %vm2031_vm10, %v2352_v33, %v2354_v42 }
 0x1f5   : > { %v2573_v54 = vmul.f32 %v5484_v17, %v1812_v62  ;;  %v2575_v28 = vmul.f32 %v5484_v17, %v1814_v56  ;;  %v2387_v49 = vadd.f32 %v2355_v10, %v2263_v15  ;;  %v2710_v47 = vmul.f32 %v5010_v16, %v2688_v7  ;;  %v5488_v15 = vld [vmem:[#allocation11_spill] sm:$0xff] }
 0x1f6   : > { %v2615_v35 = vrot.slane %v5065_v57, 2  ;;  %v2422_v39 = vadd.f32 %v2406_v61, %v2386_v34  ;;  %v2407_v59 = vmul.f32 %v5325_v40, %v1813_v26  ;;  %v2450_v38 = vmul.f32 %v5472_v36, %v1813_v26 }
 0x1f7   : > { %v3502_v11 = vpop.eup %3501  ;;  %v2716_v44 = vmul.f32 %v5010_v16, %v2700_v53  ;;  %v2511_v33 = vrot.slane %v2449_v3, 1  ;;  %v2574_v23 = vmul.f32 %v5484_v17, %v1813_v26  ;;  %v2711_v1 = vmul.f32 %v5010_v16, %v2690_v9 }
 0x1f8   : > { %v1450_v24 = vmul.f32 %v3502_v11, %v4957_v43  ;;  %v2514_v29 = vrot.slane %v2451_v18, 1  ;;  %v2423_v62 = vadd.f32 %v2407_v59, %v2387_v49  ;;  %v2512_v56 = vrot.slane %v2450_v38, 1 }
 0x1f9   : > { %v2635_v51 = vrot.slane %v2573_v54, 2  ;;  %v2638_v57 = vrot.slane %v2575_v28, 2  ;;  %v2636_v7 = vrot.slane %v2574_v23, 2  ;;  %v5093_v42 = vadd.f32 %v5083_v32, %v2710_v47 }
 0x1fa   : > { %v1789_v25 = vmul.f32 %v5488_v15, %v1450_v24  ;;  %v2513_v22 = vsel %vm1906_vm9, %v2511_v33, %v2512_v56  ;;  %v2515_v61 = vsel %vm1906_vm9, %v2512_v56, %v2514_v29  ;;  %v5099_v3 = vadd.f32 %v5083_v32, %v2711_v1 }
 0x1fb   : > { %v2546_v9 = vadd.f32 %v2513_v22, %v2422_v39  ;;  %v2547_v43 = vadd.f32 %v2515_v61, %v2423_v62  ;;  %v2637_v53 = vsel %vm2031_vm10, %v2635_v51, %v2636_v7  ;;  %v2639_v34 = vsel %vm2031_vm10, %v2636_v7, %v2638_v57  ;;  %v5490_v57 = vld [vmem:[#allocation51_spill] sm:$0xff]  ;;  %v5492_v61 = vld [vmem:[#allocation30_spill] sm:$0xff] }
 0x1fc   : > { %v5104_v18 = vadd.f32 %v5083_v32, %v2716_v44  ;;  %v1871_v26 = vmul.f32 %v3928_v4, %v1789_v25  ;;  %v1996_v10 = vmul.f32 %v5435_v48, %v1789_v25  ;;  %v2399_v54 = vmul.f32 %v5325_v40, %v1789_v25 }
 0x1fd   : > { %v2438_v28 = vmul.f32 %v5472_v36, %v1789_v25  ;;  %v2562_v49 = vmul.f32 %v5484_v17, %v1789_v25  ;;  %v2670_v47 = vadd.f32 %v2637_v53, %v2546_v9  ;;  %v3047_v39 = vmul.f32 -1.442695, %v5093_v42 }
 0x1fe   : > { %v1928_v59 = vrot.slane %v1871_v26, 1  ;;  %v2053_v38 = vrot.slane %v1996_v10, 2  ;;  %v2415_v11 = vadd.f32 %v2399_v54, %v4961_v31  ;;  %v2671_v33 = vadd.f32 %v2639_v34, %v2547_v43  ;;  %v2698_v34 = vld [vmem:[#allocation2 + $0x50] ss:$2 sm:$0xff]  ;;  %v5493_v26 = vld [vmem:[#allocation31_spill] sm:$0xff] }
 0x1ff   : > { %v1831_v44 = vmul.f32 %v3912_v0, %v1789_v25  ;;  %v2492_v23 = vrot.slane %v2438_v28, 1  ;;  %v2616_v4 = vrot.slane %v2562_v49, 2  ;;  %2686 = vst [vmem:[#allocation2 + $0x70] sm:$0xff] %v2670_v47  ;;  %v3048_v48 = vmul.f32 -1.442695, %v5099_v3  ;;  %v5491_v25 = vld [vmem:[#allocation6_spill] sm:$0xff] }
 0x200   : > { %v1929_v1 = vsel %vm1906_vm9, %v1927_v6, %v1928_v59  ;;  %v1931_v24 = vsel %vm1906_vm9, %v1928_v59, %v1930_v50  ;;  %v2054_v29 = vsel %vm2031_vm10, %v2052_v63, %v2053_v38  ;;  %v2056_v31 = vsel %vm2031_vm10, %v2053_v38, %v2055_v55  ;;  %2687 = vst [vmem:[#allocation2 + $0x78] sm:$0xff] %v2671_v33  ;;  %v5489_v55 = vld [vmem:[#allocation19_spill] sm:$0xff]  ;;  %v5494_v10 = vld [vmem:[#allocation9_spill] sm:$0xff] }
 0x201   : > { %v1971_v0 = vadd.f32 %v1929_v1, %v5036_v30  ;;  %v1972_v62 = vadd.f32 %v1931_v24, %v1831_v44  ;;  %v2493_v13 = vsel %vm1906_vm9, %v2491_v52, %v2492_v23  ;;  %v2495_v60 = vsel %vm1906_vm9, %v2492_v23, %v2494_v19 }
 0x202   : > { %v2538_v50 = vadd.f32 %v2493_v13, %v5041_v41  ;;  %v2539_v6 = vadd.f32 %v2495_v60, %v2415_v11  ;;  %v2617_v63 = vsel %vm2031_vm10, %v2615_v35, %v2616_v4  ;;  %v2619_v45 = vsel %vm2031_vm10, %v2616_v4, %v2618_v2 }
 0x203   : > { %v2117_v30 = vmul.f32 %v5349_v20, %v5489_v55  ;;  %v2096_v56 = vadd.f32 %v2054_v29, %v1971_v0  ;;  %v2097_v5 = vadd.f32 %v2056_v31, %v1972_v62  ;;  %3503 = vpow2.f32 %v3047_v39 }
 0x204   : > { %v3053_v52 = vmul.f32 -1.442695, %v5104_v18  ;;  %v2662_v8 = vadd.f32 %v2617_v63, %v2538_v50  ;;  %v2663_v51 = vadd.f32 %v2619_v45, %v2539_v6  ;;  %3505 = vpow2.f32 %v3048_v48 }
 0x205   : > { %v2565_v41 = vmul.f32 %v5484_v17, %v5475_v58  ;;  %v2132_v19 = vadd.f32 %v4992_v37, %v2096_v56  ;;  %v2133_v35 = vadd.f32 %v2117_v30, %v2097_v5  ;;  %v5145_v12 = vadd.f32 %v5083_v32, %v5018_v46 }
 0x206   : > { %v2400_v20 = vmul.f32 %v5325_v40, %v5471_v14  ;;  %v2564_v2 = vmul.f32 %v5484_v17, %v5471_v14  ;;  %v2442_v7 = vmul.f32 %v5472_v36, %v5490_v57  ;;  %2678 = vst [vmem:[#allocation2 + $0x30] sm:$0xff] %v2662_v8  ;;  %2679 = vst [vmem:[#allocation2 + $0x38] sm:$0xff] %v2663_v51  ;;  %v2496_v15 = vrot.slane %v4988_v21, 1 }
 0x207   : > { %v2497_v37 = vrot.slane %v5000_v27, 1  ;;  %v2256_v22 = vadd.f32 %v5491_v25, %v2132_v19  ;;  %v2257_v46 = vadd.f32 %v5492_v61, %v2133_v35  ;;  %v2702_v9 = vld [vmem:[#allocation2 + $0x70] ss:$2 sm:$0xff]  ;;  %v2401_v43 = vmul.f32 %v5325_v40, %v5475_v58 }
 0x208   : > { %v2566_v14 = vmul.f32 %v5484_v17, %v5490_v57  ;;  %3507 = vpow2.f32 %v3053_v52  ;;  %v2717_v36 = vmul.f32 %v5010_v16, %v2702_v9  ;;  %v2621_v53 = vrot.slane %v2565_v41, 2 }
 0x209   : > { %v2380_v21 = vadd.f32 %v5493_v26, %v2256_v22  ;;  %v2381_v27 = vadd.f32 %v5494_v10, %v2257_v46  ;;  %v3049_v54 = vmul.f32 -1.442695, %v5145_v12  ;;  %v2499_v28 = vrot.slane %v2442_v7, 1 }
 0x20a   : > { %v5166_v49 = vadd.f32 %v5083_v32, %v2717_v36  ;;  %v2620_v47 = vrot.slane %v2564_v2, 2  ;;  %v2498_v40 = vsel %vm1906_vm9, %v2496_v15, %v2497_v37  ;;  %v2623_v59 = vrot.slane %v2566_v14, 2 }
 0x20b   : > { %v2416_v58 = vadd.f32 %v2400_v20, %v2380_v21  ;;  %v2417_v17 = vadd.f32 %v2401_v43, %v2381_v27  ;;  %v2500_v39 = vsel %vm1906_vm9, %v2497_v37, %v2499_v28  ;;  %v2715_v38 = vmul.f32 %v5010_v16, %v2698_v34 }
 0x20c   : > { %v3054_v11 = vmul.f32 -1.442695, %v5166_v49  ;;  %v2622_v44 = vsel %vm2031_vm10, %v2620_v47, %v2621_v53  ;;  %3509 = vpow2.f32 %v3049_v54  ;;  %v2624_v24 = vsel %vm2031_vm10, %v2621_v53, %v2623_v59 }
 0x20d   : > { %v3504_v33 = vpop.eup %3503  ;;  %v2540_v23 = vadd.f32 %v2498_v40, %v2416_v58  ;;  %v2541_v4 = vadd.f32 %v2500_v39, %v2417_v17  ;;  %v2694_v48 = vld [vmem:[#allocation2 + $0x30] ss:$2 sm:$0xff]  ;;  %v2730_v60 = vadd.f32 %v5083_v32, %v2715_v38 }
 0x20e   : > { %v3506_v1 = vpop.eup %3505  ;;  %v2713_v29 = vmul.f32 %v5010_v16, %v2694_v48  ;;  %3511 = vpow2.f32 %v3054_v11  ;;  %v2757_v31 = vadd.f32 1.0, %v3504_v33 }
 0x20f   : > { %v2664_v0 = vadd.f32 %v2622_v44, %v2540_v23  ;;  %v2665_v62 = vadd.f32 %v2624_v24, %v2541_v4  ;;  %v2758_v13 = vadd.f32 1.0, %v3506_v1  ;;  %v3052_v45 = vmul.f32 -1.442695, %v2730_v60 }
 0x210   : > { %v2728_v50 = vadd.f32 %v5083_v32, %v2713_v29  ;;  %3513 = vrcp.f32 %v2757_v31 }
 0x211   : > { %2680 = vst [vmem:[#allocation2 + $0x40] sm:$0xff] %v2664_v0  ;;  %2681 = vst [vmem:[#allocation2 + $0x48] sm:$0xff] %v2665_v62  ;;  %3515 = vrcp.f32 %v2758_v13 }
 0x212   : > { %v3508_v6 = vpop.eup %3507  ;;  %v3050_v63 = vmul.f32 -1.442695, %v2728_v50 }
 0x213   : > { %v2763_v55 = vadd.f32 1.0, %v3508_v6 }
 0x214   : > { %3517 = vpow2.f32 %v3050_v63 }
 0x215   : > { %3519 = vpow2.f32 %v3052_v45 }
 0x216   : > { %v3510_v30 = vpop.eup %3509  ;;  %3521 = vrcp.f32 %v2763_v55 }
 0x217   : > { %v2759_v41 = vadd.f32 1.0, %v3510_v30 }
 0x218   : > { %v3512_v56 = vpop.eup %3511  ;;  %v2696_v5 = vld [vmem:[#allocation2 + $0x40] ss:$2 sm:$0xff] }
 0x219   : > { %v2714_v52 = vmul.f32 %v5010_v16, %v2696_v5  ;;  %v2764_v8 = vadd.f32 1.0, %v3512_v56 }
 0x21a   : > { %v3514_v51 = vpop.eup %3513 }
 0x21b   : > { %v3516_v19 = vpop.eup %3515  ;;  %v2729_v35 = vadd.f32 %v5083_v32, %v2714_v52  ;;  %3523 = vrcp.f32 %v2764_v8  ;;  %v2781_v20 = vmul.f32 %v3514_v51, %v5093_v42 }
 0x21c   : > { %v2782_v2 = vmul.f32 %v3516_v19, %v5099_v3  ;;  %3525 = vrcp.f32 %v2759_v41 }
 0x21d   : > { %v3051_v57 = vmul.f32 -1.442695, %v2729_v35 }
 0x21e   : > { %v3518_v16 = vpop.eup %3517  ;;  %v3061_v7 = vpack.c.bf16 %v2782_v2, %v2781_v20  ;;  %v2805_v26 = vadd.f32 %v2782_v2, %v2781_v20 }
 0x21f   : > { %3527 = vpow2.f32 %v3051_v57  ;;  %v2760_v15 = vadd.f32 1.0, %v3518_v16  ;;  %v3520_v32 = vpop.eup %3519 }
 0x220   : > { %3062 = vst [vmem:[%s5185_s14] sm:$0xff] %v3061_v7   ;;  %v3522_v37 = vpop.eup %3521  ;;  %v2762_v3 = vadd.f32 1.0, %v3520_v32 }
 0x221   : > { %3529 = vrcp.f32 %v2760_v15  ;;  %v2787_v25 = vmul.f32 %v3522_v37, %v5104_v18 }
 0x222   : > { %3531 = vrcp.f32 %v2762_v3 }
 0x225   : > { %v3524_v42 = vpop.eup %3523 }
 0x226   : > { %v2788_v22 = vmul.f32 %v3524_v42, %v5166_v49  ;;  %v3526_v61 = vpop.eup %3525 }
 0x227   : > { %v2783_v36 = vmul.f32 %v3526_v61, %v5145_v12 }
 0x228   : > { %v3076_v46 = vpack.c.bf16 %v2788_v22, %v2787_v25 }
 0x229   : > { %v3528_v9 = vpop.eup %3527  ;;  %v2806_v10 = vadd.f32 %v2805_v26, %v2783_v36 }
 0x22a   : > { %v2761_v43 = vadd.f32 1.0, %v3528_v9  ;;  %3080 = vst [vmem:[%s5185_s14 + $0x18] sm:$0xff] %v3076_v46  }
 0x22b   : > { %v3530_v14 = vpop.eup %3529 }
 0x22c   : > { %3533 = vrcp.f32 %v2761_v43  ;;  %v2784_v53 = vmul.f32 %v3530_v14, %v2728_v50  ;;  %v3532_v21 = vpop.eup %3531 }
 0x22d   : > { %v2786_v27 = vmul.f32 %v3532_v21, %v2730_v60 }
 0x22e   : > { %v3066_v34 = vpack.c.bf16 %v2784_v53, %v2783_v36  ;;  %v2807_v28 = vadd.f32 %v2806_v10, %v2784_v53 }
 0x230   : > { %3078 = vst [vmem:[%s5185_s14 + $0x8] sm:$0xff] %v3066_v34  }
 0x236   : > { %v3534_v18 = vpop.eup %3533 }
 0x237   : > { %v2785_v54 = vmul.f32 %v3534_v18, %v2729_v35 }
 0x239   : > { %v3071_v49 = vpack.c.bf16 %v2786_v27, %v2785_v54  ;;  %v2808_v47 = vadd.f32 %v2807_v28, %v2785_v54 }
 0x23b   : > { %3079 = vst [vmem:[%s5185_s14 + $0x10] sm:$0xff] %v3071_v49   ;;  %v2809_v40 = vadd.f32 %v2808_v47, %v2786_v27 }
 0x23d   : > { %v2810_v58 = vadd.f32 %v2809_v40, %v2787_v25 }
 0x23f   : > { %v2811_v17 = vadd.f32 %v2810_v58, %v2788_v22 }
 0x241   : > { %v2812_v39 = vrot.slane %v2811_v17, 4 }
 0x243   : > { %v2813_v59 = vadd.f32 %v2812_v39, %v2811_v17 }
 0x245   : > { %v2814_v12 = vrot.slane %v2813_v59, 2 }
 0x247   : > { %v2815_v38 = vadd.f32 %v2814_v12, %v2813_v59 }
 0x249   : > { %v2816_v11 = vrot.slane %v2815_v38, 1 }
 0x24b   : > { %v2817_v33 = vadd.f32 %v2816_v11, %v2815_v38 }
 0x24d   : > { %2818 = vst [vmem:[%s345_s17] sm:$0x1] %v2817_v33 }
 0x24e PF: > { %s19_s29 = sadd.s32 1, %s3559_s29   ;;  %s5495_s27 = smov %s3555_s28 }
 0x24f   : > { %p16_p5 = scmp.ge.s32.totalorder %s19_s29, 4   ;;  %s5496_s28 = smov %s5498_s30 }
 0x251   :  { %18 = sbr.rel (!%p16_p5) target bundleno = 2 (0x2), region = 98 }

</bundles_post_ra>
